<compile_context>
chip_gen: v7x
topology: tpu7x:2x2x1
jax: 0.10.0
libtpu: 0.0.40
codegen_flags: <defaults>
</compile_context>

<pallas_src>
import functools
import math

import numpy as np
import jax
import jax.numpy as jnp
from jax import lax
from jax.experimental import pallas as pl
from jax.experimental.pallas import tpu as pltpu


# Default module config: (in_c, out_c, kernel, stride, padding) per conv layer.
CONV_CFG = [(1, 64, 4, 2, 1), (64, 128, 4, 2, 1)]
FC_IN = 128 * 7 * 7


def _disc_fused_kernel(cols1_ref, w1_ref, sel_ref, w2_ref, b2_ref, fw_ref,
                       fb_ref, o_ref, *, ntaps):
    """Per-image fused conv1+ReLU -> conv2+ReLU -> FC, everything VMEM-resident.

    cols1_ref: [PH*PW, k*k+1]   conv1 im2col rows over this image's zero-padded
                                16x16 grid; last column = 1.0 flag (folds bias).
    w1_ref   : [k*k+1, C1]      conv1 weight (rows (kh,kw)) with bias last row.
    sel_ref  : [k*k, H2*W2, PH*PW] bf16 0/1 gather matrices (trace-time const).
    w2_ref   : [k*k, C1, C2]    conv2 weight per tap.
    b2_ref   : [1, C2],  fw_ref: [H2*W2, C2] (FC weight permuted to (h,w,c)),
    fb_ref   : [1, 1].
    o_ref    : [1, 8, 128]      lane-dense logit tile for this image.
    """
    # ---- conv1 + bias + ReLU (one small f32 MXU matmul; never touches HBM).
    p = jnp.maximum(
        jnp.dot(cols1_ref[...], w1_ref[...], preferred_element_type=jnp.float32),
        0.0)                                                   # [PH*PW, C1]
    p_bf = p.astype(jnp.bfloat16)                              # gather operand

    # ---- conv2: gather-by-matmul with hoisted 0/1 sel (bf16, exact) then w2.
    acc = jnp.zeros((sel_ref.shape[1], w2_ref.shape[2]), jnp.float32)  # [49, C2]
    for t in range(ntaps):
        tap = jnp.dot(sel_ref[t], p_bf,
                      preferred_element_type=jnp.float32)      # [49, C1] exact copy
        acc = acc + jnp.dot(tap, w2_ref[t],
                            preferred_element_type=jnp.float32)  # [49, C2]
    a2 = jnp.maximum(acc + b2_ref[...], 0.0)                   # [49, C2], lane-dense

    # ---- FC: per-image VPU multiply + reduce (no MXU, no segment mask).
    per_chan = jnp.sum(a2 * fw_ref[...], axis=0, keepdims=True)       # [1, C2]
    logit = jnp.sum(per_chan, axis=1, keepdims=True) + fb_ref[...]    # [1, 1]
    o_ref[...] = jnp.broadcast_to(logit.reshape(1, 1, 1), o_ref.shape)


def discriminator_forward(params, img, conv_cfg=CONV_CFG):
    """Full Discriminator forward as a single fused, image-gridded Pallas kernel."""
    (w1, b1), (w2, b2) = params["conv"]
    fw, fb = params["fc"]
    (cin1, c1, k1, s1, p1), (cin2, c2, k2, s2, p2) = conv_cfg
    assert (cin1, k1, s1, p1, k2, s2, p2) == (1, 4, 2, 1, 4, 2, 1), \
        "fused kernel specialised to the module's default conv config"
    N, Cin, H, W = img.shape
    assert Cin == cin1 and w1.shape == (c1, cin1, k1, k1) and w2.shape == (c2, cin2, k2, k2)
    K = k1
    H1 = (H + 2 * p1 - K) // s1 + 1
    W1 = (W + 2 * p1 - K) // s1 + 1
    H2 = (H1 + 2 * p2 - K) // s2 + 1
    W2 = (W1 + 2 * p2 - K) // s2 + 1
    PH, PW = H1 + 2 * p2, W1 + 2 * p2          # conv1 activation padded for conv2
    rows1 = PH * PW                             # per-image padded conv1 rows (256)
    rows2 = H2 * W2                             # per-image conv2 rows (49)
    assert fw.shape == (c2 * rows2, 1)

    # ---------- tiny wrapper-side prep (all heavy lifting happens in-kernel) ----------
    # conv1 im2col on the raw input, columns ordered (kh,kw) to match
    # w1.reshape(C1, K*K); trailing 1.0 "bias flag" column; then zero-pad the
    # (h,w) grid by 1 so border rows are exactly conv2's zero padding.
    xp = jnp.pad(img[:, 0], ((0, 0), (p1, p1), (p1, p1)))                 # [N, H+2, W+2]
    pats = [xp[:, kh:kh + s1 * H1:s1, kw:kw + s1 * W1:s1]
            for kh in range(K) for kw in range(K)]                        # each [N,H1,W1]
    cols1 = jnp.stack(pats, axis=-1)                                      # [N,H1,W1,K*K]
    cols1 = jnp.concatenate([cols1, jnp.ones((N, H1, W1, 1), cols1.dtype)], axis=-1)
    cols1 = jnp.pad(cols1, ((0, 0), (p2, p2), (p2, p2), (0, 0)))          # [N,PH,PW,K*K+1]
    cols1 = cols1.reshape(N * rows1, K * K + 1)

    w1aug = jnp.concatenate([w1.reshape(c1, K * K).T, b1.reshape(1, c1)], axis=0)
    w2k = jnp.transpose(w2, (2, 3, 1, 0)).reshape(K * K, c1, c2)          # [(kh,kw),cin,cout]
    b2row = b2.reshape(1, c2)
    # FC weight: PyTorch flattens NCHW => index (c,h,w). Our activation rows are
    # (h,w) with channels on lanes, so permute the weight to (h,w,c) once; the
    # same block is shared by every image (no per-image tiling).
    fw2d = fw.reshape(c2, H2, W2).transpose(1, 2, 0).reshape(rows2, c2)
    fb11 = fb.reshape(1, 1)

    # Hoisted 0/1 gather matrices (trace-time numpy constant, shared by every
    # grid step): sel[t, r, q] = 1 iff padded-grid row q is tap t of output row r.
    r = np.arange(rows2)
    ho, wo = r // W2, r % W2
    sel_np = np.zeros((K * K, rows2, rows1), np.float32)
    for t in range(K * K):
        kh, kw = t // K, t % K
        q = (s2 * ho + kh) * PW + (s2 * wo + kw)
        sel_np[t, r, q] = 1.0
    sel = jnp.asarray(sel_np, jnp.bfloat16)

    kern = functools.partial(_disc_fused_kernel, ntaps=K * K)
    out3 = pl.pallas_call(
        kern,
        out_shape=jax.ShapeDtypeStruct((N, 8, 128), jnp.float32),
        grid=(N,),
        in_specs=[
            pl.BlockSpec((rows1, K * K + 1), lambda i: (i, 0)),     # per-image cols1
            pl.BlockSpec((K * K + 1, c1), lambda i: (0, 0)),        # conv1 weight (shared)
            pl.BlockSpec((K * K, rows2, rows1), lambda i: (0, 0, 0)),  # sel (shared)
            pl.BlockSpec((K * K, c1, c2), lambda i: (0, 0, 0)),     # conv2 weight (shared)
            pl.BlockSpec((1, c2), lambda i: (0, 0)),                # conv2 bias
            pl.BlockSpec((rows2, c2), lambda i: (0, 0)),            # FC weight (shared)
            pl.BlockSpec((1, 1), lambda i: (0, 0)),                 # FC bias
        ],
        out_specs=pl.BlockSpec((1, 8, 128), lambda i: (i, 0, 0)),
        compiler_params=pltpu.CompilerParams(
            # Image axis is independent -> shards across v7x's 2 TensorCores.
            # Per-step VMEM ~2 MiB, so no vmem_limit_bytes override is required
            # on any of v5e/v6e/v7x even with multi-image blocks.
            dimension_semantics=("parallel",)),
    )(cols1, w1aug, sel, w2k, b2row, fw2d, fb11)
    return out3[:, 0, :1]                                             # [N, 1] logits


def reference_forward(params, img, conv_cfg=CONV_CFG):
    """Pure-XLA reference (PyTorch semantics) for correctness checking."""
    x = img
    for (w, b), (_ci, _co, _k, s, p) in zip(params["conv"], conv_cfg):
        x = lax.conv_general_dilated(x, w, (s, s), ((p, p), (p, p)),
                                     dimension_numbers=("NCHW", "OIHW", "NCHW"),
                                     precision=lax.Precision.HIGHEST)
        x = jnp.maximum(x + b.reshape(1, -1, 1, 1), 0.0)
    flat = x.reshape(x.shape[0], -1)
    fw, fb = params["fc"]
    return jnp.dot(flat, fw, precision=lax.Precision.HIGHEST) + fb


def init_params(key, conv_cfg, fc_in):
    """Deterministic init mirroring PyTorch default uniform(-1/sqrt(fan_in))."""
    params = {"conv": [], "fc": None}
    for (cin, cout, k, _s, _p) in conv_cfg:
        key, kw, kb = jax.random.split(key, 3)
        bound = 1.0 / math.sqrt(cin * k * k)
        w = jax.random.uniform(kw, (cout, cin, k, k), jnp.float32, -bound, bound)
        b = jax.random.uniform(kb, (cout,), jnp.float32, -bound, bound)
        params["conv"].append((w, b))
    key, kw, kb = jax.random.split(key, 3)
    bound = 1.0 / math.sqrt(fc_in)
    fw = jax.random.uniform(kw, (fc_in, 1), jnp.float32, -bound, bound)
    fb = jax.random.uniform(kb, (1,), jnp.float32, -bound, bound)
    params["fc"] = (fw, fb)
    return params


if __name__ == "__main__":
    # Default module config implies 1x28x28 inputs (MNIST-like); batch = 2.
    key = jax.random.PRNGKey(0)
    kimg, kparams = jax.random.split(key)
    img = jax.random.normal(kimg, (2, 1, 28, 28), jnp.float32)
    params = init_params(kparams, CONV_CFG, FC_IN)

    fwd = jax.jit(discriminator_forward)
    out = jax.block_until_ready(fwd(params, img))
    assert out.shape == (2, 1) and out.dtype == jnp.float32

    ref = jax.block_until_ready(jax.jit(reference_forward)(params, img))
    assert jnp.allclose(out, ref, atol=5e-3, rtol=5e-2), (out, ref)
    print("KERNEL_OK")
</pallas_src>

<mosaic_0001>
module attributes {stable_mosaic.version = 11 : i64} {
  func.func @_disc_fused_kernel(%arg0: i32, %arg1: memref<256x17xf32, #tpu.memory_space<vmem>>, %arg2: memref<17x64xf32, #tpu.memory_space<vmem>>, %arg3: memref<16x49x256xbf16, #tpu.memory_space<vmem>>, %arg4: memref<16x64x128xf32, #tpu.memory_space<vmem>>, %arg5: memref<1x128xf32, #tpu.memory_space<vmem>>, %arg6: memref<49x128xf32, #tpu.memory_space<vmem>>, %arg7: memref<1x1xf32, #tpu.memory_space<vmem>>, %arg8: memref<1x8x128xf32, #tpu.memory_space<vmem>>) attributes {dimension_semantics = [#tpu.dimension_semantics<parallel>], iteration_bounds = array<i64: 2>, scalar_prefetch = 0 : i64, scratch_operands = 0 : i64, tpu.core_type = #tpu.core_type<tc>, window_params = [{transform_indices = @transform_0, window_bounds = array<i64: 256, 17>}, {pipeline_mode = #tpu.pipeline_mode<synchronous>, transform_indices = @transform_1, window_bounds = array<i64: 17, 64>}, {pipeline_mode = #tpu.pipeline_mode<synchronous>, transform_indices = @transform_2, window_bounds = array<i64: 16, 49, 256>}, {pipeline_mode = #tpu.pipeline_mode<synchronous>, transform_indices = @transform_3, window_bounds = array<i64: 16, 64, 128>}, {pipeline_mode = #tpu.pipeline_mode<synchronous>, transform_indices = @transform_4, window_bounds = array<i64: 1, 128>}, {pipeline_mode = #tpu.pipeline_mode<synchronous>, transform_indices = @transform_5, window_bounds = array<i64: 49, 128>}, {pipeline_mode = #tpu.pipeline_mode<synchronous>, transform_indices = @transform_6, window_bounds = array<i64: 1, 1>}, {transform_indices = @transform_7, window_bounds = array<i64: 1, 8, 128>}]} {
    %c0 = arith.constant 0 : index
    %c0_0 = arith.constant 0 : index
    %0 = vector.load %arg1[%c0, %c0_0] : memref<256x17xf32, #tpu.memory_space<vmem>>, vector<256x17xf32>
    %c0_1 = arith.constant 0 : index
    %c0_2 = arith.constant 0 : index
    %1 = vector.load %arg2[%c0_1, %c0_2] : memref<17x64xf32, #tpu.memory_space<vmem>>, vector<17x64xf32>
    %cst = arith.constant dense<0.000000e+00> : vector<256x64xf32>
    %2 = tpu.matmul %0, %1, %cst {dimension_numbers = #tpu.dot_dimension_numbers<[1], [0], [0], [1], [0, 0, 1, 1], [], []>} : vector<256x17xf32>, vector<17x64xf32>, vector<256x64xf32> -> vector<256x64xf32>
    %cst_3 = arith.constant 0.000000e+00 : f32
    %3 = vector.broadcast %cst_3 : f32 to vector<256x64xf32>
    %4 = arith.maximumf %2, %3 : vector<256x64xf32>
    %5 = arith.truncf %4 : vector<256x64xf32> to vector<256x64xbf16>
    %cst_4 = arith.constant 0.000000e+00 : f32
    %6 = vector.broadcast %cst_4 : f32 to vector<49x128xf32>
    %c0_5 = arith.constant 0 : index
    %c0_6 = arith.constant 0 : index
    %c0_7 = arith.constant 0 : index
    %7 = vector.load %arg3[%c0_5, %c0_6, %c0_7] : memref<16x49x256xbf16, #tpu.memory_space<vmem>>, vector<1x49x256xbf16>
    %8 = vector.shape_cast %7 : vector<1x49x256xbf16> to vector<49x256xbf16>
    %cst_8 = arith.constant dense<0.000000e+00> : vector<49x64xf32>
    %9 = tpu.matmul %8, %5, %cst_8 {dimension_numbers = #tpu.dot_dimension_numbers<[1], [0], [0], [1], [0, 0, 1, 1], [], []>} : vector<49x256xbf16>, vector<256x64xbf16>, vector<49x64xf32> -> vector<49x64xf32>
    %c0_9 = arith.constant 0 : index
    %c0_10 = arith.constant 0 : index
    %c0_11 = arith.constant 0 : index
    %10 = vector.load %arg4[%c0_9, %c0_10, %c0_11] : memref<16x64x128xf32, #tpu.memory_space<vmem>>, vector<1x64x128xf32>
    %11 = vector.shape_cast %10 : vector<1x64x128xf32> to vector<64x128xf32>
    %cst_12 = arith.constant dense<0.000000e+00> : vector<49x128xf32>
    %12 = tpu.matmul %9, %11, %cst_12 {dimension_numbers = #tpu.dot_dimension_numbers<[1], [0], [0], [1], [0, 0, 1, 1], [], []>} : vector<49x64xf32>, vector<64x128xf32>, vector<49x128xf32> -> vector<49x128xf32>
    %13 = arith.addf %6, %12 : vector<49x128xf32>
    %c1 = arith.constant 1 : index
    %c0_13 = arith.constant 0 : index
    %c0_14 = arith.constant 0 : index
    %14 = vector.load %arg3[%c1, %c0_13, %c0_14] : memref<16x49x256xbf16, #tpu.memory_space<vmem>>, vector<1x49x256xbf16>
    %15 = vector.shape_cast %14 : vector<1x49x256xbf16> to vector<49x256xbf16>
    %cst_15 = arith.constant dense<0.000000e+00> : vector<49x64xf32>
    %16 = tpu.matmul %15, %5, %cst_15 {dimension_numbers = #tpu.dot_dimension_numbers<[1], [0], [0], [1], [0, 0, 1, 1], [], []>} : vector<49x256xbf16>, vector<256x64xbf16>, vector<49x64xf32> -> vector<49x64xf32>
    %c1_16 = arith.constant 1 : index
    %c0_17 = arith.constant 0 : index
    %c0_18 = arith.constant 0 : index
    %17 = vector.load %arg4[%c1_16, %c0_17, %c0_18] : memref<16x64x128xf32, #tpu.memory_space<vmem>>, vector<1x64x128xf32>
    %18 = vector.shape_cast %17 : vector<1x64x128xf32> to vector<64x128xf32>
    %cst_19 = arith.constant dense<0.000000e+00> : vector<49x128xf32>
    %19 = tpu.matmul %16, %18, %cst_19 {dimension_numbers = #tpu.dot_dimension_numbers<[1], [0], [0], [1], [0, 0, 1, 1], [], []>} : vector<49x64xf32>, vector<64x128xf32>, vector<49x128xf32> -> vector<49x128xf32>
    %20 = arith.addf %13, %19 : vector<49x128xf32>
    %c2 = arith.constant 2 : index
    %c0_20 = arith.constant 0 : index
    %c0_21 = arith.constant 0 : index
    %21 = vector.load %arg3[%c2, %c0_20, %c0_21] : memref<16x49x256xbf16, #tpu.memory_space<vmem>>, vector<1x49x256xbf16>
    %22 = vector.shape_cast %21 : vector<1x49x256xbf16> to vector<49x256xbf16>
    %cst_22 = arith.constant dense<0.000000e+00> : vector<49x64xf32>
    %23 = tpu.matmul %22, %5, %cst_22 {dimension_numbers = #tpu.dot_dimension_numbers<[1], [0], [0], [1], [0, 0, 1, 1], [], []>} : vector<49x256xbf16>, vector<256x64xbf16>, vector<49x64xf32> -> vector<49x64xf32>
    %c2_23 = arith.constant 2 : index
    %c0_24 = arith.constant 0 : index
    %c0_25 = arith.constant 0 : index
    %24 = vector.load %arg4[%c2_23, %c0_24, %c0_25] : memref<16x64x128xf32, #tpu.memory_space<vmem>>, vector<1x64x128xf32>
    %25 = vector.shape_cast %24 : vector<1x64x128xf32> to vector<64x128xf32>
    %cst_26 = arith.constant dense<0.000000e+00> : vector<49x128xf32>
    %26 = tpu.matmul %23, %25, %cst_26 {dimension_numbers = #tpu.dot_dimension_numbers<[1], [0], [0], [1], [0, 0, 1, 1], [], []>} : vector<49x64xf32>, vector<64x128xf32>, vector<49x128xf32> -> vector<49x128xf32>
    %27 = arith.addf %20, %26 : vector<49x128xf32>
    %c3 = arith.constant 3 : index
    %c0_27 = arith.constant 0 : index
    %c0_28 = arith.constant 0 : index
    %28 = vector.load %arg3[%c3, %c0_27, %c0_28] : memref<16x49x256xbf16, #tpu.memory_space<vmem>>, vector<1x49x256xbf16>
    %29 = vector.shape_cast %28 : vector<1x49x256xbf16> to vector<49x256xbf16>
    %cst_29 = arith.constant dense<0.000000e+00> : vector<49x64xf32>
    %30 = tpu.matmul %29, %5, %cst_29 {dimension_numbers = #tpu.dot_dimension_numbers<[1], [0], [0], [1], [0, 0, 1, 1], [], []>} : vector<49x256xbf16>, vector<256x64xbf16>, vector<49x64xf32> -> vector<49x64xf32>
    %c3_30 = arith.constant 3 : index
    %c0_31 = arith.constant 0 : index
    %c0_32 = arith.constant 0 : index
    %31 = vector.load %arg4[%c3_30, %c0_31, %c0_32] : memref<16x64x128xf32, #tpu.memory_space<vmem>>, vector<1x64x128xf32>
    %32 = vector.shape_cast %31 : vector<1x64x128xf32> to vector<64x128xf32>
    %cst_33 = arith.constant dense<0.000000e+00> : vector<49x128xf32>
    %33 = tpu.matmul %30, %32, %cst_33 {dimension_numbers = #tpu.dot_dimension_numbers<[1], [0], [0], [1], [0, 0, 1, 1], [], []>} : vector<49x64xf32>, vector<64x128xf32>, vector<49x128xf32> -> vector<49x128xf32>
    %34 = arith.addf %27, %33 : vector<49x128xf32>
    %c4 = arith.constant 4 : index
    %c0_34 = arith.constant 0 : index
    %c0_35 = arith.constant 0 : index
    %35 = vector.load %arg3[%c4, %c0_34, %c0_35] : memref<16x49x256xbf16, #tpu.memory_space<vmem>>, vector<1x49x256xbf16>
    %36 = vector.shape_cast %35 : vector<1x49x256xbf16> to vector<49x256xbf16>
    %cst_36 = arith.constant dense<0.000000e+00> : vector<49x64xf32>
    %37 = tpu.matmul %36, %5, %cst_36 {dimension_numbers = #tpu.dot_dimension_numbers<[1], [0], [0], [1], [0, 0, 1, 1], [], []>} : vector<49x256xbf16>, vector<256x64xbf16>, vector<49x64xf32> -> vector<49x64xf32>
    %c4_37 = arith.constant 4 : index
    %c0_38 = arith.constant 0 : index
    %c0_39 = arith.constant 0 : index
    %38 = vector.load %arg4[%c4_37, %c0_38, %c0_39] : memref<16x64x128xf32, #tpu.memory_space<vmem>>, vector<1x64x128xf32>
    %39 = vector.shape_cast %38 : vector<1x64x128xf32> to vector<64x128xf32>
    %cst_40 = arith.constant dense<0.000000e+00> : vector<49x128xf32>
    %40 = tpu.matmul %37, %39, %cst_40 {dimension_numbers = #tpu.dot_dimension_numbers<[1], [0], [0], [1], [0, 0, 1, 1], [], []>} : vector<49x64xf32>, vector<64x128xf32>, vector<49x128xf32> -> vector<49x128xf32>
    %41 = arith.addf %34, %40 : vector<49x128xf32>
    %c5 = arith.constant 5 : index
    %c0_41 = arith.constant 0 : index
    %c0_42 = arith.constant 0 : index
    %42 = vector.load %arg3[%c5, %c0_41, %c0_42] : memref<16x49x256xbf16, #tpu.memory_space<vmem>>, vector<1x49x256xbf16>
    %43 = vector.shape_cast %42 : vector<1x49x256xbf16> to vector<49x256xbf16>
    %cst_43 = arith.constant dense<0.000000e+00> : vector<49x64xf32>
    %44 = tpu.matmul %43, %5, %cst_43 {dimension_numbers = #tpu.dot_dimension_numbers<[1], [0], [0], [1], [0, 0, 1, 1], [], []>} : vector<49x256xbf16>, vector<256x64xbf16>, vector<49x64xf32> -> vector<49x64xf32>
    %c5_44 = arith.constant 5 : index
    %c0_45 = arith.constant 0 : index
    %c0_46 = arith.constant 0 : index
    %45 = vector.load %arg4[%c5_44, %c0_45, %c0_46] : memref<16x64x128xf32, #tpu.memory_space<vmem>>, vector<1x64x128xf32>
    %46 = vector.shape_cast %45 : vector<1x64x128xf32> to vector<64x128xf32>
    %cst_47 = arith.constant dense<0.000000e+00> : vector<49x128xf32>
    %47 = tpu.matmul %44, %46, %cst_47 {dimension_numbers = #tpu.dot_dimension_numbers<[1], [0], [0], [1], [0, 0, 1, 1], [], []>} : vector<49x64xf32>, vector<64x128xf32>, vector<49x128xf32> -> vector<49x128xf32>
    %48 = arith.addf %41, %47 : vector<49x128xf32>
    %c6 = arith.constant 6 : index
    %c0_48 = arith.constant 0 : index
    %c0_49 = arith.constant 0 : index
    %49 = vector.load %arg3[%c6, %c0_48, %c0_49] : memref<16x49x256xbf16, #tpu.memory_space<vmem>>, vector<1x49x256xbf16>
    %50 = vector.shape_cast %49 : vector<1x49x256xbf16> to vector<49x256xbf16>
    %cst_50 = arith.constant dense<0.000000e+00> : vector<49x64xf32>
    %51 = tpu.matmul %50, %5, %cst_50 {dimension_numbers = #tpu.dot_dimension_numbers<[1], [0], [0], [1], [0, 0, 1, 1], [], []>} : vector<49x256xbf16>, vector<256x64xbf16>, vector<49x64xf32> -> vector<49x64xf32>
    %c6_51 = arith.constant 6 : index
    %c0_52 = arith.constant 0 : index
    %c0_53 = arith.constant 0 : index
    %52 = vector.load %arg4[%c6_51, %c0_52, %c0_53] : memref<16x64x128xf32, #tpu.memory_space<vmem>>, vector<1x64x128xf32>
    %53 = vector.shape_cast %52 : vector<1x64x128xf32> to vector<64x128xf32>
    %cst_54 = arith.constant dense<0.000000e+00> : vector<49x128xf32>
    %54 = tpu.matmul %51, %53, %cst_54 {dimension_numbers = #tpu.dot_dimension_numbers<[1], [0], [0], [1], [0, 0, 1, 1], [], []>} : vector<49x64xf32>, vector<64x128xf32>, vector<49x128xf32> -> vector<49x128xf32>
    %55 = arith.addf %48, %54 : vector<49x128xf32>
    %c7 = arith.constant 7 : index
    %c0_55 = arith.constant 0 : index
    %c0_56 = arith.constant 0 : index
    %56 = vector.load %arg3[%c7, %c0_55, %c0_56] : memref<16x49x256xbf16, #tpu.memory_space<vmem>>, vector<1x49x256xbf16>
    %57 = vector.shape_cast %56 : vector<1x49x256xbf16> to vector<49x256xbf16>
    %cst_57 = arith.constant dense<0.000000e+00> : vector<49x64xf32>
    %58 = tpu.matmul %57, %5, %cst_57 {dimension_numbers = #tpu.dot_dimension_numbers<[1], [0], [0], [1], [0, 0, 1, 1], [], []>} : vector<49x256xbf16>, vector<256x64xbf16>, vector<49x64xf32> -> vector<49x64xf32>
    %c7_58 = arith.constant 7 : index
    %c0_59 = arith.constant 0 : index
    %c0_60 = arith.constant 0 : index
    %59 = vector.load %arg4[%c7_58, %c0_59, %c0_60] : memref<16x64x128xf32, #tpu.memory_space<vmem>>, vector<1x64x128xf32>
    %60 = vector.shape_cast %59 : vector<1x64x128xf32> to vector<64x128xf32>
    %cst_61 = arith.constant dense<0.000000e+00> : vector<49x128xf32>
    %61 = tpu.matmul %58, %60, %cst_61 {dimension_numbers = #tpu.dot_dimension_numbers<[1], [0], [0], [1], [0, 0, 1, 1], [], []>} : vector<49x64xf32>, vector<64x128xf32>, vector<49x128xf32> -> vector<49x128xf32>
    %62 = arith.addf %55, %61 : vector<49x128xf32>
    %c8 = arith.constant 8 : index
    %c0_62 = arith.constant 0 : index
    %c0_63 = arith.constant 0 : index
    %63 = vector.load %arg3[%c8, %c0_62, %c0_63] : memref<16x49x256xbf16, #tpu.memory_space<vmem>>, vector<1x49x256xbf16>
    %64 = vector.shape_cast %63 : vector<1x49x256xbf16> to vector<49x256xbf16>
    %cst_64 = arith.constant dense<0.000000e+00> : vector<49x64xf32>
    %65 = tpu.matmul %64, %5, %cst_64 {dimension_numbers = #tpu.dot_dimension_numbers<[1], [0], [0], [1], [0, 0, 1, 1], [], []>} : vector<49x256xbf16>, vector<256x64xbf16>, vector<49x64xf32> -> vector<49x64xf32>
    %c8_65 = arith.constant 8 : index
    %c0_66 = arith.constant 0 : index
    %c0_67 = arith.constant 0 : index
    %66 = vector.load %arg4[%c8_65, %c0_66, %c0_67] : memref<16x64x128xf32, #tpu.memory_space<vmem>>, vector<1x64x128xf32>
    %67 = vector.shape_cast %66 : vector<1x64x128xf32> to vector<64x128xf32>
    %cst_68 = arith.constant dense<0.000000e+00> : vector<49x128xf32>
    %68 = tpu.matmul %65, %67, %cst_68 {dimension_numbers = #tpu.dot_dimension_numbers<[1], [0], [0], [1], [0, 0, 1, 1], [], []>} : vector<49x64xf32>, vector<64x128xf32>, vector<49x128xf32> -> vector<49x128xf32>
    %69 = arith.addf %62, %68 : vector<49x128xf32>
    %c9 = arith.constant 9 : index
    %c0_69 = arith.constant 0 : index
    %c0_70 = arith.constant 0 : index
    %70 = vector.load %arg3[%c9, %c0_69, %c0_70] : memref<16x49x256xbf16, #tpu.memory_space<vmem>>, vector<1x49x256xbf16>
    %71 = vector.shape_cast %70 : vector<1x49x256xbf16> to vector<49x256xbf16>
    %cst_71 = arith.constant dense<0.000000e+00> : vector<49x64xf32>
    %72 = tpu.matmul %71, %5, %cst_71 {dimension_numbers = #tpu.dot_dimension_numbers<[1], [0], [0], [1], [0, 0, 1, 1], [], []>} : vector<49x256xbf16>, vector<256x64xbf16>, vector<49x64xf32> -> vector<49x64xf32>
    %c9_72 = arith.constant 9 : index
    %c0_73 = arith.constant 0 : index
    %c0_74 = arith.constant 0 : index
    %73 = vector.load %arg4[%c9_72, %c0_73, %c0_74] : memref<16x64x128xf32, #tpu.memory_space<vmem>>, vector<1x64x128xf32>
    %74 = vector.shape_cast %73 : vector<1x64x128xf32> to vector<64x128xf32>
    %cst_75 = arith.constant dense<0.000000e+00> : vector<49x128xf32>
    %75 = tpu.matmul %72, %74, %cst_75 {dimension_numbers = #tpu.dot_dimension_numbers<[1], [0], [0], [1], [0, 0, 1, 1], [], []>} : vector<49x64xf32>, vector<64x128xf32>, vector<49x128xf32> -> vector<49x128xf32>
    %76 = arith.addf %69, %75 : vector<49x128xf32>
    %c10 = arith.constant 10 : index
    %c0_76 = arith.constant 0 : index
    %c0_77 = arith.constant 0 : index
    %77 = vector.load %arg3[%c10, %c0_76, %c0_77] : memref<16x49x256xbf16, #tpu.memory_space<vmem>>, vector<1x49x256xbf16>
    %78 = vector.shape_cast %77 : vector<1x49x256xbf16> to vector<49x256xbf16>
    %cst_78 = arith.constant dense<0.000000e+00> : vector<49x64xf32>
    %79 = tpu.matmul %78, %5, %cst_78 {dimension_numbers = #tpu.dot_dimension_numbers<[1], [0], [0], [1], [0, 0, 1, 1], [], []>} : vector<49x256xbf16>, vector<256x64xbf16>, vector<49x64xf32> -> vector<49x64xf32>
    %c10_79 = arith.constant 10 : index
    %c0_80 = arith.constant 0 : index
    %c0_81 = arith.constant 0 : index
    %80 = vector.load %arg4[%c10_79, %c0_80, %c0_81] : memref<16x64x128xf32, #tpu.memory_space<vmem>>, vector<1x64x128xf32>
    %81 = vector.shape_cast %80 : vector<1x64x128xf32> to vector<64x128xf32>
    %cst_82 = arith.constant dense<0.000000e+00> : vector<49x128xf32>
    %82 = tpu.matmul %79, %81, %cst_82 {dimension_numbers = #tpu.dot_dimension_numbers<[1], [0], [0], [1], [0, 0, 1, 1], [], []>} : vector<49x64xf32>, vector<64x128xf32>, vector<49x128xf32> -> vector<49x128xf32>
    %83 = arith.addf %76, %82 : vector<49x128xf32>
    %c11 = arith.constant 11 : index
    %c0_83 = arith.constant 0 : index
    %c0_84 = arith.constant 0 : index
    %84 = vector.load %arg3[%c11, %c0_83, %c0_84] : memref<16x49x256xbf16, #tpu.memory_space<vmem>>, vector<1x49x256xbf16>
    %85 = vector.shape_cast %84 : vector<1x49x256xbf16> to vector<49x256xbf16>
    %cst_85 = arith.constant dense<0.000000e+00> : vector<49x64xf32>
    %86 = tpu.matmul %85, %5, %cst_85 {dimension_numbers = #tpu.dot_dimension_numbers<[1], [0], [0], [1], [0, 0, 1, 1], [], []>} : vector<49x256xbf16>, vector<256x64xbf16>, vector<49x64xf32> -> vector<49x64xf32>
    %c11_86 = arith.constant 11 : index
    %c0_87 = arith.constant 0 : index
    %c0_88 = arith.constant 0 : index
    %87 = vector.load %arg4[%c11_86, %c0_87, %c0_88] : memref<16x64x128xf32, #tpu.memory_space<vmem>>, vector<1x64x128xf32>
    %88 = vector.shape_cast %87 : vector<1x64x128xf32> to vector<64x128xf32>
    %cst_89 = arith.constant dense<0.000000e+00> : vector<49x128xf32>
    %89 = tpu.matmul %86, %88, %cst_89 {dimension_numbers = #tpu.dot_dimension_numbers<[1], [0], [0], [1], [0, 0, 1, 1], [], []>} : vector<49x64xf32>, vector<64x128xf32>, vector<49x128xf32> -> vector<49x128xf32>
    %90 = arith.addf %83, %89 : vector<49x128xf32>
    %c12 = arith.constant 12 : index
    %c0_90 = arith.constant 0 : index
    %c0_91 = arith.constant 0 : index
    %91 = vector.load %arg3[%c12, %c0_90, %c0_91] : memref<16x49x256xbf16, #tpu.memory_space<vmem>>, vector<1x49x256xbf16>
    %92 = vector.shape_cast %91 : vector<1x49x256xbf16> to vector<49x256xbf16>
    %cst_92 = arith.constant dense<0.000000e+00> : vector<49x64xf32>
    %93 = tpu.matmul %92, %5, %cst_92 {dimension_numbers = #tpu.dot_dimension_numbers<[1], [0], [0], [1], [0, 0, 1, 1], [], []>} : vector<49x256xbf16>, vector<256x64xbf16>, vector<49x64xf32> -> vector<49x64xf32>
    %c12_93 = arith.constant 12 : index
    %c0_94 = arith.constant 0 : index
    %c0_95 = arith.constant 0 : index
    %94 = vector.load %arg4[%c12_93, %c0_94, %c0_95] : memref<16x64x128xf32, #tpu.memory_space<vmem>>, vector<1x64x128xf32>
    %95 = vector.shape_cast %94 : vector<1x64x128xf32> to vector<64x128xf32>
    %cst_96 = arith.constant dense<0.000000e+00> : vector<49x128xf32>
    %96 = tpu.matmul %93, %95, %cst_96 {dimension_numbers = #tpu.dot_dimension_numbers<[1], [0], [0], [1], [0, 0, 1, 1], [], []>} : vector<49x64xf32>, vector<64x128xf32>, vector<49x128xf32> -> vector<49x128xf32>
    %97 = arith.addf %90, %96 : vector<49x128xf32>
    %c13 = arith.constant 13 : index
    %c0_97 = arith.constant 0 : index
    %c0_98 = arith.constant 0 : index
    %98 = vector.load %arg3[%c13, %c0_97, %c0_98] : memref<16x49x256xbf16, #tpu.memory_space<vmem>>, vector<1x49x256xbf16>
    %99 = vector.shape_cast %98 : vector<1x49x256xbf16> to vector<49x256xbf16>
    %cst_99 = arith.constant dense<0.000000e+00> : vector<49x64xf32>
    %100 = tpu.matmul %99, %5, %cst_99 {dimension_numbers = #tpu.dot_dimension_numbers<[1], [0], [0], [1], [0, 0, 1, 1], [], []>} : vector<49x256xbf16>, vector<256x64xbf16>, vector<49x64xf32> -> vector<49x64xf32>
    %c13_100 = arith.constant 13 : index
    %c0_101 = arith.constant 0 : index
    %c0_102 = arith.constant 0 : index
    %101 = vector.load %arg4[%c13_100, %c0_101, %c0_102] : memref<16x64x128xf32, #tpu.memory_space<vmem>>, vector<1x64x128xf32>
    %102 = vector.shape_cast %101 : vector<1x64x128xf32> to vector<64x128xf32>
    %cst_103 = arith.constant dense<0.000000e+00> : vector<49x128xf32>
    %103 = tpu.matmul %100, %102, %cst_103 {dimension_numbers = #tpu.dot_dimension_numbers<[1], [0], [0], [1], [0, 0, 1, 1], [], []>} : vector<49x64xf32>, vector<64x128xf32>, vector<49x128xf32> -> vector<49x128xf32>
    %104 = arith.addf %97, %103 : vector<49x128xf32>
    %c14 = arith.constant 14 : index
    %c0_104 = arith.constant 0 : index
    %c0_105 = arith.constant 0 : index
    %105 = vector.load %arg3[%c14, %c0_104, %c0_105] : memref<16x49x256xbf16, #tpu.memory_space<vmem>>, vector<1x49x256xbf16>
    %106 = vector.shape_cast %105 : vector<1x49x256xbf16> to vector<49x256xbf16>
    %cst_106 = arith.constant dense<0.000000e+00> : vector<49x64xf32>
    %107 = tpu.matmul %106, %5, %cst_106 {dimension_numbers = #tpu.dot_dimension_numbers<[1], [0], [0], [1], [0, 0, 1, 1], [], []>} : vector<49x256xbf16>, vector<256x64xbf16>, vector<49x64xf32> -> vector<49x64xf32>
    %c14_107 = arith.constant 14 : index
    %c0_108 = arith.constant 0 : index
    %c0_109 = arith.constant 0 : index
    %108 = vector.load %arg4[%c14_107, %c0_108, %c0_109] : memref<16x64x128xf32, #tpu.memory_space<vmem>>, vector<1x64x128xf32>
    %109 = vector.shape_cast %108 : vector<1x64x128xf32> to vector<64x128xf32>
    %cst_110 = arith.constant dense<0.000000e+00> : vector<49x128xf32>
    %110 = tpu.matmul %107, %109, %cst_110 {dimension_numbers = #tpu.dot_dimension_numbers<[1], [0], [0], [1], [0, 0, 1, 1], [], []>} : vector<49x64xf32>, vector<64x128xf32>, vector<49x128xf32> -> vector<49x128xf32>
    %111 = arith.addf %104, %110 : vector<49x128xf32>
    %c15 = arith.constant 15 : index
    %c0_111 = arith.constant 0 : index
    %c0_112 = arith.constant 0 : index
    %112 = vector.load %arg3[%c15, %c0_111, %c0_112] : memref<16x49x256xbf16, #tpu.memory_space<vmem>>, vector<1x49x256xbf16>
    %113 = vector.shape_cast %112 : vector<1x49x256xbf16> to vector<49x256xbf16>
    %cst_113 = arith.constant dense<0.000000e+00> : vector<49x64xf32>
    %114 = tpu.matmul %113, %5, %cst_113 {dimension_numbers = #tpu.dot_dimension_numbers<[1], [0], [0], [1], [0, 0, 1, 1], [], []>} : vector<49x256xbf16>, vector<256x64xbf16>, vector<49x64xf32> -> vector<49x64xf32>
    %c15_114 = arith.constant 15 : index
    %c0_115 = arith.constant 0 : index
    %c0_116 = arith.constant 0 : index
    %115 = vector.load %arg4[%c15_114, %c0_115, %c0_116] : memref<16x64x128xf32, #tpu.memory_space<vmem>>, vector<1x64x128xf32>
    %116 = vector.shape_cast %115 : vector<1x64x128xf32> to vector<64x128xf32>
    %cst_117 = arith.constant dense<0.000000e+00> : vector<49x128xf32>
    %117 = tpu.matmul %114, %116, %cst_117 {dimension_numbers = #tpu.dot_dimension_numbers<[1], [0], [0], [1], [0, 0, 1, 1], [], []>} : vector<49x64xf32>, vector<64x128xf32>, vector<49x128xf32> -> vector<49x128xf32>
    %118 = arith.addf %111, %117 : vector<49x128xf32>
    %c0_118 = arith.constant 0 : index
    %c0_119 = arith.constant 0 : index
    %119 = vector.load %arg5[%c0_118, %c0_119] : memref<1x128xf32, #tpu.memory_space<vmem>>, vector<1x128xf32>
    %120 = vector.broadcast %119 : vector<1x128xf32> to vector<49x128xf32>
    %121 = arith.addf %118, %120 : vector<49x128xf32>
    %cst_120 = arith.constant 0.000000e+00 : f32
    %122 = vector.broadcast %cst_120 : f32 to vector<49x128xf32>
    %123 = arith.maximumf %121, %122 : vector<49x128xf32>
    %c0_121 = arith.constant 0 : index
    %c0_122 = arith.constant 0 : index
    %124 = vector.load %arg6[%c0_121, %c0_122] : memref<49x128xf32, #tpu.memory_space<vmem>>, vector<49x128xf32>
    %125 = arith.mulf %123, %124 : vector<49x128xf32>
    %cst_123 = arith.constant dense<0.000000e+00> : vector<128xf32>
    %126 = vector.multi_reduction <add>, %125, %cst_123 [0] : vector<49x128xf32> to vector<128xf32>
    %127 = vector.shape_cast %126 : vector<128xf32> to vector<1x128xf32>
    %cst_124 = arith.constant dense<0.000000e+00> : vector<1xf32>
    %128 = vector.multi_reduction <add>, %127, %cst_124 [1] : vector<1x128xf32> to vector<1xf32>
    %129 = vector.shape_cast %128 : vector<1xf32> to vector<1x1xf32>
    %c0_125 = arith.constant 0 : index
    %c0_126 = arith.constant 0 : index
    %130 = vector.load %arg7[%c0_125, %c0_126] : memref<1x1xf32, #tpu.memory_space<vmem>>, vector<1x1xf32>
    %131 = arith.addf %129, %130 : vector<1x1xf32>
    %132 = vector.shape_cast %131 : vector<1x1xf32> to vector<1x1x1xf32>
    %133 = vector.shape_cast %132 : vector<1x1x1xf32> to vector<1x1x1xf32>
    %134 = vector.broadcast %133 : vector<1x1x1xf32> to vector<1x8x128xf32>
    %c0_127 = arith.constant 0 : index
    %c0_128 = arith.constant 0 : index
    %c0_129 = arith.constant 0 : index
    %135 = vector.load %arg8[%c0_127, %c0_128, %c0_129] : memref<1x8x128xf32, #tpu.memory_space<vmem>>, vector<1x8x128xf32>
    tpu.vector_store %arg8[%c0_127, %c0_128, %c0_129], %134 {strides = array<i32>} : memref<1x8x128xf32, #tpu.memory_space<vmem>>, vector<1x8x128xf32>,
    return
  }
  func.func @transform_0(%arg0: i32) -> (i32, i32) {
    %c0_i32 = arith.constant 0 : i32
    %c0_i32_0 = arith.constant 0 : i32
    return %arg0, %c0_i32 : i32, i32
  }
  func.func @transform_1(%arg0: i32) -> (i32, i32) {
    %c0_i32 = arith.constant 0 : i32
    %c0_i32_0 = arith.constant 0 : i32
    %c0_i32_1 = arith.constant 0 : i32
    return %c0_i32, %c0_i32_0 : i32, i32
  }
  func.func @transform_2(%arg0: i32) -> (i32, i32, i32) {
    %c0_i32 = arith.constant 0 : i32
    %c0_i32_0 = arith.constant 0 : i32
    %c0_i32_1 = arith.constant 0 : i32
    %c0_i32_2 = arith.constant 0 : i32
    return %c0_i32, %c0_i32_0, %c0_i32_1 : i32, i32, i32
  }
  func.func @transform_3(%arg0: i32) -> (i32, i32, i32) {
    %c0_i32 = arith.constant 0 : i32
    %c0_i32_0 = arith.constant 0 : i32
    %c0_i32_1 = arith.constant 0 : i32
    %c0_i32_2 = arith.constant 0 : i32
    return %c0_i32, %c0_i32_0, %c0_i32_1 : i32, i32, i32
  }
  func.func @transform_4(%arg0: i32) -> (i32, i32) {
    %c0_i32 = arith.constant 0 : i32
    %c0_i32_0 = arith.constant 0 : i32
    %c0_i32_1 = arith.constant 0 : i32
    return %c0_i32, %c0_i32_0 : i32, i32
  }
  func.func @transform_5(%arg0: i32) -> (i32, i32) {
    %c0_i32 = arith.constant 0 : i32
    %c0_i32_0 = arith.constant 0 : i32
    %c0_i32_1 = arith.constant 0 : i32
    return %c0_i32, %c0_i32_0 : i32, i32
  }
  func.func @transform_6(%arg0: i32) -> (i32, i32) {
    %c0_i32 = arith.constant 0 : i32
    %c0_i32_0 = arith.constant 0 : i32
    %c0_i32_1 = arith.constant 0 : i32
    return %c0_i32, %c0_i32_0 : i32, i32
  }
  func.func @transform_7(%arg0: i32) -> (i32, i32, i32) {
    %c0_i32 = arith.constant 0 : i32
    %c0_i32_0 = arith.constant 0 : i32
    %c0_i32_1 = arith.constant 0 : i32
    return %arg0, %c0_i32, %c0_i32_0 : i32, i32, i32
  }
}

</mosaic_0001>

<bundles_post_ra>
// kernel: discriminator_forward.1
= control target key start
LH: loop header
LB: loop body
LE: loop exit
PB: predicated region body
PF: predicated region fallthrough
CT: control target
= control target key end

     0   :  { %s7237_s26 = smov 0   ;;  %s8868_s0 = inlined_call_operand.vmem [shape: f32[512,17], index: 0, kind: input, shape index: {}]   ;;  %s8869_s1 = inlined_call_operand.vmem [shape: f32[17,64], index: 1, kind: input, shape index: {}]   ;;  %s8870_s2 = inlined_call_operand.vmem [shape: bf16[16,49,256], index: 2, kind: input, shape index: {}]   ;;  %s8871_s3 = inlined_call_operand.vmem [shape: f32[16,64,128], index: 3, kind: input, shape index: {}]   ;;  %s8872_s4 = inlined_call_operand.vmem [shape: f32[1,128], index: 4, kind: input, shape index: {}]   ;;  %s8873_s5 = inlined_call_operand.vmem [shape: f32[49,128], index: 5, kind: input, shape index: {}]   ;;  %s8874_s6 = inlined_call_operand.<no memory space> [shape: f32[1,1], index: 6, kind: input, shape index: {}]   ;;  %s8875_s7 = inlined_call_operand.vmem [shape: f32[2,8,128], index: 7, kind: output, shape index: {}]  }
   0x1   :  { %v12_v0 = vstv %s8874_s6 }
   0x2   :  { %13 = vst [vmem:[#allocation2] sm:$0x1] %v12_v0 }
   0x3 LB: > { %s7243_s27 = sadd.s32 4294967295, %s7188_s26   ;;  %p4731_p0 = scmp.ge.s32.totalorder %s7188_s26, 1  ;;  %s7188_s26 = sphi %s7237_s26, %s19_s26  }
   0x4   : > { %p240_p1 = scmp.lt.s32.totalorder %s7188_s26, 3 }
   0x6   : > { %p241_p2 = pnand %p4731_p0, %p240_p1 }
   0x7   : > { %v314_v1 = vld [vmem:[%s8869_s1] sm:$0xff] (!%p241_p2)  ;;  %v315_v2 = vld [vmem:[%s8869_s1 + $0x8] sm:$0xff] (!%p241_p2)  ;;  %v316_v3 = vld [vmem:[%s8869_s1 + $0x10] sm:$0x1] (!%p241_p2)  ;;  %s4732_s10 = sshll.u32 (!%p241_p2), %s7243_s27, 5  ;;  %vm414_vm0 = vcmask (!%p241_p2), 1040384  }
   0x8   : > { %244 = sbr.rel (%p241_p2) target bundleno = 2605 (0xa2d), region = 48  ;;  %v6797_v4 = vpack.c.bf16 (!%p241_p2), %v315_v2, %v314_v1  ;;  %p272_p3 = scmp.lt.s32.totalorder (!%p241_p2), %s4732_s10, 63  ;;  %vm317_vm1 = vcmask (!%p241_p2), 138240   ;;  %v4791_v37 = vld [vmem:[%s8871_s3 + $0x40] sm:$0xff] (!%p241_p2)  ;;  %v4792_v38 = vld [vmem:[%s8871_s3 + $0x48] sm:$0xff] (!%p241_p2)  ;;  %v7190_v40 = vmov (!%p241_p2), 0.0|0.0  }
   0x9   : > { %v6802_v39 = vpack.c.bf16 (!%p241_p2), %v4792_v38, %v4791_v37  ;;  %v4793_v41 = vld [vmem:[%s8871_s3 + $0x50] sm:$0xff] (!%p241_p2)  ;;  %v4794_v42 = vld [vmem:[%s8871_s3 + $0x58] sm:$0xff] (!%p241_p2)  ;;  %v4795_v44 = vld [vmem:[%s8871_s3 + $0x60] sm:$0xff] (!%p241_p2)  ;;  %vm7191_vm2 = vmmov (!%p241_p2), 0   ;;  %vm925_vm3 = vcmask (!%p241_p2), 523264   ;;  %p277_p4 = scmp.lt.s32.totalorder (!%p241_p2), %s7243_s27, 1 }
   0xa   : > { %6798 = vmatprep.subr.bf16.mxu0 (!%p241_p2), %v6797_v4  ;;  %v6805_v43 = vpack.c.bf16 (!%p241_p2), %v4794_v42, %v4793_v41  ;;  %v4796_v45 = vld [vmem:[%s8871_s3 + $0x68] sm:$0xff] (!%p241_p2)  ;;  %v4797_v47 = vld [vmem:[%s8871_s3 + $0x70] sm:$0xff] (!%p241_p2)  ;;  %v4798_v48 = vld [vmem:[%s8871_s3 + $0x78] sm:$0xff] (!%p241_p2) }
   0xb   : > { %6800 = vmatpush3.bf16.msra.mxu0 (!%p241_p2), %v6797_v4  ;;  %v6808_v46 = vpack.c.bf16 (!%p241_p2), %v4796_v45, %v4795_v44  ;;  %v6811_v49 = vpack.c.bf16 (!%p241_p2), %v4798_v48, %v4797_v47  ;;  %v7008_v50 = vld [vmem:[%s8870_s2 + $0x4] ss:$8 sps:$4 sm:$0xff] (!%p241_p2)  }
   0xc   : > { %6155 = vmatprep.subr.msk.mxu0 (!%p241_p2), %vm414_vm0, %v316_v3  ;;  %767 = vmatprep.mubr.bf16.mxu1 (!%p241_p2), %v7008_v50 }
   0xf   : > { %s8877_s10 = smov (!%p272_p3, %s4732_s10), 63  ;;  %6156 = vmatpush3.msk.msra.mxu0 %vm414_vm0, %v316_v3  ;;  %s8879_s27 = smov (!%p277_p4, %s7243_s27), 1 }
  0x10   : > { %s4733_s11 = sshll.u32 %s8877_s10, 3  ;;  %6801 = vmatprep.subr.bf16.mxu0 %v7190_v40  ;;  %s4734_s29 = sshll.u32 %s8879_s27, 3 }
  0x11   : > { %s7261_s14 = scalar_lea.vmem %s8868_s0, %s4733_s11  ;;  %s280_s8 = scalar_lea.vmem %s8875_s7, %s4734_s29 }
  0x12   : > { %v282_v5 = vld [vmem:[%s7261_s14] sm:$0xff]  ;;  %v283_v6 = vld [vmem:[%s7261_s14 + $0x8] sm:$0xff]  ;;  %v284_v7 = vld [vmem:[%s7261_s14 + $0x10] sm:$0xff] }
  0x13   : > { %6157 = vmatprep.mubr.msk.f32.mxu0 %vm317_vm1, %v282_v5  ;;  %v285_v8 = vld [vmem:[%s7261_s14 + $0x18] sm:$0xff]  ;;  %v286_v9 = vld [vmem:[%s7261_s14 + $0x20] sm:$0xff]  ;;  %v287_v10 = vld [vmem:[%s7261_s14 + $0x28] sm:$0xff] }
  0x14   : > { %6158 = vmatmul.mubr.msk.f32.vlgmr.msra.gmra.mrb[0].mxu0 %vm317_vm1, %v283_v6  ;;  %v288_v11 = vld [vmem:[%s7261_s14 + $0x30] sm:$0xff]  ;;  %v289_v12 = vld [vmem:[%s7261_s14 + $0x38] sm:$0xff]  ;;  %v290_v13 = vld [vmem:[%s7261_s14 + $0x40] sm:$0xff] }
  0x15   : > { %6160 = vmatprep.mubr.msk.f32.mxu0 %vm317_vm1, %v284_v7  ;;  %v291_v14 = vld [vmem:[%s7261_s14 + $0x48] sm:$0xff]  ;;  %v292_v15 = vld [vmem:[%s7261_s14 + $0x50] sm:$0xff]  ;;  %v293_v16 = vld [vmem:[%s7261_s14 + $0x58] sm:$0xff]  ;;  %6803 = vmatpush3.bf16.msra.mxu0 %v6802_v39 }
  0x16   : > { %v294_v17 = vld [vmem:[%s7261_s14 + $0x60] sm:$0xff]  ;;  %v295_v18 = vld [vmem:[%s7261_s14 + $0x68] sm:$0xff]  ;;  %v296_v19 = vld [vmem:[%s7261_s14 + $0x70] sm:$0xff]  ;;  %6804 = vmatprep.subr.bf16.mxu0 %v7190_v40 }
  0x17   : > { %v297_v20 = vld [vmem:[%s7261_s14 + $0x78] sm:$0xff]  ;;  %v298_v21 = vld [vmem:[%s7261_s14 + $0x80] sm:$0xff]  ;;  %v299_v22 = vld [vmem:[%s7261_s14 + $0x88] sm:$0xff] }
  0x18   : > { %6161 = vmatmul.mubr.msk.f32.gmra.mrb[2].mxu0 %vm317_vm1, %v285_v8  ;;  %v300_v23 = vld [vmem:[%s7261_s14 + $0x90] sm:$0xff]  ;;  %v301_v24 = vld [vmem:[%s7261_s14 + $0x98] sm:$0xff]  ;;  %v302_v25 = vld [vmem:[%s7261_s14 + $0xa0] sm:$0xff] }
  0x19   : > { %6163 = vmatprep.mubr.msk.f32.mxu0 %vm317_vm1, %v286_v9  ;;  %v303_v26 = vld [vmem:[%s7261_s14 + $0xa8] sm:$0xff]  ;;  %v304_v27 = vld [vmem:[%s7261_s14 + $0xb0] sm:$0xff]  ;;  %v305_v28 = vld [vmem:[%s7261_s14 + $0xb8] sm:$0xff]  ;;  %6806 = vmatpush3.bf16.msra.mxu0 %v6805_v43 }
  0x1a   : > { %v306_v29 = vld [vmem:[%s7261_s14 + $0xc0] sm:$0xff]  ;;  %v307_v30 = vld [vmem:[%s7261_s14 + $0xc8] sm:$0xff]  ;;  %v308_v31 = vld [vmem:[%s7261_s14 + $0xd0] sm:$0xff]  ;;  %6807 = vmatprep.subr.bf16.mxu0 %v7190_v40 }
  0x1b   : > { %v309_v32 = vld [vmem:[%s7261_s14 + $0xd8] sm:$0xff]  ;;  %v310_v33 = vld [vmem:[%s7261_s14 + $0xe0] sm:$0xff]  ;;  %v311_v34 = vld [vmem:[%s7261_s14 + $0xe8] sm:$0xff] }
  0x1c   : > { %6164 = vmatmul.mubr.msk.f32.gmra.mrb[4].mxu0 %vm317_vm1, %v287_v10  ;;  %v312_v35 = vld [vmem:[%s7261_s14 + $0xf0] sm:$0xff]  ;;  %v313_v36 = vld [vmem:[%s7261_s14 + $0xf8] sm:$0xff] }
  0x1d   : > { %6166 = vmatprep.mubr.msk.f32.mxu0 %vm317_vm1, %v288_v11  ;;  %6809 = vmatpush3.bf16.msra.mxu0 %v6808_v46 }
  0x1e   : > { %6810 = vmatprep.subr.bf16.mxu0 %v7190_v40 }
  0x20   : > { %6167 = vmatmul.mubr.msk.f32.gmra.mrb[6].mxu0 %vm317_vm1, %v289_v12 }
  0x21   : > { %6169 = vmatprep.mubr.msk.f32.mxu0 %vm317_vm1, %v290_v13  ;;  %6812 = vmatpush3.bf16.msra.mxu0 %v6811_v49 }
  0x24   : > { %6170 = vmatmul.mubr.msk.f32.gmra.mrb[8].mxu0 %vm317_vm1, %v291_v14 }
  0x25   : > { %6172 = vmatprep.mubr.msk.f32.mxu0 %vm317_vm1, %v292_v15 }
  0x28   : > { %6173 = vmatmul.mubr.msk.f32.gmra.mrb[10].mxu0 %vm317_vm1, %v293_v16 }
  0x29   : > { %6175 = vmatprep.mubr.msk.f32.mxu0 %vm317_vm1, %v294_v17 }
  0x2c   : > { %6176 = vmatmul.mubr.msk.f32.gmra.mrb[12].mxu0 %vm317_vm1, %v295_v18 }
  0x2d   : > { %6178 = vmatprep.mubr.msk.f32.mxu0 %vm317_vm1, %v296_v19 }
  0x30   : > { %6179 = vmatmul.mubr.msk.f32.gmra.mrb[14].mxu0 %vm317_vm1, %v297_v20 }
  0x31   : > { %6181 = vmatprep.mubr.msk.f32.mxu0 %vm317_vm1, %v298_v21 }
  0x34   : > { %6182 = vmatmul.mubr.msk.f32.gmra.mrb[16].mxu0 %vm317_vm1, %v299_v22 }
  0x35   : > { %6184 = vmatprep.mubr.msk.f32.mxu0 %vm317_vm1, %v300_v23 }
  0x38   : > { %6185 = vmatmul.mubr.msk.f32.gmra.mrb[18].mxu0 %vm317_vm1, %v301_v24 }
  0x39   : > { %6187 = vmatprep.mubr.msk.f32.mxu0 %vm317_vm1, %v302_v25 }
  0x3c   : > { %6188 = vmatmul.mubr.msk.f32.gmra.mrb[20].mxu0 %vm317_vm1, %v303_v26 }
  0x3d   : > { %6190 = vmatprep.mubr.msk.f32.mxu0 %vm317_vm1, %v304_v27 }
  0x40   : > { %6191 = vmatmul.mubr.msk.f32.gmra.mrb[22].mxu0 %vm317_vm1, %v305_v28 }
  0x41   : > { %6193 = vmatprep.mubr.msk.f32.mxu0 %vm317_vm1, %v306_v29 }
  0x44   : > { %6194 = vmatmul.mubr.msk.f32.gmra.mrb[24].mxu0 %vm317_vm1, %v307_v30 }
  0x45   : > { %6196 = vmatprep.mubr.msk.f32.mxu0 %vm317_vm1, %v308_v31 }
  0x48   : > { %6197 = vmatmul.mubr.msk.f32.gmra.mrb[26].mxu0 %vm317_vm1, %v309_v32 }
  0x49   : > { %6199 = vmatprep.mubr.msk.f32.mxu0 %vm317_vm1, %v310_v33 }
  0x4c   : > { %6200 = vmatmul.mubr.msk.f32.gmra.mrb[28].mxu0 %vm317_vm1, %v311_v34 }
  0x4d   : > { %6202 = vmatprep.mubr.msk.f32.mxu0 %vm317_vm1, %v312_v35 }
  0x50   : > { %6203 = vmatmul.mubr.msk.f32.gmra.mrb[30].mxu0 %vm317_vm1, %v313_v36 }
  0xe7   : > { %v6159_v51 = vpop.f32.mrb[0].mxu0 }
  0xe8   : > { %v644_v52 = vmax.f32 %v6159_v51, 0.0  ;;  %v484_v53 = vpop.f32.mrb[1].mxu0 }
  0xe9   : > { %v643_v54 = vmax.f32 %v484_v53, 0.0 }
  0xeb   : > { %v7359_v55 = vpack.c.bf16 %v644_v52, %v643_v54  ;;  %v6162_v56 = vpop.f32.mrb[2].mxu0 }
  0xec   : > { %v646_v57 = vmax.f32 %v6162_v56, 0.0  ;;  %v494_v58 = vpop.f32.mrb[3].mxu0 }
  0xed   : > { %v645_v59 = vmax.f32 %v494_v58, 0.0 }
  0xef   : > { %v7361_v60 = vpack.c.bf16 %v646_v57, %v645_v59  ;;  %v6165_v61 = vpop.f32.mrb[4].mxu0 }
  0xf0   : > { %v648_v62 = vmax.f32 %v6165_v61, 0.0  ;;  %v504_v63 = vpop.f32.mrb[5].mxu0 }
  0xf1   : > { %v647_v0 = vmax.f32 %v504_v63, 0.0 }
  0xf3   : > { %v7363_v1 = vpack.c.bf16 %v648_v62, %v647_v0  ;;  %v6168_v2 = vpop.f32.mrb[6].mxu0 }
  0xf4   : > { %v650_v3 = vmax.f32 %v6168_v2, 0.0  ;;  %v514_v4 = vpop.f32.mrb[7].mxu0 }
  0xf5   : > { %v649_v5 = vmax.f32 %v514_v4, 0.0 }
  0xf7   : > { %v7365_v6 = vpack.c.bf16 %v650_v3, %v649_v5  ;;  %v6171_v7 = vpop.f32.mrb[8].mxu0 }
  0xf8   : > { %v652_v8 = vmax.f32 %v6171_v7, 0.0  ;;  %v524_v9 = vpop.f32.mrb[9].mxu0 }
  0xf9   : > { %v651_v10 = vmax.f32 %v524_v9, 0.0  ;;  %v7009_v9 = vld [vmem:[%s8870_s2 + $0x14] ss:$8 sps:$4 sm:$0xff]  }
  0xfb   : > { %v7367_v11 = vpack.c.bf16 %v652_v8, %v651_v10  ;;  %v6174_v12 = vpop.f32.mrb[10].mxu0  ;;  %v7006_v8 = vld [vmem:[%s8870_s2] ss:$8 sps:$4 sm:$0xff]   ;;  %v7011_v10 = vld [vmem:[%s8870_s2 + $0x10] ss:$8 sps:$4 sm:$0xff]  }
  0xfc   : > { %v654_v13 = vmax.f32 %v6174_v12, 0.0  ;;  %v534_v14 = vpop.f32.mrb[11].mxu0  ;;  %v7012_v12 = vld [vmem:[%s8870_s2 + $0x24] ss:$8 sps:$4 sm:$0xff]  }
  0xfd   : > { %v653_v15 = vmax.f32 %v534_v14, 0.0  ;;  %v7014_v14 = vld [vmem:[%s8870_s2 + $0x20] ss:$8 sps:$4 sm:$0xff]  }
  0xff   : > { %v7369_v16 = vpack.c.bf16 %v654_v13, %v653_v15  ;;  %v6177_v17 = vpop.f32.mrb[12].mxu0  ;;  %v697_v13 = vld [vmem:[%s8870_s2 + $0x30] sm:$0x11] }
 0x100   : > { %v656_v18 = vmax.f32 %v6177_v17, 0.0  ;;  %v544_v19 = vpop.f32.mrb[13].mxu0  ;;  %v4775_v15 = vcombine.high %v697_v13, %v697_v13  ;;  %v4774_v17 = vcombine.low %v697_v13, %v697_v13 }
 0x101   : > { %v655_v20 = vmax.f32 %v544_v19, 0.0  ;;  %v799_v19 = vld [vmem:[%s8871_s3] sm:$0xff] }
 0x103   : > { %v7371_v21 = vpack.c.bf16 %v656_v18, %v655_v20  ;;  %v6180_v22 = vpop.f32.mrb[14].mxu0  ;;  %v7019_v18 = vld [vmem:[%s8870_s2 + $0x3c] ss:$8 sps:$4 sm:$0xff]   ;;  %v800_v20 = vld [vmem:[%s8871_s3 + $0x8] sm:$0xff] }
 0x104   : > { %v658_v23 = vmax.f32 %v6180_v22, 0.0  ;;  %v554_v24 = vpop.f32.mrb[15].mxu0  ;;  %v7017_v22 = vld [vmem:[%s8870_s2 + $0x38] ss:$8 sps:$4 sm:$0xff]  }
 0x105   : > { %v657_v25 = vmax.f32 %v554_v24, 0.0  ;;  %v6814_v24 = vpack.c.bf16 %v800_v20, %v799_v19 }
 0x107   : > { %v7373_v26 = vpack.c.bf16 %v658_v23, %v657_v25  ;;  %v6183_v27 = vpop.f32.mrb[16].mxu0  ;;  %v7020_v23 = vld [vmem:[%s8870_s2 + $0x4c] ss:$8 sps:$4 sm:$0xff]  }
 0x108   : > { %v660_v28 = vmax.f32 %v6183_v27, 0.0  ;;  %v564_v29 = vpop.f32.mrb[17].mxu0  ;;  %v801_v25 = vld [vmem:[%s8871_s3 + $0x10] sm:$0xff]  ;;  %v802_v27 = vld [vmem:[%s8871_s3 + $0x18] sm:$0xff] }
 0x109   : > { %v659_v30 = vmax.f32 %v564_v29, 0.0  ;;  %v803_v29 = vld [vmem:[%s8871_s3 + $0x20] sm:$0xff] }
 0x10b   : > { %v7375_v31 = vpack.c.bf16 %v660_v28, %v659_v30  ;;  %v6186_v32 = vpop.f32.mrb[18].mxu0  ;;  %v6817_v28 = vpack.c.bf16 %v802_v27, %v801_v25  ;;  %v804_v30 = vld [vmem:[%s8871_s3 + $0x28] sm:$0xff] }
 0x10c   : > { %v662_v33 = vmax.f32 %v6186_v32, 0.0  ;;  %v574_v34 = vpop.f32.mrb[19].mxu0  ;;  %v7022_v32 = vld [vmem:[%s8870_s2 + $0x48] ss:$8 sps:$4 sm:$0xff]  }
 0x10d   : > { %v661_v35 = vmax.f32 %v574_v34, 0.0  ;;  %5271 = vmatprep.subr.bf16.mxu1 %v7375_v31  ;;  %5381 = vmatprep.subr.bf16.mxu0 %v7375_v31  ;;  %v6820_v34 = vpack.c.bf16 %v804_v30, %v803_v29 }
 0x10e   : > { %5272 = vmatpush3.bf16.msra.mxu1 %v7359_v55 }
 0x10f   : > { %v7380_v36 = vpack.c.bf16 %v662_v33, %v661_v35  ;;  %v6189_v37 = vpop.f32.mrb[20].mxu0  ;;  %v7023_v33 = vld [vmem:[%s8870_s2 + $0x5c] ss:$8 sps:$4 sm:$0xff]   ;;  %v4782_v35 = vld [vmem:[%s8870_s2 + $0x68] sm:$0x11] }
 0x110   : > { %v664_v38 = vmax.f32 %v6189_v37, 0.0  ;;  %v584_v39 = vpop.f32.mrb[21].mxu0  ;;  %v7025_v37 = vld [vmem:[%s8870_s2 + $0x58] ss:$8 sps:$4 sm:$0xff]  }
 0x111   : > { %v663_v41 = vmax.f32 %v584_v39, 0.0  ;;  %5273 = vmatprep.subr.bf16.mxu1 %v7380_v36  ;;  %v4789_v39 = vcombine.low %v4782_v35, %v4782_v35 }
 0x112   : > { %5274 = vmatpush3.bf16.msra.mxu1 %v7361_v60 }
 0x113   : > { %v7384_v42 = vpack.c.bf16 %v664_v38, %v663_v41  ;;  %v6192_v43 = vpop.f32.mrb[22].mxu0  ;;  %v4790_v38 = vcombine.high %v4782_v35, %v4782_v35  ;;  %v805_v41 = vld [vmem:[%s8871_s3 + $0x30] sm:$0xff] }
 0x114   : > { %v666_v44 = vmax.f32 %v6192_v43, 0.0  ;;  %v594_v45 = vpop.f32.mrb[23].mxu0  ;;  %v806_v43 = vld [vmem:[%s8871_s3 + $0x38] sm:$0xff] }
 0x115   : > { %v665_v46 = vmax.f32 %v594_v45, 0.0  ;;  %5275 = vmatprep.subr.bf16.mxu1 %v7384_v42  ;;  %v7192_v45 = vmov 0.0  }
 0x116   : > { %5276 = vmatpush3.bf16.msra.mxu1 %v7363_v1  ;;  %6221 = vmatprep.mubr.msk.f32.mxu0 %vm7191_vm2, %v7192_v45 }
 0x117   : > { %v7388_v47 = vpack.c.bf16 %v666_v44, %v665_v46  ;;  %v6195_v48 = vpop.f32.mrb[24].mxu0  ;;  %v6823_v44 = vpack.c.bf16 %v806_v43, %v805_v41  ;;  %v7030_v41 = vld [vmem:[%s8870_s2 + $0x74] ss:$8 sps:$4 sm:$0xff]  }
 0x118   : > { %v668_v49 = vmax.f32 %v6195_v48, 0.0  ;;  %v604_v50 = vpop.f32.mrb[25].mxu0 }
 0x119   : > { %v667_v51 = vmax.f32 %v604_v50, 0.0  ;;  %5277 = vmatprep.subr.bf16.mxu1 %v7388_v47 }
 0x11a   : > { %5278 = vmatpush3.bf16.msra.mxu1 %v7365_v6 }
 0x11b   : > { %v7392_v52 = vpack.c.bf16 %v668_v49, %v667_v51  ;;  %v6198_v53 = vpop.f32.mrb[26].mxu0 }
 0x11c   : > { %v670_v54 = vmax.f32 %v6198_v53, 0.0  ;;  %v614_v56 = vpop.f32.mrb[27].mxu0 }
 0x11d   : > { %v669_v57 = vmax.f32 %v614_v56, 0.0  ;;  %5279 = vmatprep.subr.bf16.mxu1 %v7392_v52 }
 0x11e   : > { %5280 = vmatpush3.bf16.msra.mxu1 %v7367_v11 }
 0x11f   : > { %v7396_v58 = vpack.c.bf16 %v670_v54, %v669_v57  ;;  %v6201_v59 = vpop.f32.mrb[28].mxu0 }
 0x120   : > { %v672_v61 = vmax.f32 %v6201_v59, 0.0  ;;  %v624_v62 = vpop.f32.mrb[29].mxu0 }
 0x121   : > { %v671_v63 = vmax.f32 %v624_v62, 0.0  ;;  %5281 = vmatprep.subr.bf16.mxu1 %v7396_v58 }
 0x122   : > { %5282 = vmatpush3.bf16.msra.mxu1 %v7369_v16 }
 0x123   : > { %v7400_v0 = vpack.c.bf16 %v672_v61, %v671_v63  ;;  %v6204_v2 = vpop.f32.mrb[30].mxu0 }
 0x124   : > { %v674_v3 = vmax.f32 %v6204_v2, 0.0  ;;  %v634_v4 = vpop.f32.mrb[31].mxu0 }
 0x125   : > { %v673_v5 = vmax.f32 %v634_v4, 0.0  ;;  %5283 = vmatprep.subr.bf16.mxu1 %v7400_v0 }
 0x126   : > { %5284 = vmatpush3.bf16.msra.mxu1 %v7371_v21 }
 0x127   : > { %v7404_v7 = vpack.c.bf16 %v674_v3, %v673_v5 }
 0x129   : > { %5285 = vmatprep.subr.bf16.mxu1 %v7404_v7 }
 0x12a   : > { %5286 = vmatpush3.bf16.msra.mxu1 %v7373_v26 }
 0x12b   : > { %5311 = vmatprep.subr.bf16.mxu1 %v7375_v31 }
 0x12d   : > { %768 = vmatmul.mubr.bf16.vlgmr.msra.gmra.mrb[0].mxu1 %v7006_v8 }
 0x12e   : > { %5312 = vmatpush3.bf16.msra.mxu1 %v7359_v55  ;;  %775 = vmatprep.mubr.bf16.mxu1 %v7009_v9 }
 0x12f   : > { %5313 = vmatprep.subr.bf16.mxu1 %v7380_v36 }
 0x132   : > { %5314 = vmatpush3.bf16.msra.mxu1 %v7361_v60 }
 0x133   : > { %5315 = vmatprep.subr.bf16.mxu1 %v7384_v42 }
 0x135   : > { %776 = vmatmul.mubr.bf16.gmra.mrb[4].mxu1 %v7011_v10 }
 0x136   : > { %5316 = vmatpush3.bf16.msra.mxu1 %v7363_v1  ;;  %783 = vmatprep.mubr.bf16.mxu1 %v7012_v12 }
 0x137   : > { %5317 = vmatprep.subr.bf16.mxu1 %v7388_v47 }
 0x13a   : > { %5318 = vmatpush3.bf16.msra.mxu1 %v7365_v6 }
 0x13b   : > { %5319 = vmatprep.subr.bf16.mxu1 %v7392_v52 }
 0x13d   : > { %784 = vmatmul.mubr.bf16.gmra.mrb[8].mxu1 %v7014_v14 }
 0x13e   : > { %5320 = vmatpush3.bf16.msra.mxu1 %v7367_v11  ;;  %791 = vmatprep.mubr.bf16.mxu1 %v4775_v15 }
 0x13f   : > { %5321 = vmatprep.subr.bf16.mxu1 %v7396_v58 }
 0x142   : > { %5322 = vmatpush3.bf16.msra.mxu1 %v7369_v16 }
 0x143   : > { %5323 = vmatprep.subr.bf16.mxu1 %v7400_v0 }
 0x145   : > { %792 = vmatmul.mubr.bf16.gmra.mrb[12].mxu1 %v4774_v17 }
 0x146   : > { %5324 = vmatpush3.bf16.msra.mxu1 %v7371_v21  ;;  %884 = vmatprep.mubr.bf16.mxu1 %v7019_v18 }
 0x147   : > { %5325 = vmatprep.subr.bf16.mxu1 %v7404_v7 }
 0x14a   : > { %5326 = vmatpush3.bf16.msra.mxu1 %v7373_v26 }
 0x14b   : > { %6813 = vmatprep.subr.bf16.mxu1 %v7190_v40 }
 0x14d   : > { %885 = vmatmul.mubr.bf16.vlgmr.msra.gmra.mrb[16].mxu1 %v7017_v22 }
 0x14e   : > { %892 = vmatprep.mubr.bf16.mxu1 %v7020_v23  ;;  %6815 = vmatpush3.bf16.msra.mxu1 %v6814_v24 }
 0x14f   : > { %6816 = vmatprep.subr.bf16.mxu1 %v7190_v40 }
 0x152   : > { %6818 = vmatpush3.bf16.msra.mxu1 %v6817_v28 }
 0x153   : > { %6819 = vmatprep.subr.bf16.mxu1 %v7190_v40 }
 0x155   : > { %893 = vmatmul.mubr.bf16.gmra.mrb[20].mxu1 %v7022_v32 }
 0x156   : > { %900 = vmatprep.mubr.bf16.mxu1 %v7023_v33  ;;  %6821 = vmatpush3.bf16.msra.mxu1 %v6820_v34 }
 0x157   : > { %6822 = vmatprep.subr.bf16.mxu1 %v7190_v40 }
 0x15a   : > { %6824 = vmatpush3.bf16.msra.mxu1 %v6823_v44 }
 0x15b   : > { %6825 = vmatprep.subr.bf16.mxu1 %v7190_v40 }
 0x15d   : > { %901 = vmatmul.mubr.bf16.gmra.mrb[24].mxu1 %v7025_v37 }
 0x15e   : > { %908 = vmatprep.mubr.bf16.mxu1 %v4790_v38 }
 0x165   : > { %909 = vmatmul.mubr.bf16.gmra.mrb[28].mxu1 %v4789_v39 }
 0x166   : > { %6258 = vmatprep.mubr.msk.f32.mxu1 %vm7191_vm2, %v7192_v45 }
 0x200   : > { %v5287_v46 = vpop.f32.mrb[0].mxu1 }
 0x201   : > { %v5288_v48 = vpop.f32.mrb[1].mxu1 }
 0x202   : > { %v5289_v49 = vadd.f32 %v5288_v48, %v5287_v46  ;;  %v5290_v50 = vpop.f32.mrb[2].mxu1  ;;  %v7028_v48 = vld [vmem:[%s8870_s2 + $0x70] ss:$8 sps:$4 sm:$0xff]  }
 0x203   : > { %v5291_v51 = vpop.f32.mrb[3].mxu1 }
 0x204   : > { %v5292_v53 = vadd.f32 %v5291_v51, %v5290_v50  ;;  %6259 = vmatmul.mubr.msk.f32.vlgmr.msra.gmra.mrb[32].mxu1 %vm925_vm3, %v5289_v49  ;;  %v7031_v49 = vld [vmem:[%s8870_s2 + $0x84] ss:$8 sps:$4 sm:$0xff]   ;;  %v7033_v50 = vld [vmem:[%s8870_s2 + $0x80] ss:$8 sps:$4 sm:$0xff]   ;;  %v7034_v51 = vld [vmem:[%s8870_s2 + $0x94] ss:$8 sps:$4 sm:$0xff]  }
 0x205   : > { %6261 = vmatprep.mubr.msk.f32.mxu1 %vm7191_vm2, %v7192_v45 }
 0x208   : > { %v5293_v54 = vpop.f32.mrb[4].mxu1  ;;  %6262 = vmatmul.mubr.msk.f32.gmra.mrb[34].mxu1 %vm925_vm3, %v5292_v53  ;;  %v4819_v53 = vld [vmem:[%s8870_s2 + $0xa0] sm:$0x11] }
 0x209   : > { %v5294_v56 = vpop.f32.mrb[5].mxu1  ;;  %6264 = vmatprep.mubr.msk.f32.mxu1 %vm7191_vm2, %v7192_v45 }
 0x20a   : > { %v5295_v57 = vadd.f32 %v5294_v56, %v5293_v54  ;;  %v5296_v59 = vpop.f32.mrb[6].mxu1  ;;  %v7036_v54 = vld [vmem:[%s8870_s2 + $0x90] ss:$8 sps:$4 sm:$0xff]   ;;  %v4827_v56 = vcombine.high %v4819_v53, %v4819_v53 }
 0x20b   : > { %v5297_v61 = vpop.f32.mrb[7].mxu1 }
 0x20c   : > { %v5298_v62 = vadd.f32 %v5297_v61, %v5296_v59  ;;  %6265 = vmatmul.mubr.msk.f32.gmra.mrb[36].mxu1 %vm925_vm3, %v5295_v57  ;;  %v4826_v57 = vcombine.low %v4819_v53, %v4819_v53  ;;  %v7041_v59 = vld [vmem:[%s8870_s2 + $0xac] ss:$8 sps:$4 sm:$0xff]   ;;  %v7039_v61 = vld [vmem:[%s8870_s2 + $0xa8] ss:$8 sps:$4 sm:$0xff]  }
 0x20d   : > { %6267 = vmatprep.mubr.msk.f32.mxu1 %vm7191_vm2, %v7192_v45  ;;  %v7077_v53 = vld [vmem:[%s8870_s2 + $0x160] ss:$8 sps:$4 sm:$0xff]  }
 0x210   : > { %v5299_v63 = vpop.f32.mrb[8].mxu1  ;;  %6268 = vmatmul.mubr.msk.f32.gmra.mrb[38].mxu1 %vm925_vm3, %v5298_v62  ;;  %v7042_v62 = vld [vmem:[%s8870_s2 + $0xbc] ss:$8 sps:$4 sm:$0xff]  }
 0x211   : > { %v5300_v2 = vpop.f32.mrb[9].mxu1  ;;  %6270 = vmatprep.mubr.msk.f32.mxu1 %vm7191_vm2, %v7192_v45 }
 0x212   : > { %v5301_v3 = vadd.f32 %v5300_v2, %v5299_v63  ;;  %v5302_v4 = vpop.f32.mrb[10].mxu1  ;;  %v7044_v63 = vld [vmem:[%s8870_s2 + $0xb8] ss:$8 sps:$4 sm:$0xff]   ;;  %v7045_v2 = vld [vmem:[%s8870_s2 + $0xcc] ss:$8 sps:$4 sm:$0xff]  }
 0x213   : > { %v5303_v5 = vpop.f32.mrb[11].mxu1 }
 0x214   : > { %v5304_v8 = vadd.f32 %v5303_v5, %v5302_v4  ;;  %6271 = vmatmul.mubr.msk.f32.gmra.mrb[40].mxu1 %vm925_vm3, %v5301_v3  ;;  %v4849_v3 = vld [vmem:[%s8870_s2 + $0xd8] sm:$0x11]  ;;  %v7047_v4 = vld [vmem:[%s8870_s2 + $0xc8] ss:$8 sps:$4 sm:$0xff]  }
 0x215   : > { %6273 = vmatprep.mubr.msk.f32.mxu1 %vm7191_vm2, %v7192_v45  ;;  %v4857_v5 = vcombine.high %v4849_v3, %v4849_v3 }
 0x218   : > { %v5305_v9 = vpop.f32.mrb[12].mxu1  ;;  %6274 = vmatmul.mubr.msk.f32.gmra.mrb[42].mxu1 %vm925_vm3, %v5304_v8  ;;  %v4856_v8 = vcombine.low %v4849_v3, %v4849_v3 }
 0x219   : > { %v5306_v10 = vpop.f32.mrb[13].mxu1  ;;  %6276 = vmatprep.mubr.msk.f32.mxu1 %vm7191_vm2, %v7192_v45 }
 0x21a   : > { %v5307_v12 = vadd.f32 %v5306_v10, %v5305_v9  ;;  %v5308_v13 = vpop.f32.mrb[14].mxu1  ;;  %v7052_v9 = vld [vmem:[%s8870_s2 + $0xe4] ss:$8 sps:$4 sm:$0xff]   ;;  %v7050_v10 = vld [vmem:[%s8870_s2 + $0xe0] ss:$8 sps:$4 sm:$0xff]  }
 0x21b   : > { %v5309_v14 = vpop.f32.mrb[15].mxu1  ;;  %v7055_v13 = vld [vmem:[%s8870_s2 + $0xf0] ss:$8 sps:$4 sm:$0xff]  }
 0x21c   : > { %6277 = vmatmul.mubr.msk.f32.gmra.mrb[44].mxu1 %vm925_vm3, %v5307_v12  ;;  %v7053_v12 = vld [vmem:[%s8870_s2 + $0xf4] ss:$8 sps:$4 sm:$0xff]   ;;  %v7056_v14 = vld [vmem:[%s8870_s2 + $0x104] ss:$8 sps:$4 sm:$0xff]  }
 0x21d   : > { %6295 = vmatprep.mubr.msk.f32.mxu1 %vm7191_vm2, %v7192_v45 }
 0x220   : > { %v5327_v15 = vpop.f32.mrb[16].mxu1 }
 0x221   : > { %v5328_v17 = vpop.f32.mrb[17].mxu1 }
 0x222   : > { %v5329_v18 = vadd.f32 %v5328_v17, %v5327_v15  ;;  %v5330_v19 = vpop.f32.mrb[18].mxu1  ;;  %v4828_v15 = vld [vmem:[%s8871_s3 + $0x80] sm:$0xff]  ;;  %v4829_v17 = vld [vmem:[%s8871_s3 + $0x88] sm:$0xff] }
 0x223   : > { %v5331_v20 = vpop.f32.mrb[19].mxu1 }
 0x224   : > { %v5332_v22 = vadd.f32 %v5331_v20, %v5330_v19  ;;  %6222 = vmatmul.mubr.msk.f32.vlgmr.msra.gmra.mrb[32].mxu0 %vm925_vm3, %v5329_v18  ;;  %v6826_v18 = vpack.c.bf16 %v4829_v17, %v4828_v15  ;;  %v4830_v19 = vld [vmem:[%s8871_s3 + $0x90] sm:$0xff]  ;;  %v4831_v20 = vld [vmem:[%s8871_s3 + $0x98] sm:$0xff] }
 0x225   : > { %5382 = vmatpush3.bf16.msra.mxu0 %v7359_v55  ;;  %6224 = vmatprep.mubr.msk.f32.mxu0 %vm7191_vm2, %v7192_v45  ;;  %v7088_v17 = vld [vmem:[%s8870_s2 + $0x198] ss:$8 sps:$4 sm:$0xff]  }
 0x226   : > { %5383 = vmatprep.subr.bf16.mxu0 %v7380_v36  ;;  %6827 = vmatpush3.bf16.msra.mxu1 %v6826_v18  ;;  %v7089_v18 = vld [vmem:[%s8870_s2 + $0x1ac] ss:$8 sps:$4 sm:$0xff]  }
 0x227   : > { %6828 = vmatprep.subr.bf16.mxu1 %v7190_v40 }
 0x228   : > { %v5333_v23 = vpop.f32.mrb[20].mxu1  ;;  %6225 = vmatmul.mubr.msk.f32.gmra.mrb[34].mxu0 %vm925_vm3, %v5332_v22  ;;  %v4879_v22 = vld [vmem:[%s8870_s2 + $0x110] sm:$0x11] }
 0x229   : > { %5384 = vmatpush3.bf16.msra.mxu0 %v7361_v60  ;;  %v5334_v24 = vpop.f32.mrb[21].mxu1  ;;  %6227 = vmatprep.mubr.msk.f32.mxu0 %vm7191_vm2, %v7192_v45 }
 0x22a   : > { %v5335_v25 = vadd.f32 %v5334_v24, %v5333_v23  ;;  %5385 = vmatprep.subr.bf16.mxu0 %v7384_v42  ;;  %v5336_v27 = vpop.f32.mrb[22].mxu1  ;;  %v6829_v23 = vpack.c.bf16 %v4831_v20, %v4830_v19  ;;  %v7058_v24 = vld [vmem:[%s8870_s2 + $0x100] ss:$8 sps:$4 sm:$0xff]  }
 0x22b   : > { %v5337_v28 = vpop.f32.mrb[23].mxu1 }
 0x22c   : > { %v5338_v29 = vadd.f32 %v5337_v28, %v5336_v27  ;;  %6228 = vmatmul.mubr.msk.f32.gmra.mrb[36].mxu0 %vm925_vm3, %v5335_v25  ;;  %6830 = vmatpush3.bf16.msra.mxu1 %v6829_v23  ;;  %v4832_v25 = vld [vmem:[%s8871_s3 + $0xa0] sm:$0xff]  ;;  %v4833_v27 = vld [vmem:[%s8871_s3 + $0xa8] sm:$0xff]  ;;  %v4887_v28 = vcombine.high %v4879_v22, %v4879_v22 }
 0x22d   : > { %5386 = vmatpush3.bf16.msra.mxu0 %v7363_v1  ;;  %6230 = vmatprep.mubr.msk.f32.mxu0 %vm7191_vm2, %v7192_v45 }
 0x22e   : > { %5387 = vmatprep.subr.bf16.mxu0 %v7388_v47  ;;  %6831 = vmatprep.subr.bf16.mxu1 %v7190_v40 }
 0x230   : > { %v5339_v30 = vpop.f32.mrb[24].mxu1  ;;  %6231 = vmatmul.mubr.msk.f32.gmra.mrb[38].mxu0 %vm925_vm3, %v5338_v29  ;;  %v6832_v29 = vpack.c.bf16 %v4833_v27, %v4832_v25  ;;  %v7091_v25 = vld [vmem:[%s8870_s2 + $0x1a8] ss:$8 sps:$4 sm:$0xff]  }
 0x231   : > { %5388 = vmatpush3.bf16.msra.mxu0 %v7365_v6  ;;  %v5340_v32 = vpop.f32.mrb[25].mxu1  ;;  %6233 = vmatprep.mubr.msk.f32.mxu0 %vm7191_vm2, %v7192_v45 }
 0x232   : > { %v5341_v33 = vadd.f32 %v5340_v32, %v5339_v30  ;;  %5389 = vmatprep.subr.bf16.mxu0 %v7392_v52  ;;  %v5342_v34 = vpop.f32.mrb[26].mxu1  ;;  %6833 = vmatpush3.bf16.msra.mxu1 %v6832_v29  ;;  %v4834_v30 = vld [vmem:[%s8871_s3 + $0xb0] sm:$0xff]  ;;  %v4835_v32 = vld [vmem:[%s8871_s3 + $0xb8] sm:$0xff] }
 0x233   : > { %v5343_v35 = vpop.f32.mrb[27].mxu1  ;;  %6834 = vmatprep.subr.bf16.mxu1 %v7190_v40 }
 0x234   : > { %v5344_v37 = vadd.f32 %v5343_v35, %v5342_v34  ;;  %6234 = vmatmul.mubr.msk.f32.gmra.mrb[40].mxu0 %vm925_vm3, %v5341_v33  ;;  %v6835_v33 = vpack.c.bf16 %v4835_v32, %v4834_v30  ;;  %v4886_v34 = vcombine.low %v4879_v22, %v4879_v22  ;;  %v7063_v35 = vld [vmem:[%s8870_s2 + $0x11c] ss:$8 sps:$4 sm:$0xff]  }
 0x235   : > { %5390 = vmatpush3.bf16.msra.mxu0 %v7367_v11  ;;  %6236 = vmatprep.mubr.msk.f32.mxu0 %vm7191_vm2, %v7192_v45  ;;  %v4969_v22 = vld [vmem:[%s8870_s2 + $0x1b8] sm:$0x11] }
 0x236   : > { %5391 = vmatprep.subr.bf16.mxu0 %v7396_v58  ;;  %6836 = vmatpush3.bf16.msra.mxu1 %v6835_v33  ;;  %v4977_v27 = vcombine.high %v4969_v22, %v4969_v22  ;;  %v4976_v32 = vcombine.low %v4969_v22, %v4969_v22  ;;  %v7096_v33 = vld [vmem:[%s8870_s2 + $0x1c4] ss:$8 sps:$4 sm:$0xff]  }
 0x237   : > { %6837 = vmatprep.subr.bf16.mxu1 %v7190_v40 }
 0x238   : > { %v5345_v38 = vpop.f32.mrb[28].mxu1  ;;  %6237 = vmatmul.mubr.msk.f32.gmra.mrb[42].mxu0 %vm925_vm3, %v5344_v37  ;;  %v7061_v37 = vld [vmem:[%s8870_s2 + $0x118] ss:$8 sps:$4 sm:$0xff]  }
 0x239   : > { %5392 = vmatpush3.bf16.msra.mxu0 %v7369_v16  ;;  %v5346_v39 = vpop.f32.mrb[29].mxu1  ;;  %6239 = vmatprep.mubr.msk.f32.mxu0 %vm7191_vm2, %v7192_v45 }
 0x23a   : > { %v5347_v43 = vadd.f32 %v5346_v39, %v5345_v38  ;;  %5393 = vmatprep.subr.bf16.mxu0 %v7400_v0  ;;  %v5348_v44 = vpop.f32.mrb[30].mxu1  ;;  %v7064_v38 = vld [vmem:[%s8870_s2 + $0x12c] ss:$8 sps:$4 sm:$0xff]   ;;  %v7066_v39 = vld [vmem:[%s8870_s2 + $0x128] ss:$8 sps:$4 sm:$0xff]  }
 0x23b   : > { %v5349_v46 = vpop.f32.mrb[31].mxu1  ;;  %v7069_v44 = vld [vmem:[%s8870_s2 + $0x138] ss:$8 sps:$4 sm:$0xff]  }
 0x23c   : > { %6240 = vmatmul.mubr.msk.f32.gmra.mrb[44].mxu0 %vm925_vm3, %v5347_v43  ;;  %v4909_v43 = vld [vmem:[%s8870_s2 + $0x148] sm:$0x11] }
 0x23d   : > { %5394 = vmatpush3.bf16.msra.mxu0 %v7371_v21  ;;  %1245 = vmatprep.mubr.bf16.mxu0 %v7030_v41  ;;  %v7067_v41 = vld [vmem:[%s8870_s2 + $0x13c] ss:$8 sps:$4 sm:$0xff]   ;;  %v4917_v46 = vcombine.high %v4909_v43, %v4909_v43 }
 0x23e   : > { %5395 = vmatprep.subr.bf16.mxu0 %v7404_v7 }
 0x241   : > { %5396 = vmatpush3.bf16.msra.mxu0 %v7373_v26 }
 0x242   : > { %5436 = vmatprep.subr.bf16.mxu0 %v7375_v31 }
 0x244   : > { %1246 = vmatmul.mubr.bf16.vlgmr.msra.gmra.mrb[48].mxu0 %v7028_v48  ;;  %v4916_v48 = vcombine.low %v4909_v43, %v4909_v43  ;;  %v7094_v43 = vld [vmem:[%s8870_s2 + $0x1c0] ss:$8 sps:$4 sm:$0xff]  }
 0x245   : > { %5437 = vmatpush3.bf16.msra.mxu0 %v7359_v55  ;;  %1253 = vmatprep.mubr.bf16.mxu0 %v7031_v49  ;;  %v7074_v49 = vld [vmem:[%s8870_s2 + $0x154] ss:$8 sps:$4 sm:$0xff]  }
 0x246   : > { %5438 = vmatprep.subr.bf16.mxu0 %v7380_v36 }
 0x249   : > { %5439 = vmatpush3.bf16.msra.mxu0 %v7361_v60 }
 0x24a   : > { %5440 = vmatprep.subr.bf16.mxu0 %v7384_v42 }
 0x24c   : > { %1254 = vmatmul.mubr.bf16.gmra.mrb[52].mxu0 %v7033_v50  ;;  %v7072_v50 = vld [vmem:[%s8870_s2 + $0x150] ss:$8 sps:$4 sm:$0xff]  }
 0x24d   : > { %5441 = vmatpush3.bf16.msra.mxu0 %v7363_v1  ;;  %1261 = vmatprep.mubr.bf16.mxu0 %v7034_v51  ;;  %v7075_v51 = vld [vmem:[%s8870_s2 + $0x164] ss:$8 sps:$4 sm:$0xff]  }
 0x24e   : > { %5442 = vmatprep.subr.bf16.mxu0 %v7388_v47 }
 0x251   : > { %5443 = vmatpush3.bf16.msra.mxu0 %v7365_v6 }
 0x252   : > { %5444 = vmatprep.subr.bf16.mxu0 %v7392_v52 }
 0x254   : > { %1262 = vmatmul.mubr.bf16.gmra.mrb[56].mxu0 %v7036_v54  ;;  %v7078_v54 = vld [vmem:[%s8870_s2 + $0x174] ss:$8 sps:$4 sm:$0xff]  }
 0x255   : > { %5445 = vmatpush3.bf16.msra.mxu0 %v7367_v11  ;;  %1269 = vmatprep.mubr.bf16.mxu0 %v4827_v56  ;;  %v4939_v56 = vld [vmem:[%s8870_s2 + $0x180] sm:$0x11] }
 0x256   : > { %5446 = vmatprep.subr.bf16.mxu0 %v7396_v58 }
 0x259   : > { %5447 = vmatpush3.bf16.msra.mxu0 %v7369_v16 }
 0x25a   : > { %5448 = vmatprep.subr.bf16.mxu0 %v7400_v0 }
 0x25c   : > { %1270 = vmatmul.mubr.bf16.gmra.mrb[60].mxu0 %v4826_v57  ;;  %v7080_v57 = vld [vmem:[%s8870_s2 + $0x170] ss:$8 sps:$4 sm:$0xff]  }
 0x25d   : > { %5449 = vmatpush3.bf16.msra.mxu0 %v7371_v21  ;;  %1491 = vmatprep.mubr.bf16.mxu0 %v7041_v59  ;;  %v4947_v59 = vcombine.high %v4939_v56, %v4939_v56 }
 0x25e   : > { %5450 = vmatprep.subr.bf16.mxu0 %v7404_v7 }
 0x261   : > { %5451 = vmatpush3.bf16.msra.mxu0 %v7373_v26 }
 0x262   : > { %5491 = vmatprep.subr.bf16.mxu0 %v7375_v31 }
 0x264   : > { %1492 = vmatmul.mubr.bf16.vlgmr.msra.gmra.mrb[64].mxu0 %v7039_v61 }
 0x265   : > { %5492 = vmatpush3.bf16.msra.mxu0 %v7359_v55  ;;  %1499 = vmatprep.mubr.bf16.mxu0 %v7042_v62 }
 0x266   : > { %5493 = vmatprep.subr.bf16.mxu0 %v7380_v36 }
 0x269   : > { %5494 = vmatpush3.bf16.msra.mxu0 %v7361_v60 }
 0x26a   : > { %5495 = vmatprep.subr.bf16.mxu0 %v7384_v42 }
 0x26c   : > { %1500 = vmatmul.mubr.bf16.gmra.mrb[68].mxu0 %v7044_v63  ;;  %v4946_v63 = vcombine.low %v4939_v56, %v4939_v56  ;;  %v7100_v56 = vld [vmem:[%s8870_s2 + $0x1e4] ss:$8 sps:$4 sm:$0xff]  }
 0x26d   : > { %5496 = vmatpush3.bf16.msra.mxu0 %v7363_v1  ;;  %1507 = vmatprep.mubr.bf16.mxu0 %v7045_v2  ;;  %v7085_v2 = vld [vmem:[%s8870_s2 + $0x18c] ss:$8 sps:$4 sm:$0xff]  }
 0x26e   : > { %5497 = vmatprep.subr.bf16.mxu0 %v7388_v47 }
 0x271   : > { %5498 = vmatpush3.bf16.msra.mxu0 %v7365_v6 }
 0x272   : > { %5499 = vmatprep.subr.bf16.mxu0 %v7392_v52 }
 0x274   : > { %1508 = vmatmul.mubr.bf16.gmra.mrb[72].mxu0 %v7047_v4 }
 0x275   : > { %5500 = vmatpush3.bf16.msra.mxu0 %v7367_v11  ;;  %1515 = vmatprep.mubr.bf16.mxu0 %v4857_v5 }
 0x276   : > { %5501 = vmatprep.subr.bf16.mxu0 %v7396_v58 }
 0x279   : > { %5502 = vmatpush3.bf16.msra.mxu0 %v7369_v16 }
 0x27a   : > { %5503 = vmatprep.subr.bf16.mxu0 %v7400_v0 }
 0x27c   : > { %1516 = vmatmul.mubr.bf16.gmra.mrb[76].mxu0 %v4856_v8 }
 0x27d   : > { %5504 = vmatpush3.bf16.msra.mxu0 %v7371_v21  ;;  %1737 = vmatprep.mubr.bf16.mxu0 %v7052_v9  ;;  %v7083_v9 = vld [vmem:[%s8870_s2 + $0x188] ss:$8 sps:$4 sm:$0xff]  }
 0x27e   : > { %5505 = vmatprep.subr.bf16.mxu0 %v7404_v7 }
 0x281   : > { %5506 = vmatpush3.bf16.msra.mxu0 %v7373_v26 }
 0x282   : > { %5546 = vmatprep.subr.bf16.mxu0 %v7375_v31 }
 0x284   : > { %1738 = vmatmul.mubr.bf16.vlgmr.msra.gmra.mrb[80].mxu0 %v7050_v10  ;;  %v7086_v10 = vld [vmem:[%s8870_s2 + $0x19c] ss:$8 sps:$4 sm:$0xff]  }
 0x285   : > { %5547 = vmatpush3.bf16.msra.mxu0 %v7359_v55  ;;  %1745 = vmatprep.mubr.bf16.mxu0 %v7053_v12 }
 0x286   : > { %5548 = vmatprep.subr.bf16.mxu0 %v7380_v36 }
 0x289   : > { %5549 = vmatpush3.bf16.msra.mxu0 %v7361_v60 }
 0x28a   : > { %5550 = vmatprep.subr.bf16.mxu0 %v7384_v42 }
 0x28c   : > { %1746 = vmatmul.mubr.bf16.gmra.mrb[84].mxu0 %v7055_v13 }
 0x28d   : > { %5551 = vmatpush3.bf16.msra.mxu0 %v7363_v1  ;;  %1753 = vmatprep.mubr.bf16.mxu0 %v7056_v14 }
 0x28e   : > { %5552 = vmatprep.subr.bf16.mxu0 %v7388_v47 }
 0x291   : > { %5553 = vmatpush3.bf16.msra.mxu0 %v7365_v6 }
 0x292   : > { %5554 = vmatprep.subr.bf16.mxu0 %v7392_v52 }
 0x294   : > { %1754 = vmatmul.mubr.bf16.gmra.mrb[88].mxu0 %v7058_v24 }
 0x295   : > { %5555 = vmatpush3.bf16.msra.mxu0 %v7367_v11  ;;  %1761 = vmatprep.mubr.bf16.mxu0 %v4887_v28 }
 0x296   : > { %5556 = vmatprep.subr.bf16.mxu0 %v7396_v58 }
 0x299   : > { %5557 = vmatpush3.bf16.msra.mxu0 %v7369_v16 }
 0x29a   : > { %5558 = vmatprep.subr.bf16.mxu0 %v7400_v0 }
 0x29c   : > { %1762 = vmatmul.mubr.bf16.gmra.mrb[92].mxu0 %v4886_v34 }
 0x29d   : > { %5559 = vmatpush3.bf16.msra.mxu0 %v7371_v21  ;;  %1983 = vmatprep.mubr.bf16.mxu0 %v7063_v35 }
 0x29e   : > { %5560 = vmatprep.subr.bf16.mxu0 %v7404_v7 }
 0x2a1   : > { %5561 = vmatpush3.bf16.msra.mxu0 %v7373_v26 }
 0x2a2   : > { %5601 = vmatprep.subr.bf16.mxu0 %v7375_v31 }
 0x2a4   : > { %1984 = vmatmul.mubr.bf16.vlgmr.msra.gmra.mrb[96].mxu0 %v7061_v37 }
 0x2a5   : > { %5602 = vmatpush3.bf16.msra.mxu0 %v7359_v55  ;;  %1991 = vmatprep.mubr.bf16.mxu0 %v7064_v38 }
 0x2a6   : > { %5603 = vmatprep.subr.bf16.mxu0 %v7380_v36 }
 0x2a9   : > { %5604 = vmatpush3.bf16.msra.mxu0 %v7361_v60 }
 0x2aa   : > { %5605 = vmatprep.subr.bf16.mxu0 %v7384_v42 }
 0x2ac   : > { %1992 = vmatmul.mubr.bf16.gmra.mrb[100].mxu0 %v7066_v39 }
 0x2ad   : > { %5606 = vmatpush3.bf16.msra.mxu0 %v7363_v1  ;;  %1999 = vmatprep.mubr.bf16.mxu0 %v7067_v41 }
 0x2ae   : > { %5607 = vmatprep.subr.bf16.mxu0 %v7388_v47 }
 0x2b1   : > { %5608 = vmatpush3.bf16.msra.mxu0 %v7365_v6 }
 0x2b2   : > { %5609 = vmatprep.subr.bf16.mxu0 %v7392_v52 }
 0x2b4   : > { %2000 = vmatmul.mubr.bf16.gmra.mrb[104].mxu0 %v7069_v44  ;;  %v7097_v44 = vld [vmem:[%s8870_s2 + $0x1d4] ss:$8 sps:$4 sm:$0xff]  }
 0x2b5   : > { %5610 = vmatpush3.bf16.msra.mxu0 %v7367_v11  ;;  %2007 = vmatprep.mubr.bf16.mxu0 %v4917_v46 }
 0x2b6   : > { %5611 = vmatprep.subr.bf16.mxu0 %v7396_v58 }
 0x2b9   : > { %5612 = vmatpush3.bf16.msra.mxu0 %v7369_v16 }
 0x2ba   : > { %5613 = vmatprep.subr.bf16.mxu0 %v7400_v0 }
 0x2bc   : > { %2008 = vmatmul.mubr.bf16.gmra.mrb[108].mxu0 %v4916_v48 }
 0x2bd   : > { %5614 = vmatpush3.bf16.msra.mxu0 %v7371_v21  ;;  %2229 = vmatprep.mubr.bf16.mxu0 %v7074_v49 }
 0x2be   : > { %5615 = vmatprep.subr.bf16.mxu0 %v7404_v7 }
 0x2c1   : > { %5616 = vmatpush3.bf16.msra.mxu0 %v7373_v26 }
 0x2c2   : > { %5656 = vmatprep.subr.bf16.mxu0 %v7375_v31 }
 0x2c4   : > { %2230 = vmatmul.mubr.bf16.vlgmr.msra.gmra.mrb[112].mxu0 %v7072_v50 }
 0x2c5   : > { %5657 = vmatpush3.bf16.msra.mxu0 %v7359_v55  ;;  %2237 = vmatprep.mubr.bf16.mxu0 %v7075_v51 }
 0x2c6   : > { %5658 = vmatprep.subr.bf16.mxu0 %v7380_v36 }
 0x2c9   : > { %5659 = vmatpush3.bf16.msra.mxu0 %v7361_v60 }
 0x2ca   : > { %5660 = vmatprep.subr.bf16.mxu0 %v7384_v42 }
 0x2cc   : > { %2238 = vmatmul.mubr.bf16.gmra.mrb[116].mxu0 %v7077_v53 }
 0x2cd   : > { %5661 = vmatpush3.bf16.msra.mxu0 %v7363_v1  ;;  %2245 = vmatprep.mubr.bf16.mxu0 %v7078_v54  ;;  %v7099_v54 = vld [vmem:[%s8870_s2 + $0x1d0] ss:$8 sps:$4 sm:$0xff]  }
 0x2ce   : > { %5662 = vmatprep.subr.bf16.mxu0 %v7388_v47 }
 0x2d1   : > { %5663 = vmatpush3.bf16.msra.mxu0 %v7365_v6 }
 0x2d2   : > { %5664 = vmatprep.subr.bf16.mxu0 %v7392_v52 }
 0x2d4   : > { %2246 = vmatmul.mubr.bf16.gmra.mrb[120].mxu0 %v7080_v57 }
 0x2d5   : > { %5665 = vmatpush3.bf16.msra.mxu0 %v7367_v11  ;;  %2253 = vmatprep.mubr.bf16.mxu0 %v4947_v59 }
 0x2d6   : > { %5666 = vmatprep.subr.bf16.mxu0 %v7396_v58 }
 0x2d7   : > { %v1134_v61 = vpop.f32.mrb[32].mxu1 }
 0x2d8   : > { %v6260_v62 = vpop.f32.mrb[33].mxu1 }
 0x2d9   : > { %5667 = vmatpush3.bf16.msra.mxu0 %v7369_v16  ;;  %v4999_v62 = vld [vmem:[%s8870_s2 + $0x1f0] sm:$0x11] }
 0x2da   : > { %5668 = vmatprep.subr.bf16.mxu0 %v7400_v0 }
 0x2db   : > { %v1139_v3 = vpop.f32.mrb[34].mxu1 }
 0x2dc   : > { %2254 = vmatmul.mubr.bf16.gmra.mrb[124].mxu0 %v4946_v63  ;;  %v6263_v4 = vpop.f32.mrb[35].mxu1 }
 0x2dd   : > { %5669 = vmatpush3.bf16.msra.mxu0 %v7371_v21  ;;  %2475 = vmatprep.mubr.bf16.mxu0 %v7085_v2  ;;  %v7102_v4 = vld [vmem:[%s8870_s2 + $0x1e0] ss:$8 sps:$4 sm:$0xff]  }
 0x2de   : > { %5670 = vmatprep.subr.bf16.mxu0 %v7404_v7 }
 0x2df   : > { %v1144_v5 = vpop.f32.mrb[36].mxu1 }
 0x2e0   : > { %v6266_v8 = vpop.f32.mrb[37].mxu1 }
 0x2e1   : > { %5671 = vmatpush3.bf16.msra.mxu0 %v7373_v26  ;;  %v4858_v8 = vld [vmem:[%s8871_s3 + $0xc0] sm:$0xff] }
 0x2e2   : > { %5711 = vmatprep.subr.bf16.mxu0 %v7375_v31 }
 0x2e3   : > { %v1149_v12 = vpop.f32.mrb[38].mxu1 }
 0x2e4   : > { %2476 = vmatmul.mubr.bf16.vlgmr.msra.gmra.mrb[128].mxu0 %v7083_v9  ;;  %v6269_v13 = vpop.f32.mrb[39].mxu1  ;;  %v4859_v9 = vld [vmem:[%s8871_s3 + $0xc8] sm:$0xff] }
 0x2e5   : > { %5712 = vmatpush3.bf16.msra.mxu0 %v7359_v55  ;;  %2483 = vmatprep.mubr.bf16.mxu0 %v7086_v10  ;;  %v5006_v13 = vcombine.low %v4999_v62, %v4999_v62 }
 0x2e6   : > { %5713 = vmatprep.subr.bf16.mxu0 %v7380_v36 }
 0x2e7   : > { %v1154_v14 = vpop.f32.mrb[40].mxu1 }
 0x2e8   : > { %v6272_v15 = vpop.f32.mrb[41].mxu1 }
 0x2e9   : > { %5714 = vmatpush3.bf16.msra.mxu0 %v7361_v60 }
 0x2ea   : > { %5715 = vmatprep.subr.bf16.mxu0 %v7384_v42 }
 0x2eb   : > { %v1159_v19 = vpop.f32.mrb[42].mxu1 }
 0x2ec   : > { %2484 = vmatmul.mubr.bf16.gmra.mrb[132].mxu0 %v7088_v17  ;;  %v6275_v20 = vpop.f32.mrb[43].mxu1  ;;  %v6838_v17 = vpack.c.bf16 %v4859_v9, %v4858_v8 }
 0x2ed   : > { %5716 = vmatpush3.bf16.msra.mxu0 %v7363_v1  ;;  %2491 = vmatprep.mubr.bf16.mxu0 %v7089_v18  ;;  %v4861_v20 = vld [vmem:[%s8871_s3 + $0xd8] sm:$0xff] }
 0x2ee   : > { %5717 = vmatprep.subr.bf16.mxu0 %v7388_v47 }
 0x2ef   : > { %v1164_v23 = vpop.f32.mrb[44].mxu1 }
 0x2f0   : > { %v6278_v24 = vpop.f32.mrb[45].mxu1 }
 0x2f1   : > { %5718 = vmatpush3.bf16.msra.mxu0 %v7365_v6  ;;  %v4862_v24 = vld [vmem:[%s8871_s3 + $0xe0] sm:$0xff] }
 0x2f2   : > { %5719 = vmatprep.subr.bf16.mxu0 %v7392_v52 }
 0x2f4   : > { %2492 = vmatmul.mubr.bf16.gmra.mrb[136].mxu0 %v7091_v25  ;;  %v4863_v25 = vld [vmem:[%s8871_s3 + $0xe8] sm:$0xff] }
 0x2f5   : > { %5720 = vmatpush3.bf16.msra.mxu0 %v7367_v11  ;;  %2499 = vmatprep.mubr.bf16.mxu0 %v4977_v27 }
 0x2f6   : > { %5721 = vmatprep.subr.bf16.mxu0 %v7396_v58 }
 0x2f7   : > { %v1013_v28 = vpop.f32.mrb[32].mxu0 }
 0x2f8   : > { %v7796_v29 = vadd.f32 %v1134_v61, %v1013_v28  ;;  %v6223_v30 = vpop.f32.mrb[33].mxu0 }
 0x2f9   : > { %5722 = vmatpush3.bf16.msra.mxu0 %v7369_v16 }
 0x2fa   : > { %5723 = vmatprep.subr.bf16.mxu0 %v7400_v0 }
 0x2fb   : > { %v1018_v34 = vpop.f32.mrb[34].mxu0 }
 0x2fc   : > { %v7803_v35 = vadd.f32 %v1139_v3, %v1018_v34  ;;  %2500 = vmatmul.mubr.bf16.gmra.mrb[140].mxu0 %v4976_v32  ;;  %v6226_v37 = vpop.f32.mrb[35].mxu0 }
 0x2fd   : > { %5724 = vmatpush3.bf16.msra.mxu0 %v7371_v21  ;;  %2721 = vmatprep.mubr.bf16.mxu0 %v7096_v33  ;;  %v6844_v33 = vpack.c.bf16 %v4863_v25, %v4862_v24  ;;  %v4864_v37 = vld [vmem:[%s8871_s3 + $0xf0] sm:$0xff] }
 0x2fe   : > { %5725 = vmatprep.subr.bf16.mxu0 %v7404_v7 }
 0x2ff   : > { %v1023_v38 = vpop.f32.mrb[36].mxu0 }
 0x300   : > { %v7807_v39 = vadd.f32 %v1144_v5, %v1023_v38  ;;  %v6229_v41 = vpop.f32.mrb[37].mxu0  ;;  %v5007_v5 = vcombine.high %v4999_v62, %v4999_v62  ;;  %v4865_v38 = vld [vmem:[%s8871_s3 + $0xf8] sm:$0xff] }
 0x301   : > { %5726 = vmatpush3.bf16.msra.mxu0 %v7373_v26 }
 0x302   : > { %6909 = vmatprep.subr.bf16.mxu0 %v7190_v40 }
 0x303   : > { %v1028_v46 = vpop.f32.mrb[38].mxu0 }
 0x304   : > { %v7817_v48 = vadd.f32 %v1149_v12, %v1028_v46  ;;  %2722 = vmatmul.mubr.bf16.vlgmr.msra.gmra.mrb[144].mxu0 %v7094_v43  ;;  %v6232_v49 = vpop.f32.mrb[39].mxu0  ;;  %v6847_v43 = vpack.c.bf16 %v4865_v38, %v4864_v37 }
 0x305   : > { %2729 = vmatprep.mubr.bf16.mxu0 %v7097_v44 }
 0x307   : > { %v1033_v50 = vpop.f32.mrb[40].mxu0 }
 0x308   : > { %v7819_v51 = vadd.f32 %v1154_v14, %v1033_v50  ;;  %v6235_v53 = vpop.f32.mrb[41].mxu0 }
 0x30b   : > { %v1038_v57 = vpop.f32.mrb[42].mxu0 }
 0x30c   : > { %v7827_v59 = vadd.f32 %v1159_v19, %v1038_v57  ;;  %2730 = vmatmul.mubr.bf16.gmra.mrb[148].mxu0 %v7099_v54  ;;  %v6238_v61 = vpop.f32.mrb[43].mxu0  ;;  %v4860_v19 = vld [vmem:[%s8871_s3 + $0xd0] sm:$0xff] }
 0x30d   : > { %2737 = vmatprep.mubr.bf16.mxu0 %v7100_v56 }
 0x30f   : > { %v1043_v63 = vpop.f32.mrb[44].mxu0 }
 0x310   : > { %v7832_v2 = vadd.f32 %v1164_v23, %v1043_v63  ;;  %v6241_v3 = vpop.f32.mrb[45].mxu0  ;;  %v6841_v23 = vpack.c.bf16 %v4861_v20, %v4860_v19  ;;  %v4892_v19 = vld [vmem:[%s8871_s3 + $0x120] sm:$0xff]  ;;  %v4893_v20 = vld [vmem:[%s8871_s3 + $0x128] sm:$0xff] }
 0x311   : > { %v4888_v3 = vld [vmem:[%s8871_s3 + $0x100] sm:$0xff]  ;;  %v6856_v24 = vpack.c.bf16 %v4893_v20, %v4892_v19 }
 0x314   : > { %2738 = vmatmul.mubr.bf16.gmra.mrb[152].mxu0 %v7102_v4  ;;  %v4889_v4 = vld [vmem:[%s8871_s3 + $0x108] sm:$0xff] }
 0x315   : > { %2745 = vmatprep.mubr.bf16.mxu0 %v5007_v5  ;;  %v6850_v9 = vpack.c.bf16 %v4889_v4, %v4888_v3 }
 0x317   : > { %v5397_v10 = vpop.f32.mrb[48].mxu0 }
 0x318   : > { %v5398_v12 = vpop.f32.mrb[49].mxu0 }
 0x319   : > { %v5399_v14 = vadd.f32 %v5398_v12, %v5397_v10  ;;  %v5400_v15 = vpop.f32.mrb[50].mxu0 }
 0x31a   : > { %v5401_v18 = vpop.f32.mrb[51].mxu0 }
 0x31b   : > { %v5402_v22 = vadd.f32 %v5401_v18, %v5400_v15  ;;  %6296 = vmatmul.mubr.msk.f32.vlgmr.msra.gmra.mrb[46].mxu1 %vm925_vm3, %v5399_v14  ;;  %v4891_v14 = vld [vmem:[%s8871_s3 + $0x118] sm:$0xff] }
 0x31c   : > { %2746 = vmatmul.mubr.bf16.gmra.mrb[156].mxu0 %v5006_v13  ;;  %6298 = vmatprep.mubr.msk.f32.mxu1 %vm7191_vm2, %v7192_v45  ;;  %v4890_v13 = vld [vmem:[%s8871_s3 + $0x110] sm:$0xff] }
 0x31d   : > { %6839 = vmatpush3.bf16.msra.mxu1 %v6838_v17  ;;  %6554 = vmatprep.mubr.msk.f32.mxu0 %vm7191_vm2, %v7192_v45  ;;  %v6853_v18 = vpack.c.bf16 %v4891_v14, %v4890_v13  ;;  %v4922_v14 = vld [vmem:[%s8871_s3 + $0x160] sm:$0xff] }
 0x31e   : > { %6840 = vmatprep.subr.bf16.mxu1 %v7190_v40 }
 0x31f   : > { %v5403_v27 = vpop.f32.mrb[52].mxu0  ;;  %6299 = vmatmul.mubr.msk.f32.gmra.mrb[48].mxu1 %vm925_vm3, %v5402_v22 }
 0x320   : > { %v5404_v28 = vpop.f32.mrb[53].mxu0  ;;  %6301 = vmatprep.mubr.msk.f32.mxu1 %vm7191_vm2, %v7192_v45 }
 0x321   : > { %v5405_v30 = vadd.f32 %v5404_v28, %v5403_v27  ;;  %v5406_v32 = vpop.f32.mrb[54].mxu0  ;;  %6842 = vmatpush3.bf16.msra.mxu1 %v6841_v23  ;;  %v4894_v28 = vld [vmem:[%s8871_s3 + $0x130] sm:$0xff] }
 0x322   : > { %v5407_v34 = vpop.f32.mrb[55].mxu0  ;;  %6843 = vmatprep.subr.bf16.mxu1 %v7190_v40 }
 0x323   : > { %v5408_v41 = vadd.f32 %v5407_v34, %v5406_v32  ;;  %6302 = vmatmul.mubr.msk.f32.gmra.mrb[50].mxu1 %vm925_vm3, %v5405_v30  ;;  %v4895_v30 = vld [vmem:[%s8871_s3 + $0x138] sm:$0xff] }
 0x324   : > { %6304 = vmatprep.mubr.msk.f32.mxu1 %vm7191_vm2, %v7192_v45  ;;  %v6859_v34 = vpack.c.bf16 %v4895_v30, %v4894_v28 }
 0x325   : > { %6845 = vmatpush3.bf16.msra.mxu1 %v6844_v33 }
 0x326   : > { %6846 = vmatprep.subr.bf16.mxu1 %v7190_v40 }
 0x327   : > { %v5409_v44 = vpop.f32.mrb[56].mxu0  ;;  %6305 = vmatmul.mubr.msk.f32.gmra.mrb[52].mxu1 %vm925_vm3, %v5408_v41 }
 0x328   : > { %v5410_v46 = vpop.f32.mrb[57].mxu0  ;;  %6307 = vmatprep.mubr.msk.f32.mxu1 %vm7191_vm2, %v7192_v45 }
 0x329   : > { %v5411_v49 = vadd.f32 %v5410_v46, %v5409_v44  ;;  %v5412_v50 = vpop.f32.mrb[58].mxu0  ;;  %6848 = vmatpush3.bf16.msra.mxu1 %v6847_v43 }
 0x32a   : > { %v5413_v53 = vpop.f32.mrb[59].mxu0  ;;  %6849 = vmatprep.subr.bf16.mxu1 %v7190_v40 }
 0x32b   : > { %v5414_v54 = vadd.f32 %v5413_v53, %v5412_v50  ;;  %6308 = vmatmul.mubr.msk.f32.gmra.mrb[54].mxu1 %vm925_vm3, %v5411_v49 }
 0x32c   : > { %6310 = vmatprep.mubr.msk.f32.mxu1 %vm7191_vm2, %v7192_v45 }
 0x32f   : > { %v5415_v56 = vpop.f32.mrb[60].mxu0  ;;  %6311 = vmatmul.mubr.msk.f32.gmra.mrb[56].mxu1 %vm925_vm3, %v5414_v54 }
 0x330   : > { %v5416_v57 = vpop.f32.mrb[61].mxu0  ;;  %6313 = vmatprep.mubr.msk.f32.mxu1 %vm7191_vm2, %v7192_v45 }
 0x331   : > { %v5417_v61 = vadd.f32 %v5416_v57, %v5415_v56  ;;  %v5418_v62 = vpop.f32.mrb[62].mxu0  ;;  %v4918_v57 = vld [vmem:[%s8871_s3 + $0x140] sm:$0xff] }
 0x332   : > { %v5419_v63 = vpop.f32.mrb[63].mxu0 }
 0x333   : > { %6314 = vmatmul.mubr.msk.f32.gmra.mrb[58].mxu1 %vm925_vm3, %v5417_v61  ;;  %v4919_v61 = vld [vmem:[%s8871_s3 + $0x148] sm:$0xff] }
 0x334   : > { %6332 = vmatprep.mubr.msk.f32.mxu1 %vm7191_vm2, %v7192_v45  ;;  %v6862_v3 = vpack.c.bf16 %v4919_v61, %v4918_v57 }
 0x337   : > { %v5452_v5 = vpop.f32.mrb[64].mxu0 }
 0x338   : > { %v5453_v8 = vpop.f32.mrb[65].mxu0 }
 0x339   : > { %v5454_v10 = vadd.f32 %v5453_v8, %v5452_v5  ;;  %v5455_v12 = vpop.f32.mrb[66].mxu0  ;;  %v4920_v8 = vld [vmem:[%s8871_s3 + $0x150] sm:$0xff] }
 0x33a   : > { %v5456_v15 = vpop.f32.mrb[67].mxu0 }
 0x33b   : > { %v5457_v17 = vadd.f32 %v5456_v15, %v5455_v12  ;;  %6333 = vmatmul.mubr.msk.f32.vlgmr.msra.gmra.mrb[60].mxu1 %vm925_vm3, %v5454_v10  ;;  %v4923_v15 = vld [vmem:[%s8871_s3 + $0x168] sm:$0xff] }
 0x33c   : > { %6335 = vmatprep.mubr.msk.f32.mxu1 %vm7191_vm2, %v7192_v45  ;;  %6851 = vmatpush3.bf16.msra.mxu1 %v6850_v9  ;;  %v4921_v9 = vld [vmem:[%s8871_s3 + $0x158] sm:$0xff]  ;;  %v6868_v19 = vpack.c.bf16 %v4923_v15, %v4922_v14 }
 0x33d   : > { %6852 = vmatprep.subr.bf16.mxu1 %v7190_v40  ;;  %v6865_v13 = vpack.c.bf16 %v4921_v9, %v4920_v8  ;;  %v4952_v9 = vld [vmem:[%s8871_s3 + $0x1a0] sm:$0xff] }
 0x33f   : > { %v5458_v22 = vpop.f32.mrb[68].mxu0  ;;  %6336 = vmatmul.mubr.msk.f32.gmra.mrb[62].mxu1 %vm925_vm3, %v5457_v17 }
 0x340   : > { %v5459_v23 = vpop.f32.mrb[69].mxu0  ;;  %6338 = vmatprep.mubr.msk.f32.mxu1 %vm7191_vm2, %v7192_v45  ;;  %6854 = vmatpush3.bf16.msra.mxu1 %v6853_v18 }
 0x341   : > { %v5460_v25 = vadd.f32 %v5459_v23, %v5458_v22  ;;  %v5461_v27 = vpop.f32.mrb[70].mxu0  ;;  %6855 = vmatprep.subr.bf16.mxu1 %v7190_v40  ;;  %v4924_v23 = vld [vmem:[%s8871_s3 + $0x170] sm:$0xff] }
 0x342   : > { %v5462_v32 = vpop.f32.mrb[71].mxu0 }
 0x343   : > { %v5463_v33 = vadd.f32 %v5462_v32, %v5461_v27  ;;  %6339 = vmatmul.mubr.msk.f32.gmra.mrb[64].mxu1 %vm925_vm3, %v5460_v25 }
 0x344   : > { %6341 = vmatprep.mubr.msk.f32.mxu1 %vm7191_vm2, %v7192_v45  ;;  %6857 = vmatpush3.bf16.msra.mxu1 %v6856_v24  ;;  %v4925_v24 = vld [vmem:[%s8871_s3 + $0x178] sm:$0xff] }
 0x345   : > { %6858 = vmatprep.subr.bf16.mxu1 %v7190_v40  ;;  %v6871_v28 = vpack.c.bf16 %v4925_v24, %v4924_v23 }
 0x347   : > { %v5464_v37 = vpop.f32.mrb[72].mxu0  ;;  %6342 = vmatmul.mubr.msk.f32.gmra.mrb[66].mxu1 %vm925_vm3, %v5463_v33 }
 0x348   : > { %v5465_v38 = vpop.f32.mrb[73].mxu0  ;;  %6344 = vmatprep.mubr.msk.f32.mxu1 %vm7191_vm2, %v7192_v45  ;;  %6860 = vmatpush3.bf16.msra.mxu1 %v6859_v34 }
 0x349   : > { %v5466_v41 = vadd.f32 %v5465_v38, %v5464_v37  ;;  %v5467_v43 = vpop.f32.mrb[74].mxu0  ;;  %6861 = vmatprep.subr.bf16.mxu1 %v7190_v40 }
 0x34a   : > { %v5468_v44 = vpop.f32.mrb[75].mxu0 }
 0x34b   : > { %v5469_v46 = vadd.f32 %v5468_v44, %v5467_v43  ;;  %6345 = vmatmul.mubr.msk.f32.gmra.mrb[68].mxu1 %vm925_vm3, %v5466_v41 }
 0x34c   : > { %6347 = vmatprep.mubr.msk.f32.mxu1 %vm7191_vm2, %v7192_v45 }
 0x34f   : > { %v5470_v49 = vpop.f32.mrb[76].mxu0  ;;  %6348 = vmatmul.mubr.msk.f32.gmra.mrb[70].mxu1 %vm925_vm3, %v5469_v46 }
 0x350   : > { %v5471_v50 = vpop.f32.mrb[77].mxu0  ;;  %6350 = vmatprep.mubr.msk.f32.mxu1 %vm7191_vm2, %v7192_v45 }
 0x351   : > { %v5472_v53 = vadd.f32 %v5471_v50, %v5470_v49  ;;  %v5473_v54 = vpop.f32.mrb[78].mxu0  ;;  %v4948_v50 = vld [vmem:[%s8871_s3 + $0x180] sm:$0xff] }
 0x352   : > { %v5474_v56 = vpop.f32.mrb[79].mxu0 }
 0x353   : > { %6351 = vmatmul.mubr.msk.f32.gmra.mrb[72].mxu1 %vm925_vm3, %v5472_v53  ;;  %v4949_v53 = vld [vmem:[%s8871_s3 + $0x188] sm:$0xff] }
 0x354   : > { %6369 = vmatprep.mubr.msk.f32.mxu1 %vm7191_vm2, %v7192_v45  ;;  %v6874_v57 = vpack.c.bf16 %v4949_v53, %v4948_v50 }
 0x357   : > { %v5507_v62 = vpop.f32.mrb[80].mxu0 }
 0x358   : > { %v5508_v63 = vpop.f32.mrb[81].mxu0 }
 0x359   : > { %v5509_v4 = vadd.f32 %v5508_v63, %v5507_v62  ;;  %v5510_v5 = vpop.f32.mrb[82].mxu0  ;;  %v4950_v63 = vld [vmem:[%s8871_s3 + $0x190] sm:$0xff] }
 0x35a   : > { %v5511_v10 = vpop.f32.mrb[83].mxu0 }
 0x35b   : > { %v5512_v12 = vadd.f32 %v5511_v10, %v5510_v5  ;;  %6370 = vmatmul.mubr.msk.f32.vlgmr.msra.gmra.mrb[74].mxu1 %vm925_vm3, %v5509_v4  ;;  %v4953_v10 = vld [vmem:[%s8871_s3 + $0x1a8] sm:$0xff] }
 0x35c   : > { %6372 = vmatprep.mubr.msk.f32.mxu1 %vm7191_vm2, %v7192_v45  ;;  %6863 = vmatpush3.bf16.msra.mxu1 %v6862_v3  ;;  %v4951_v3 = vld [vmem:[%s8871_s3 + $0x198] sm:$0xff]  ;;  %v6880_v14 = vpack.c.bf16 %v4953_v10, %v4952_v9 }
 0x35d   : > { %6864 = vmatprep.subr.bf16.mxu1 %v7190_v40  ;;  %v6877_v8 = vpack.c.bf16 %v4951_v3, %v4950_v63  ;;  %v4982_v3 = vld [vmem:[%s8871_s3 + $0x1e0] sm:$0xff] }
 0x35f   : > { %v5513_v17 = vpop.f32.mrb[84].mxu0  ;;  %6373 = vmatmul.mubr.msk.f32.gmra.mrb[76].mxu1 %vm925_vm3, %v5512_v12 }
 0x360   : > { %v5514_v18 = vpop.f32.mrb[85].mxu0  ;;  %6375 = vmatprep.mubr.msk.f32.mxu1 %vm7191_vm2, %v7192_v45  ;;  %6866 = vmatpush3.bf16.msra.mxu1 %v6865_v13 }
 0x361   : > { %v5515_v20 = vadd.f32 %v5514_v18, %v5513_v17  ;;  %v5516_v22 = vpop.f32.mrb[86].mxu0  ;;  %6867 = vmatprep.subr.bf16.mxu1 %v7190_v40  ;;  %v4954_v18 = vld [vmem:[%s8871_s3 + $0x1b0] sm:$0xff] }
 0x362   : > { %v5517_v25 = vpop.f32.mrb[87].mxu0 }
 0x363   : > { %v5518_v27 = vadd.f32 %v5517_v25, %v5516_v22  ;;  %6376 = vmatmul.mubr.msk.f32.gmra.mrb[78].mxu1 %vm925_vm3, %v5515_v20 }
 0x364   : > { %6378 = vmatprep.mubr.msk.f32.mxu1 %vm7191_vm2, %v7192_v45  ;;  %6869 = vmatpush3.bf16.msra.mxu1 %v6868_v19  ;;  %v4955_v19 = vld [vmem:[%s8871_s3 + $0x1b8] sm:$0xff] }
 0x365   : > { %6870 = vmatprep.subr.bf16.mxu1 %v7190_v40  ;;  %v6883_v23 = vpack.c.bf16 %v4955_v19, %v4954_v18 }
 0x367   : > { %v5519_v30 = vpop.f32.mrb[88].mxu0  ;;  %6379 = vmatmul.mubr.msk.f32.gmra.mrb[80].mxu1 %vm925_vm3, %v5518_v27 }
 0x368   : > { %v5520_v32 = vpop.f32.mrb[89].mxu0  ;;  %6381 = vmatprep.mubr.msk.f32.mxu1 %vm7191_vm2, %v7192_v45  ;;  %6872 = vmatpush3.bf16.msra.mxu1 %v6871_v28 }
 0x369   : > { %v5521_v33 = vadd.f32 %v5520_v32, %v5519_v30  ;;  %v5522_v34 = vpop.f32.mrb[90].mxu0  ;;  %6873 = vmatprep.subr.bf16.mxu1 %v7190_v40 }
 0x36a   : > { %v5523_v37 = vpop.f32.mrb[91].mxu0 }
 0x36b   : > { %v5524_v38 = vadd.f32 %v5523_v37, %v5522_v34  ;;  %6382 = vmatmul.mubr.msk.f32.gmra.mrb[82].mxu1 %vm925_vm3, %v5521_v33 }
 0x36c   : > { %6384 = vmatprep.mubr.msk.f32.mxu1 %vm7191_vm2, %v7192_v45 }
 0x36f   : > { %v5525_v41 = vpop.f32.mrb[92].mxu0  ;;  %6385 = vmatmul.mubr.msk.f32.gmra.mrb[84].mxu1 %vm925_vm3, %v5524_v38 }
 0x370   : > { %v5526_v43 = vpop.f32.mrb[93].mxu0  ;;  %6387 = vmatprep.mubr.msk.f32.mxu1 %vm7191_vm2, %v7192_v45 }
 0x371   : > { %v5527_v44 = vadd.f32 %v5526_v43, %v5525_v41  ;;  %v5528_v46 = vpop.f32.mrb[94].mxu0  ;;  %v4978_v43 = vld [vmem:[%s8871_s3 + $0x1c0] sm:$0xff] }
 0x372   : > { %v5529_v49 = vpop.f32.mrb[95].mxu0 }
 0x373   : > { %6388 = vmatmul.mubr.msk.f32.gmra.mrb[86].mxu1 %vm925_vm3, %v5527_v44  ;;  %v4979_v44 = vld [vmem:[%s8871_s3 + $0x1c8] sm:$0xff] }
 0x374   : > { %6406 = vmatprep.mubr.msk.f32.mxu1 %vm7191_vm2, %v7192_v45  ;;  %v6886_v50 = vpack.c.bf16 %v4979_v44, %v4978_v43 }
 0x377   : > { %v5562_v54 = vpop.f32.mrb[96].mxu0 }
 0x378   : > { %v5563_v56 = vpop.f32.mrb[97].mxu0 }
 0x379   : > { %v5564_v61 = vadd.f32 %v5563_v56, %v5562_v54  ;;  %v5565_v62 = vpop.f32.mrb[98].mxu0  ;;  %v4980_v56 = vld [vmem:[%s8871_s3 + $0x1d0] sm:$0xff] }
 0x37a   : > { %v5566_v4 = vpop.f32.mrb[99].mxu0 }
 0x37b   : > { %v5567_v5 = vadd.f32 %v5566_v4, %v5565_v62  ;;  %6407 = vmatmul.mubr.msk.f32.vlgmr.msra.gmra.mrb[88].mxu1 %vm925_vm3, %v5564_v61  ;;  %v4983_v4 = vld [vmem:[%s8871_s3 + $0x1e8] sm:$0xff] }
 0x37c   : > { %6409 = vmatprep.mubr.msk.f32.mxu1 %vm7191_vm2, %v7192_v45  ;;  %6875 = vmatpush3.bf16.msra.mxu1 %v6874_v57  ;;  %v4981_v57 = vld [vmem:[%s8871_s3 + $0x1d8] sm:$0xff]  ;;  %v6892_v9 = vpack.c.bf16 %v4983_v4, %v4982_v3 }
 0x37d   : > { %6876 = vmatprep.subr.bf16.mxu1 %v7190_v40  ;;  %v6889_v63 = vpack.c.bf16 %v4981_v57, %v4980_v56  ;;  %v5012_v57 = vld [vmem:[%s8871_s3 + $0x220] sm:$0xff] }
 0x37f   : > { %v5568_v12 = vpop.f32.mrb[100].mxu0  ;;  %6410 = vmatmul.mubr.msk.f32.gmra.mrb[90].mxu1 %vm925_vm3, %v5567_v5 }
 0x380   : > { %v5569_v13 = vpop.f32.mrb[101].mxu0  ;;  %6412 = vmatprep.mubr.msk.f32.mxu1 %vm7191_vm2, %v7192_v45  ;;  %6878 = vmatpush3.bf16.msra.mxu1 %v6877_v8 }
 0x381   : > { %v5570_v15 = vadd.f32 %v5569_v13, %v5568_v12  ;;  %v5571_v17 = vpop.f32.mrb[102].mxu0  ;;  %6879 = vmatprep.subr.bf16.mxu1 %v7190_v40  ;;  %v4984_v13 = vld [vmem:[%s8871_s3 + $0x1f0] sm:$0xff] }
 0x382   : > { %v5572_v20 = vpop.f32.mrb[103].mxu0 }
 0x383   : > { %v5573_v22 = vadd.f32 %v5572_v20, %v5571_v17  ;;  %6413 = vmatmul.mubr.msk.f32.gmra.mrb[92].mxu1 %vm925_vm3, %v5570_v15 }
 0x384   : > { %6415 = vmatprep.mubr.msk.f32.mxu1 %vm7191_vm2, %v7192_v45  ;;  %6881 = vmatpush3.bf16.msra.mxu1 %v6880_v14  ;;  %v4985_v14 = vld [vmem:[%s8871_s3 + $0x1f8] sm:$0xff] }
 0x385   : > { %6882 = vmatprep.subr.bf16.mxu1 %v7190_v40  ;;  %v6895_v18 = vpack.c.bf16 %v4985_v14, %v4984_v13 }
 0x387   : > { %v5574_v24 = vpop.f32.mrb[104].mxu0  ;;  %6416 = vmatmul.mubr.msk.f32.gmra.mrb[94].mxu1 %vm925_vm3, %v5573_v22 }
 0x388   : > { %v5575_v25 = vpop.f32.mrb[105].mxu0  ;;  %6418 = vmatprep.mubr.msk.f32.mxu1 %vm7191_vm2, %v7192_v45  ;;  %6884 = vmatpush3.bf16.msra.mxu1 %v6883_v23 }
 0x389   : > { %v5576_v27 = vadd.f32 %v5575_v25, %v5574_v24  ;;  %v5577_v28 = vpop.f32.mrb[106].mxu0  ;;  %6885 = vmatprep.subr.bf16.mxu1 %v7190_v40 }
 0x38a   : > { %v5578_v30 = vpop.f32.mrb[107].mxu0 }
 0x38b   : > { %v5579_v32 = vadd.f32 %v5578_v30, %v5577_v28  ;;  %6419 = vmatmul.mubr.msk.f32.gmra.mrb[96].mxu1 %vm925_vm3, %v5576_v27 }
 0x38c   : > { %6421 = vmatprep.mubr.msk.f32.mxu1 %vm7191_vm2, %v7192_v45 }
 0x38f   : > { %v5580_v33 = vpop.f32.mrb[108].mxu0  ;;  %6422 = vmatmul.mubr.msk.f32.gmra.mrb[98].mxu1 %vm925_vm3, %v5579_v32 }
 0x390   : > { %v5581_v34 = vpop.f32.mrb[109].mxu0  ;;  %6424 = vmatprep.mubr.msk.f32.mxu1 %vm7191_vm2, %v7192_v45 }
 0x391   : > { %v5582_v37 = vadd.f32 %v5581_v34, %v5580_v33  ;;  %v5583_v38 = vpop.f32.mrb[110].mxu0  ;;  %v5008_v34 = vld [vmem:[%s8871_s3 + $0x200] sm:$0xff] }
 0x392   : > { %v5584_v41 = vpop.f32.mrb[111].mxu0 }
 0x393   : > { %6425 = vmatmul.mubr.msk.f32.gmra.mrb[100].mxu1 %vm925_vm3, %v5582_v37  ;;  %v5009_v37 = vld [vmem:[%s8871_s3 + $0x208] sm:$0xff] }
 0x394   : > { %6443 = vmatprep.mubr.msk.f32.mxu1 %vm7191_vm2, %v7192_v45  ;;  %v6898_v43 = vpack.c.bf16 %v5009_v37, %v5008_v34 }
 0x397   : > { %v5617_v46 = vpop.f32.mrb[112].mxu0 }
 0x398   : > { %v5618_v49 = vpop.f32.mrb[113].mxu0 }
 0x399   : > { %v5619_v53 = vadd.f32 %v5618_v49, %v5617_v46  ;;  %v5620_v54 = vpop.f32.mrb[114].mxu0  ;;  %v5010_v49 = vld [vmem:[%s8871_s3 + $0x210] sm:$0xff] }
 0x39a   : > { %v5621_v61 = vpop.f32.mrb[115].mxu0 }
 0x39b   : > { %v5622_v62 = vadd.f32 %v5621_v61, %v5620_v54  ;;  %6444 = vmatmul.mubr.msk.f32.vlgmr.msra.gmra.mrb[102].mxu1 %vm925_vm3, %v5619_v53  ;;  %v5013_v61 = vld [vmem:[%s8871_s3 + $0x228] sm:$0xff] }
 0x39c   : > { %6446 = vmatprep.mubr.msk.f32.mxu1 %vm7191_vm2, %v7192_v45  ;;  %6887 = vmatpush3.bf16.msra.mxu1 %v6886_v50  ;;  %v5011_v50 = vld [vmem:[%s8871_s3 + $0x218] sm:$0xff]  ;;  %v6904_v3 = vpack.c.bf16 %v5013_v61, %v5012_v57 }
 0x39d   : > { %6888 = vmatprep.subr.bf16.mxu1 %v7190_v40  ;;  %v6901_v56 = vpack.c.bf16 %v5011_v50, %v5010_v49 }
 0x39f   : > { %v5623_v5 = vpop.f32.mrb[116].mxu0  ;;  %6447 = vmatmul.mubr.msk.f32.gmra.mrb[104].mxu1 %vm925_vm3, %v5622_v62 }
 0x3a0   : > { %v5624_v8 = vpop.f32.mrb[117].mxu0  ;;  %6449 = vmatprep.mubr.msk.f32.mxu1 %vm7191_vm2, %v7192_v45  ;;  %6890 = vmatpush3.bf16.msra.mxu1 %v6889_v63 }
 0x3a1   : > { %v5625_v10 = vadd.f32 %v5624_v8, %v5623_v5  ;;  %v5626_v12 = vpop.f32.mrb[118].mxu0  ;;  %6891 = vmatprep.subr.bf16.mxu1 %v7190_v40  ;;  %v5014_v8 = vld [vmem:[%s8871_s3 + $0x230] sm:$0xff] }
 0x3a2   : > { %v5627_v15 = vpop.f32.mrb[119].mxu0 }
 0x3a3   : > { %v5628_v17 = vadd.f32 %v5627_v15, %v5626_v12  ;;  %6450 = vmatmul.mubr.msk.f32.gmra.mrb[106].mxu1 %vm925_vm3, %v5625_v10 }
 0x3a4   : > { %6452 = vmatprep.mubr.msk.f32.mxu1 %vm7191_vm2, %v7192_v45  ;;  %6893 = vmatpush3.bf16.msra.mxu1 %v6892_v9  ;;  %v5015_v9 = vld [vmem:[%s8871_s3 + $0x238] sm:$0xff] }
 0x3a5   : > { %6894 = vmatprep.subr.bf16.mxu1 %v7190_v40  ;;  %v6907_v13 = vpack.c.bf16 %v5015_v9, %v5014_v8  ;;  %v7107_v8 = vld [vmem:[%s8870_s2 + $0x1fc] ss:$8 sps:$4 sm:$0xff]  }
 0x3a7   : > { %v5629_v19 = vpop.f32.mrb[120].mxu0  ;;  %6453 = vmatmul.mubr.msk.f32.gmra.mrb[108].mxu1 %vm925_vm3, %v5628_v17 }
 0x3a8   : > { %v5630_v20 = vpop.f32.mrb[121].mxu0  ;;  %6455 = vmatprep.mubr.msk.f32.mxu1 %vm7191_vm2, %v7192_v45  ;;  %6896 = vmatpush3.bf16.msra.mxu1 %v6895_v18 }
 0x3a9   : > { %v5631_v22 = vadd.f32 %v5630_v20, %v5629_v19  ;;  %v5632_v23 = vpop.f32.mrb[122].mxu0  ;;  %6897 = vmatprep.subr.bf16.mxu1 %v7190_v40 }
 0x3aa   : > { %v5633_v24 = vpop.f32.mrb[123].mxu0 }
 0x3ab   : > { %v5634_v25 = vadd.f32 %v5633_v24, %v5632_v23  ;;  %6456 = vmatmul.mubr.msk.f32.gmra.mrb[110].mxu1 %vm925_vm3, %v5631_v22 }
 0x3ac   : > { %6458 = vmatprep.mubr.msk.f32.mxu1 %vm7191_vm2, %v7192_v45 }
 0x3af   : > { %v5635_v27 = vpop.f32.mrb[124].mxu0  ;;  %6459 = vmatmul.mubr.msk.f32.gmra.mrb[112].mxu1 %vm925_vm3, %v5634_v25 }
 0x3b0   : > { %v5636_v28 = vpop.f32.mrb[125].mxu0  ;;  %6461 = vmatprep.mubr.msk.f32.mxu1 %vm7191_vm2, %v7192_v45 }
 0x3b1   : > { %v5637_v30 = vadd.f32 %v5636_v28, %v5635_v27  ;;  %v5638_v32 = vpop.f32.mrb[126].mxu0 }
 0x3b2   : > { %v5639_v33 = vpop.f32.mrb[127].mxu0 }
 0x3b3   : > { %6462 = vmatmul.mubr.msk.f32.gmra.mrb[114].mxu1 %vm925_vm3, %v5637_v30 }
 0x3b4   : > { %6480 = vmatprep.mubr.msk.f32.mxu1 %vm7191_vm2, %v7192_v45 }
 0x3b7   : > { %v5672_v38 = vpop.f32.mrb[128].mxu0 }
 0x3b8   : > { %v5673_v41 = vpop.f32.mrb[129].mxu0 }
 0x3b9   : > { %v5674_v44 = vadd.f32 %v5673_v41, %v5672_v38  ;;  %v5675_v46 = vpop.f32.mrb[130].mxu0 }
 0x3ba   : > { %v5676_v53 = vpop.f32.mrb[131].mxu0 }
 0x3bb   : > { %v5677_v54 = vadd.f32 %v5676_v53, %v5675_v46  ;;  %6481 = vmatmul.mubr.msk.f32.vlgmr.msra.gmra.mrb[116].mxu1 %vm925_vm3, %v5674_v44 }
 0x3bc   : > { %6899 = vmatpush3.bf16.msra.mxu1 %v6898_v43  ;;  %6483 = vmatprep.mubr.msk.f32.mxu1 %vm7191_vm2, %v7192_v45 }
 0x3bd   : > { %6900 = vmatprep.subr.bf16.mxu1 %v7190_v40 }
 0x3bf   : > { %v5678_v62 = vpop.f32.mrb[132].mxu0  ;;  %6484 = vmatmul.mubr.msk.f32.gmra.mrb[118].mxu1 %vm925_vm3, %v5677_v54 }
 0x3c0   : > { %6902 = vmatpush3.bf16.msra.mxu1 %v6901_v56  ;;  %v5679_v63 = vpop.f32.mrb[133].mxu0  ;;  %6486 = vmatprep.mubr.msk.f32.mxu1 %vm7191_vm2, %v7192_v45 }
 0x3c1   : > { %v5680_v4 = vadd.f32 %v5679_v63, %v5678_v62  ;;  %v5681_v5 = vpop.f32.mrb[134].mxu0  ;;  %6903 = vmatprep.subr.bf16.mxu1 %v7190_v40 }
 0x3c2   : > { %v5682_v10 = vpop.f32.mrb[135].mxu0 }
 0x3c3   : > { %v5683_v12 = vadd.f32 %v5682_v10, %v5681_v5  ;;  %6487 = vmatmul.mubr.msk.f32.gmra.mrb[120].mxu1 %vm925_vm3, %v5680_v4 }
 0x3c4   : > { %6905 = vmatpush3.bf16.msra.mxu1 %v6904_v3  ;;  %6489 = vmatprep.mubr.msk.f32.mxu1 %vm7191_vm2, %v7192_v45 }
 0x3c5   : > { %6906 = vmatprep.subr.bf16.mxu1 %v7190_v40 }
 0x3c7   : > { %v5684_v14 = vpop.f32.mrb[136].mxu0  ;;  %6490 = vmatmul.mubr.msk.f32.gmra.mrb[122].mxu1 %vm925_vm3, %v5683_v12 }
 0x3c8   : > { %6908 = vmatpush3.bf16.msra.mxu1 %v6907_v13  ;;  %v5685_v15 = vpop.f32.mrb[137].mxu0  ;;  %6492 = vmatprep.mubr.msk.f32.mxu1 %vm7191_vm2, %v7192_v45 }
 0x3c9   : > { %v5686_v17 = vadd.f32 %v5685_v15, %v5684_v14  ;;  %5766 = vmatprep.subr.bf16.mxu1 %v7375_v31  ;;  %v5687_v18 = vpop.f32.mrb[138].mxu0 }
 0x3ca   : > { %v5688_v19 = vpop.f32.mrb[139].mxu0 }
 0x3cb   : > { %v5689_v20 = vadd.f32 %v5688_v19, %v5687_v18  ;;  %6493 = vmatmul.mubr.msk.f32.gmra.mrb[124].mxu1 %vm925_vm3, %v5686_v17  ;;  %v7105_v19 = vld [vmem:[%s8870_s2 + $0x1f8] ss:$8 sps:$4 sm:$0xff]  }
 0x3cc   : > { %6495 = vmatprep.mubr.msk.f32.mxu1 %vm7191_vm2, %v7192_v45 }
 0x3cf   : > { %v5690_v22 = vpop.f32.mrb[140].mxu0  ;;  %6496 = vmatmul.mubr.msk.f32.gmra.mrb[126].mxu1 %vm925_vm3, %v5689_v20 }
 0x3d0   : > { %v5691_v23 = vpop.f32.mrb[141].mxu0  ;;  %6498 = vmatprep.mubr.msk.f32.mxu1 %vm7191_vm2, %v7192_v45 }
 0x3d1   : > { %v5692_v24 = vadd.f32 %v5691_v23, %v5690_v22  ;;  %v5693_v25 = vpop.f32.mrb[142].mxu0 }
 0x3d2   : > { %v5694_v27 = vpop.f32.mrb[143].mxu0 }
 0x3d3   : > { %6499 = vmatmul.mubr.msk.f32.gmra.mrb[128].mxu1 %vm925_vm3, %v5692_v24  ;;  %v7110_v27 = vld [vmem:[%s8870_s2 + $0x208] ss:$8 sps:$4 sm:$0xff]  }
 0x3d4   : > { %6517 = vmatprep.mubr.msk.f32.mxu1 %vm7191_vm2, %v7192_v45 }
 0x3d7   : > { %v5727_v28 = vpop.f32.mrb[144].mxu0 }
 0x3d8   : > { %v5728_v30 = vpop.f32.mrb[145].mxu0 }
 0x3d9   : > { %v5729_v32 = vadd.f32 %v5728_v30, %v5727_v28  ;;  %v5730_v33 = vpop.f32.mrb[146].mxu0 }
 0x3da   : > { %v5731_v34 = vpop.f32.mrb[147].mxu0 }
 0x3db   : > { %v5732_v37 = vadd.f32 %v5731_v34, %v5730_v33  ;;  %6518 = vmatmul.mubr.msk.f32.vlgmr.msra.gmra.mrb[130].mxu1 %vm925_vm3, %v5729_v32 }
 0x3dc   : > { %5767 = vmatpush3.bf16.msra.mxu1 %v7359_v55  ;;  %6520 = vmatprep.mubr.msk.f32.mxu1 %vm7191_vm2, %v7192_v45 }
 0x3dd   : > { %5768 = vmatprep.subr.bf16.mxu1 %v7380_v36 }
 0x3df   : > { %v5733_v38 = vpop.f32.mrb[148].mxu0  ;;  %6521 = vmatmul.mubr.msk.f32.gmra.mrb[132].mxu1 %vm925_vm3, %v5732_v37 }
 0x3e0   : > { %5769 = vmatpush3.bf16.msra.mxu1 %v7361_v60  ;;  %v5734_v41 = vpop.f32.mrb[149].mxu0  ;;  %6523 = vmatprep.mubr.msk.f32.mxu1 %vm7191_vm2, %v7192_v45 }
 0x3e1   : > { %v5735_v43 = vadd.f32 %v5734_v41, %v5733_v38  ;;  %5770 = vmatprep.subr.bf16.mxu1 %v7384_v42  ;;  %v5736_v44 = vpop.f32.mrb[150].mxu0  ;;  %v7113_v38 = vld [vmem:[%s8870_s2 + $0x218] ss:$8 sps:$4 sm:$0xff]  }
 0x3e2   : > { %v5737_v46 = vpop.f32.mrb[151].mxu0 }
 0x3e3   : > { %v5738_v49 = vadd.f32 %v5737_v46, %v5736_v44  ;;  %6524 = vmatmul.mubr.msk.f32.gmra.mrb[134].mxu1 %vm925_vm3, %v5735_v43  ;;  %v7118_v46 = vld [vmem:[%s8870_s2 + $0x234] ss:$8 sps:$4 sm:$0xff]  }
 0x3e4   : > { %5771 = vmatpush3.bf16.msra.mxu1 %v7363_v1  ;;  %6526 = vmatprep.mubr.msk.f32.mxu1 %vm7191_vm2, %v7192_v45 }
 0x3e5   : > { %5772 = vmatprep.subr.bf16.mxu1 %v7388_v47 }
 0x3e7   : > { %v5739_v50 = vpop.f32.mrb[152].mxu0  ;;  %6527 = vmatmul.mubr.msk.f32.gmra.mrb[136].mxu1 %vm925_vm3, %v5738_v49 }
 0x3e8   : > { %5773 = vmatpush3.bf16.msra.mxu1 %v7365_v6  ;;  %v5740_v53 = vpop.f32.mrb[153].mxu0  ;;  %6529 = vmatprep.mubr.msk.f32.mxu1 %vm7191_vm2, %v7192_v45 }
 0x3e9   : > { %v5741_v54 = vadd.f32 %v5740_v53, %v5739_v50  ;;  %5774 = vmatprep.subr.bf16.mxu1 %v7392_v52  ;;  %v5742_v56 = vpop.f32.mrb[154].mxu0 }
 0x3ea   : > { %v5743_v57 = vpop.f32.mrb[155].mxu0 }
 0x3eb   : > { %v5744_v61 = vadd.f32 %v5743_v57, %v5742_v56  ;;  %6530 = vmatmul.mubr.msk.f32.gmra.mrb[138].mxu1 %vm925_vm3, %v5741_v54 }
 0x3ec   : > { %5775 = vmatpush3.bf16.msra.mxu1 %v7367_v11  ;;  %6532 = vmatprep.mubr.msk.f32.mxu1 %vm7191_vm2, %v7192_v45 }
 0x3ed   : > { %5776 = vmatprep.subr.bf16.mxu1 %v7396_v58 }
 0x3ee   : > { %v1373_v62 = vpop.f32.mrb[46].mxu1 }
 0x3ef   : > { %v1407_v63 = vadd.f32 %v1373_v62, %v7796_v29  ;;  %v6297_v3 = vpop.f32.mrb[47].mxu1  ;;  %v5745_v4 = vpop.f32.mrb[156].mxu0  ;;  %6533 = vmatmul.mubr.msk.f32.gmra.mrb[140].mxu1 %vm925_vm3, %v5744_v61  ;;  %v7116_v61 = vld [vmem:[%s8870_s2 + $0x230] ss:$8 sps:$4 sm:$0xff]   ;;  %v7119_v62 = vld [vmem:[%s8870_s2 + $0x244] ss:$8 sps:$4 sm:$0xff]  }
 0x3f0   : > { %5777 = vmatpush3.bf16.msra.mxu1 %v7369_v16  ;;  %v5746_v5 = vpop.f32.mrb[157].mxu0  ;;  %6535 = vmatprep.mubr.msk.f32.mxu1 %vm7191_vm2, %v7192_v45 }
 0x3f1   : > { %v5747_v9 = vadd.f32 %v5746_v5, %v5745_v4  ;;  %5778 = vmatprep.subr.bf16.mxu1 %v7400_v0  ;;  %v5748_v10 = vpop.f32.mrb[158].mxu0 }
 0x3f2   : > { %v1378_v12 = vpop.f32.mrb[48].mxu1  ;;  %v5749_v29 = vpop.f32.mrb[159].mxu0  ;;  %v7121_v10 = vld [vmem:[%s8870_s2 + $0x240] ss:$8 sps:$4 sm:$0xff]  }
 0x3f3   : > { %v1408_v13 = vadd.f32 %v1378_v12, %v7803_v35  ;;  %v6300_v14 = vpop.f32.mrb[49].mxu1  ;;  %6536 = vmatmul.mubr.msk.f32.gmra.mrb[142].mxu1 %vm925_vm3, %v5747_v9  ;;  %v7108_v35 = vld [vmem:[%s8870_s2 + $0x20c] ss:$8 sps:$4 sm:$0xff]  }
 0x3f4   : > { %5779 = vmatpush3.bf16.msra.mxu1 %v7371_v21  ;;  %2967 = vmatprep.mubr.bf16.mxu1 %v7107_v8  ;;  %v7122_v12 = vld [vmem:[%s8870_s2 + $0x254] ss:$8 sps:$4 sm:$0xff]  }
 0x3f5   : > { %5780 = vmatprep.subr.bf16.mxu1 %v7404_v7 }
 0x3f6   : > { %v1383_v15 = vpop.f32.mrb[50].mxu1 }
 0x3f7   : > { %v1409_v17 = vadd.f32 %v1383_v15, %v7807_v39  ;;  %v6303_v18 = vpop.f32.mrb[51].mxu1  ;;  %v5059_v15 = vld [vmem:[%s8870_s2 + $0x260] sm:$0x11] }
 0x3f8   : > { %5781 = vmatpush3.bf16.msra.mxu1 %v7373_v26 }
 0x3f9   : > { %5821 = vmatprep.subr.bf16.mxu1 %v7375_v31 }
 0x3fa   : > { %v1388_v20 = vpop.f32.mrb[52].mxu1 }
 0x3fb   : > { %v1410_v22 = vadd.f32 %v1388_v20, %v7817_v48  ;;  %2968 = vmatmul.mubr.bf16.vlgmr.msra.gmra.mrb[144].mxu1 %v7105_v19  ;;  %v6306_v23 = vpop.f32.mrb[53].mxu1  ;;  %v7111_v48 = vld [vmem:[%s8870_s2 + $0x21c] ss:$8 sps:$4 sm:$0xff]   ;;  %v5067_v20 = vcombine.high %v5059_v15, %v5059_v15 }
 0x3fc   : > { %5822 = vmatpush3.bf16.msra.mxu1 %v7359_v55  ;;  %2975 = vmatprep.mubr.bf16.mxu1 %v7108_v35  ;;  %v7124_v35 = vld [vmem:[%s8870_s2 + $0x250] ss:$8 sps:$4 sm:$0xff]  }
 0x3fd   : > { %5823 = vmatprep.subr.bf16.mxu1 %v7380_v36 }
 0x3fe   : > { %v1393_v39 = vpop.f32.mrb[54].mxu1 }
 0x3ff   : > { %v1411_v24 = vadd.f32 %v1393_v39, %v7819_v51  ;;  %v6309_v25 = vpop.f32.mrb[55].mxu1  ;;  %v5029_v51 = vld [vmem:[%s8870_s2 + $0x228] sm:$0x11] }
 0x400   : > { %5824 = vmatpush3.bf16.msra.mxu1 %v7361_v60 }
 0x401   : > { %5825 = vmatprep.subr.bf16.mxu1 %v7384_v42 }
 0x402   : > { %v1398_v28 = vpop.f32.mrb[56].mxu1 }
 0x403   : > { %v1412_v30 = vadd.f32 %v1398_v28, %v7827_v59  ;;  %2976 = vmatmul.mubr.bf16.gmra.mrb[148].mxu1 %v7110_v27  ;;  %v6312_v32 = vpop.f32.mrb[57].mxu1  ;;  %v5037_v59 = vcombine.high %v5029_v51, %v5029_v51 }
 0x404   : > { %5826 = vmatpush3.bf16.msra.mxu1 %v7363_v1  ;;  %2983 = vmatprep.mubr.bf16.mxu1 %v7111_v48 }
 0x405   : > { %5827 = vmatprep.subr.bf16.mxu1 %v7388_v47 }
 0x406   : > { %v1403_v33 = vpop.f32.mrb[58].mxu1 }
 0x407   : > { %v1413_v34 = vadd.f32 %v1403_v33, %v7832_v2  ;;  %v6315_v37 = vpop.f32.mrb[59].mxu1  ;;  %v5036_v2 = vcombine.low %v5029_v51, %v5029_v51  ;;  %v5038_v51 = vld [vmem:[%s8871_s3 + $0x240] sm:$0xff]  ;;  %v5039_v33 = vld [vmem:[%s8871_s3 + $0x248] sm:$0xff] }
 0x408   : > { %5828 = vmatpush3.bf16.msra.mxu1 %v7365_v6 }
 0x409   : > { %5829 = vmatprep.subr.bf16.mxu1 %v7392_v52 }
 0x40b   : > { %2984 = vmatmul.mubr.bf16.gmra.mrb[152].mxu1 %v7113_v38 }
 0x40c   : > { %5830 = vmatpush3.bf16.msra.mxu1 %v7367_v11  ;;  %2991 = vmatprep.mubr.bf16.mxu1 %v5037_v59 }
 0x40d   : > { %5831 = vmatprep.subr.bf16.mxu1 %v7396_v58 }
 0x40e   : > { %v1619_v41 = vpop.f32.mrb[60].mxu1 }
 0x40f   : > { %v1653_v43 = vadd.f32 %v1619_v41, %v1407_v63  ;;  %v6334_v44 = vpop.f32.mrb[61].mxu1 }
 0x410   : > { %5832 = vmatpush3.bf16.msra.mxu1 %v7369_v16 }
 0x411   : > { %5833 = vmatprep.subr.bf16.mxu1 %v7400_v0 }
 0x412   : > { %v1624_v49 = vpop.f32.mrb[62].mxu1 }
 0x413   : > { %v1654_v50 = vadd.f32 %v1624_v49, %v1408_v13  ;;  %2992 = vmatmul.mubr.bf16.gmra.mrb[156].mxu1 %v5036_v2  ;;  %v6337_v53 = vpop.f32.mrb[63].mxu1  ;;  %v5040_v2 = vld [vmem:[%s8871_s3 + $0x250] sm:$0xff] }
 0x414   : > { %5834 = vmatpush3.bf16.msra.mxu1 %v7371_v21  ;;  %3213 = vmatprep.mubr.bf16.mxu1 %v7118_v46  ;;  %v5041_v46 = vld [vmem:[%s8871_s3 + $0x258] sm:$0xff] }
 0x415   : > { %5835 = vmatprep.subr.bf16.mxu1 %v7404_v7  ;;  %v6913_v49 = vpack.c.bf16 %v5041_v46, %v5040_v2 }
 0x416   : > { %v1629_v54 = vpop.f32.mrb[64].mxu1 }
 0x417   : > { %v1655_v56 = vadd.f32 %v1629_v54, %v1409_v17  ;;  %v6340_v57 = vpop.f32.mrb[65].mxu1 }
 0x418   : > { %5836 = vmatpush3.bf16.msra.mxu1 %v7373_v26 }
 0x419   : > { %6933 = vmatprep.subr.bf16.mxu1 %v7190_v40 }
 0x41a   : > { %v1634_v63 = vpop.f32.mrb[66].mxu1 }
 0x41b   : > { %v1656_v3 = vadd.f32 %v1634_v63, %v1410_v22  ;;  %3214 = vmatmul.mubr.bf16.vlgmr.msra.gmra.mrb[160].mxu1 %v7116_v61  ;;  %v6343_v4 = vpop.f32.mrb[67].mxu1  ;;  %v5043_v63 = vld [vmem:[%s8871_s3 + $0x268] sm:$0xff] }
 0x41c   : > { %3221 = vmatprep.mubr.bf16.mxu1 %v7119_v62  ;;  %v5042_v62 = vld [vmem:[%s8871_s3 + $0x260] sm:$0xff]  ;;  %v5044_v4 = vld [vmem:[%s8871_s3 + $0x270] sm:$0xff] }
 0x41e   : > { %v1639_v5 = vpop.f32.mrb[68].mxu1 }
 0x41f   : > { %v1657_v8 = vadd.f32 %v1639_v5, %v1411_v24  ;;  %v6346_v9 = vpop.f32.mrb[69].mxu1  ;;  %v5066_v24 = vcombine.low %v5059_v15, %v5059_v15  ;;  %v5045_v5 = vld [vmem:[%s8871_s3 + $0x278] sm:$0xff] }
 0x422   : > { %v1644_v29 = vpop.f32.mrb[70].mxu1 }
 0x423   : > { %v1658_v13 = vadd.f32 %v1644_v29, %v1412_v30  ;;  %3222 = vmatmul.mubr.bf16.gmra.mrb[164].mxu1 %v7121_v10  ;;  %v6349_v14 = vpop.f32.mrb[71].mxu1 }
 0x424   : > { %3229 = vmatprep.mubr.bf16.mxu1 %v7122_v12 }
 0x426   : > { %v1649_v17 = vpop.f32.mrb[72].mxu1 }
 0x427   : > { %v1659_v18 = vadd.f32 %v1649_v17, %v1413_v34  ;;  %v6352_v19 = vpop.f32.mrb[73].mxu1  ;;  %v6910_v34 = vpack.c.bf16 %v5039_v33, %v5038_v51 }
 0x429   : > { %6911 = vmatpush3.bf16.msra.mxu0 %v6910_v34 }
 0x42a   : > { %6912 = vmatprep.subr.bf16.mxu0 %v7190_v40 }
 0x42b   : > { %3230 = vmatmul.mubr.bf16.gmra.mrb[168].mxu1 %v7124_v35 }
 0x42c   : > { %3237 = vmatprep.mubr.bf16.mxu1 %v5067_v20 }
 0x42d   : > { %6914 = vmatpush3.bf16.msra.mxu0 %v6913_v49 }
 0x42e   : > { %v1865_v22 = vpop.f32.mrb[74].mxu1  ;;  %6915 = vmatprep.subr.bf16.mxu0 %v7190_v40 }
 0x42f   : > { %v1899_v23 = vadd.f32 %v1865_v22, %v1653_v43  ;;  %v6371_v39 = vpop.f32.mrb[75].mxu1 }
 0x432   : > { %v1870_v25 = vpop.f32.mrb[76].mxu1 }
 0x433   : > { %v1900_v27 = vadd.f32 %v1870_v25, %v1654_v50  ;;  %3238 = vmatmul.mubr.bf16.gmra.mrb[172].mxu1 %v5066_v24  ;;  %v6374_v48 = vpop.f32.mrb[77].mxu1 }
 0x434   : > { %6628 = vmatprep.mubr.msk.f32.mxu1 %vm7191_vm2, %v7192_v45 }
 0x436   : > { %v1875_v28 = vpop.f32.mrb[78].mxu1 }
 0x437   : > { %v1901_v30 = vadd.f32 %v1875_v28, %v1655_v56  ;;  %v6377_v32 = vpop.f32.mrb[79].mxu1 }
 0x43a   : > { %v1880_v37 = vpop.f32.mrb[80].mxu1 }
 0x43b   : > { %v1902_v38 = vadd.f32 %v1880_v37, %v1656_v3  ;;  %v6380_v59 = vpop.f32.mrb[81].mxu1  ;;  %v6916_v3 = vpack.c.bf16 %v5043_v63, %v5042_v62 }
 0x43d   : > { %6917 = vmatpush3.bf16.msra.mxu0 %v6916_v3 }
 0x43e   : > { %v1885_v41 = vpop.f32.mrb[82].mxu1  ;;  %6918 = vmatprep.subr.bf16.mxu0 %v7190_v40 }
 0x43f   : > { %v1903_v43 = vadd.f32 %v1885_v41, %v1657_v8  ;;  %v6383_v44 = vpop.f32.mrb[83].mxu1  ;;  %v6919_v8 = vpack.c.bf16 %v5045_v5, %v5044_v4 }
 0x441   : > { %6920 = vmatpush3.bf16.msra.mxu0 %v6919_v8 }
 0x442   : > { %v1890_v50 = vpop.f32.mrb[84].mxu1  ;;  %6921 = vmatprep.subr.bf16.mxu0 %v7190_v40 }
 0x443   : > { %v1904_v53 = vadd.f32 %v1890_v50, %v1658_v13  ;;  %v6386_v54 = vpop.f32.mrb[85].mxu1 }
 0x446   : > { %v1895_v56 = vpop.f32.mrb[86].mxu1 }
 0x447   : > { %v1905_v57 = vadd.f32 %v1895_v56, %v1659_v18  ;;  %v6389_v61 = vpop.f32.mrb[87].mxu1 }
 0x44e   : > { %v2111_v9 = vpop.f32.mrb[88].mxu1 }
 0x44f   : > { %v2145_v10 = vadd.f32 %v2111_v9, %v1899_v23  ;;  %v6408_v12 = vpop.f32.mrb[89].mxu1 }
 0x452   : > { %v2116_v29 = vpop.f32.mrb[90].mxu1 }
 0x453   : > { %v2146_v13 = vadd.f32 %v2116_v29, %v1900_v27  ;;  %v6411_v14 = vpop.f32.mrb[91].mxu1 }
 0x456   : > { %v2121_v15 = vpop.f32.mrb[92].mxu1 }
 0x457   : > { %v2147_v17 = vadd.f32 %v2121_v15, %v1901_v30  ;;  %v6414_v18 = vpop.f32.mrb[93].mxu1 }
 0x45a   : > { %v2126_v19 = vpop.f32.mrb[94].mxu1 }
 0x45b   : > { %v2148_v35 = vadd.f32 %v2126_v19, %v1902_v38  ;;  %v6417_v20 = vpop.f32.mrb[95].mxu1 }
 0x45e   : > { %v2131_v22 = vpop.f32.mrb[96].mxu1 }
 0x45f   : > { %v2149_v39 = vadd.f32 %v2131_v22, %v1903_v43  ;;  %v6420_v24 = vpop.f32.mrb[97].mxu1 }
 0x462   : > { %v2136_v25 = vpop.f32.mrb[98].mxu1 }
 0x463   : > { %v2150_v48 = vadd.f32 %v2136_v25, %v1904_v53  ;;  %v6423_v28 = vpop.f32.mrb[99].mxu1 }
 0x466   : > { %v2141_v32 = vpop.f32.mrb[100].mxu1 }
 0x467   : > { %v2151_v23 = vadd.f32 %v2141_v32, %v1905_v57  ;;  %v6426_v51 = vpop.f32.mrb[101].mxu1 }
 0x46e   : > { %v2357_v33 = vpop.f32.mrb[102].mxu1 }
 0x46f   : > { %v2391_v34 = vadd.f32 %v2357_v33, %v2145_v10  ;;  %v6445_v37 = vpop.f32.mrb[103].mxu1 }
 0x472   : > { %v2362_v27 = vpop.f32.mrb[104].mxu1 }
 0x473   : > { %v2392_v59 = vadd.f32 %v2362_v27, %v2146_v13  ;;  %v6448_v41 = vpop.f32.mrb[105].mxu1 }
 0x476   : > { %v2367_v30 = vpop.f32.mrb[106].mxu1 }
 0x477   : > { %v2393_v44 = vadd.f32 %v2367_v30, %v2147_v17  ;;  %v6451_v2 = vpop.f32.mrb[107].mxu1 }
 0x47a   : > { %v2372_v38 = vpop.f32.mrb[108].mxu1 }
 0x47b   : > { %v2394_v46 = vadd.f32 %v2372_v38, %v2148_v35  ;;  %v6454_v49 = vpop.f32.mrb[109].mxu1 }
 0x47e   : > { %v2377_v43 = vpop.f32.mrb[110].mxu1 }
 0x47f   : > { %v2395_v50 = vadd.f32 %v2377_v43, %v2149_v39  ;;  %v6457_v54 = vpop.f32.mrb[111].mxu1 }
 0x482   : > { %v2382_v53 = vpop.f32.mrb[112].mxu1 }
 0x483   : > { %v2396_v56 = vadd.f32 %v2382_v53, %v2150_v48  ;;  %v6460_v61 = vpop.f32.mrb[113].mxu1 }
 0x484   : > { %v5068_v61 = vld [vmem:[%s8871_s3 + $0x280] sm:$0xff] }
 0x486   : > { %v2387_v57 = vpop.f32.mrb[114].mxu1 }
 0x487   : > { %v2397_v62 = vadd.f32 %v2387_v57, %v2151_v23  ;;  %v6463_v63 = vpop.f32.mrb[115].mxu1  ;;  %v5069_v57 = vld [vmem:[%s8871_s3 + $0x288] sm:$0xff] }
 0x48e   : > { %v2603_v3 = vpop.f32.mrb[116].mxu1 }
 0x48f   : > { %v2637_v4 = vadd.f32 %v2603_v3, %v2391_v34  ;;  %v6482_v5 = vpop.f32.mrb[117].mxu1  ;;  %v6922_v3 = vpack.c.bf16 %v5069_v57, %v5068_v61 }
 0x492   : > { %v2608_v8 = vpop.f32.mrb[118].mxu1 }
 0x493   : > { %v2638_v9 = vadd.f32 %v2608_v8, %v2392_v59  ;;  %v6485_v10 = vpop.f32.mrb[119].mxu1  ;;  %v5070_v8 = vld [vmem:[%s8871_s3 + $0x290] sm:$0xff] }
 0x496   : > { %v2613_v12 = vpop.f32.mrb[120].mxu1 }
 0x497   : > { %v2639_v29 = vadd.f32 %v2613_v12, %v2393_v44  ;;  %v6488_v13 = vpop.f32.mrb[121].mxu1 }
 0x498   : > { %v5072_v13 = vld [vmem:[%s8871_s3 + $0x2a0] sm:$0xff] }
 0x49a   : > { %v2618_v14 = vpop.f32.mrb[122].mxu1 }
 0x49b   : > { %v2640_v15 = vadd.f32 %v2618_v14, %v2394_v46  ;;  %v6491_v17 = vpop.f32.mrb[123].mxu1  ;;  %v5073_v14 = vld [vmem:[%s8871_s3 + $0x2a8] sm:$0xff] }
 0x49e   : > { %v2623_v18 = vpop.f32.mrb[124].mxu1 }
 0x49f   : > { %v2641_v19 = vadd.f32 %v2623_v18, %v2395_v50  ;;  %v6494_v35 = vpop.f32.mrb[125].mxu1  ;;  %v6928_v18 = vpack.c.bf16 %v5073_v14, %v5072_v13 }
 0x4a2   : > { %v2628_v20 = vpop.f32.mrb[126].mxu1 }
 0x4a3   : > { %v2642_v22 = vadd.f32 %v2628_v20, %v2396_v56  ;;  %v6497_v39 = vpop.f32.mrb[127].mxu1  ;;  %v5074_v20 = vld [vmem:[%s8871_s3 + $0x2b0] sm:$0xff] }
 0x4a6   : > { %v2633_v24 = vpop.f32.mrb[128].mxu1 }
 0x4a7   : > { %v2643_v25 = vadd.f32 %v2633_v24, %v2397_v62  ;;  %v6500_v48 = vpop.f32.mrb[129].mxu1 }
 0x4ae   : > { %v2849_v28 = vpop.f32.mrb[130].mxu1 }
 0x4af   : > { %v8263_v32 = vadd.f32 %v2849_v28, %v2637_v4  ;;  %v6519_v23 = vpop.f32.mrb[131].mxu1 }
 0x4b2   : > { %v2854_v51 = vpop.f32.mrb[132].mxu1 }
 0x4b3   : > { %v8265_v33 = vadd.f32 %v2854_v51, %v2638_v9  ;;  %v6522_v34 = vpop.f32.mrb[133].mxu1  ;;  %v5071_v9 = vld [vmem:[%s8871_s3 + $0x298] sm:$0xff] }
 0x4b6   : > { %v2859_v37 = vpop.f32.mrb[134].mxu1 }
 0x4b7   : > { %v8267_v27 = vadd.f32 %v2859_v37, %v2639_v29  ;;  %v6525_v59 = vpop.f32.mrb[135].mxu1  ;;  %v6925_v29 = vpack.c.bf16 %v5071_v9, %v5070_v8 }
 0x4ba   : > { %v2864_v41 = vpop.f32.mrb[136].mxu1 }
 0x4bb   : > { %v8269_v30 = vadd.f32 %v2864_v41, %v2640_v15  ;;  %v6528_v44 = vpop.f32.mrb[137].mxu1 }
 0x4be   : > { %v2869_v2 = vpop.f32.mrb[138].mxu1 }
 0x4bf   : > { %v8271_v38 = vadd.f32 %v2869_v2, %v2641_v19  ;;  %v6531_v46 = vpop.f32.mrb[139].mxu1 }
 0x4c2   : > { %v2874_v49 = vpop.f32.mrb[140].mxu1 }
 0x4c3   : > { %v8273_v43 = vadd.f32 %v2874_v49, %v2642_v22  ;;  %v6534_v50 = vpop.f32.mrb[141].mxu1  ;;  %v5075_v22 = vld [vmem:[%s8871_s3 + $0x2b8] sm:$0xff] }
 0x4c6   : > { %v2879_v54 = vpop.f32.mrb[142].mxu1 }
 0x4c7   : > { %v8275_v53 = vadd.f32 %v2879_v54, %v2643_v25  ;;  %v6537_v56 = vpop.f32.mrb[143].mxu1  ;;  %v6931_v25 = vpack.c.bf16 %v5075_v22, %v5074_v20  ;;  %v7127_v22 = vld [vmem:[%s8870_s2 + $0x268] ss:$8 sps:$4 sm:$0xff]  }
 0x4ce   : > { %v5782_v62 = vpop.f32.mrb[144].mxu1 }
 0x4cf   : > { %v5783_v63 = vpop.f32.mrb[145].mxu1 }
 0x4d0   : > { %v5784_v4 = vadd.f32 %v5783_v63, %v5782_v62  ;;  %v5785_v5 = vpop.f32.mrb[146].mxu1 }
 0x4d1   : > { %v5786_v10 = vpop.f32.mrb[147].mxu1 }
 0x4d2   : > { %v5787_v12 = vadd.f32 %v5786_v10, %v5785_v5  ;;  %6555 = vmatmul.mubr.msk.f32.vlgmr.msra.gmra.mrb[46].mxu0 %vm925_vm3, %v5784_v4 }
 0x4d3   : > { %6923 = vmatpush3.bf16.msra.mxu0 %v6922_v3  ;;  %6557 = vmatprep.mubr.msk.f32.mxu0 %vm7191_vm2, %v7192_v45 }
 0x4d4   : > { %6924 = vmatprep.subr.bf16.mxu0 %v7190_v40 }
 0x4d6   : > { %v5788_v15 = vpop.f32.mrb[148].mxu1  ;;  %6558 = vmatmul.mubr.msk.f32.gmra.mrb[160].mxu0 %vm925_vm3, %v5787_v12 }
 0x4d7   : > { %6926 = vmatpush3.bf16.msra.mxu0 %v6925_v29  ;;  %v5789_v17 = vpop.f32.mrb[149].mxu1  ;;  %6560 = vmatprep.mubr.msk.f32.mxu0 %vm7191_vm2, %v7192_v45 }
 0x4d8   : > { %v5790_v19 = vadd.f32 %v5789_v17, %v5788_v15  ;;  %v5791_v35 = vpop.f32.mrb[150].mxu1  ;;  %6927 = vmatprep.subr.bf16.mxu0 %v7190_v40 }
 0x4d9   : > { %v5792_v39 = vpop.f32.mrb[151].mxu1 }
 0x4da   : > { %v5793_v24 = vadd.f32 %v5792_v39, %v5791_v35  ;;  %6561 = vmatmul.mubr.msk.f32.gmra.mrb[162].mxu0 %vm925_vm3, %v5790_v19  ;;  %v7130_v39 = vld [vmem:[%s8870_s2 + $0x27c] ss:$8 sps:$4 sm:$0xff]  }
 0x4db   : > { %6929 = vmatpush3.bf16.msra.mxu0 %v6928_v18  ;;  %6563 = vmatprep.mubr.msk.f32.mxu0 %vm7191_vm2, %v7192_v45  ;;  %v7129_v18 = vld [vmem:[%s8870_s2 + $0x26c] ss:$8 sps:$4 sm:$0xff]  }
 0x4dc   : > { %6930 = vmatprep.subr.bf16.mxu0 %v7190_v40 }
 0x4de   : > { %v5794_v48 = vpop.f32.mrb[152].mxu1  ;;  %6564 = vmatmul.mubr.msk.f32.gmra.mrb[164].mxu0 %vm925_vm3, %v5793_v24  ;;  %v7132_v24 = vld [vmem:[%s8870_s2 + $0x278] ss:$8 sps:$4 sm:$0xff]  }
 0x4df   : > { %6932 = vmatpush3.bf16.msra.mxu0 %v6931_v25  ;;  %v5795_v28 = vpop.f32.mrb[153].mxu1  ;;  %6566 = vmatprep.mubr.msk.f32.mxu0 %vm7191_vm2, %v7192_v45  ;;  %v7133_v25 = vld [vmem:[%s8870_s2 + $0x28c] ss:$8 sps:$4 sm:$0xff]  }
 0x4e0   : > { %v5796_v23 = vadd.f32 %v5795_v28, %v5794_v48  ;;  %5876 = vmatprep.subr.bf16.mxu0 %v7375_v31  ;;  %v5797_v51 = vpop.f32.mrb[154].mxu1  ;;  %v5089_v48 = vld [vmem:[%s8870_s2 + $0x298] sm:$0x11]  ;;  %v7135_v28 = vld [vmem:[%s8870_s2 + $0x288] ss:$8 sps:$4 sm:$0xff]  }
 0x4e1   : > { %v5798_v34 = vpop.f32.mrb[155].mxu1 }
 0x4e2   : > { %v5799_v37 = vadd.f32 %v5798_v34, %v5797_v51  ;;  %6567 = vmatmul.mubr.msk.f32.gmra.mrb[166].mxu0 %vm925_vm3, %v5796_v23  ;;  %v5097_v23 = vcombine.high %v5089_v48, %v5089_v48  ;;  %v5096_v51 = vcombine.low %v5089_v48, %v5089_v48  ;;  %v7140_v34 = vld [vmem:[%s8870_s2 + $0x2a4] ss:$8 sps:$4 sm:$0xff]  }
 0x4e3   : > { %6569 = vmatprep.mubr.msk.f32.mxu0 %vm7191_vm2, %v7192_v45 }
 0x4e6   : > { %v5800_v59 = vpop.f32.mrb[156].mxu1  ;;  %6570 = vmatmul.mubr.msk.f32.gmra.mrb[168].mxu0 %vm925_vm3, %v5799_v37  ;;  %v7138_v37 = vld [vmem:[%s8870_s2 + $0x2a0] ss:$8 sps:$4 sm:$0xff]  }
 0x4e7   : > { %v5801_v41 = vpop.f32.mrb[157].mxu1  ;;  %6572 = vmatprep.mubr.msk.f32.mxu0 %vm7191_vm2, %v7192_v45 }
 0x4e8   : > { %v5802_v44 = vadd.f32 %v5801_v41, %v5800_v59  ;;  %v5803_v2 = vpop.f32.mrb[158].mxu1  ;;  %v7141_v59 = vld [vmem:[%s8870_s2 + $0x2b4] ss:$8 sps:$4 sm:$0xff]   ;;  %v7143_v41 = vld [vmem:[%s8870_s2 + $0x2b0] ss:$8 sps:$4 sm:$0xff]  }
 0x4e9   : > { %v5804_v46 = vpop.f32.mrb[159].mxu1  ;;  %v5119_v2 = vld [vmem:[%s8870_s2 + $0x2d0] sm:$0x11] }
 0x4ea   : > { %6573 = vmatmul.mubr.msk.f32.gmra.mrb[170].mxu0 %vm925_vm3, %v5802_v44  ;;  %v7144_v44 = vld [vmem:[%s8870_s2 + $0x2c4] ss:$8 sps:$4 sm:$0xff]   ;;  %v7146_v46 = vld [vmem:[%s8870_s2 + $0x2c0] ss:$8 sps:$4 sm:$0xff]  }
 0x4eb   : > { %6591 = vmatprep.mubr.msk.f32.mxu0 %vm7191_vm2, %v7192_v45 }
 0x4ee   : > { %v5837_v49 = vpop.f32.mrb[160].mxu1 }
 0x4ef   : > { %v5838_v50 = vpop.f32.mrb[161].mxu1 }
 0x4f0   : > { %v5839_v54 = vadd.f32 %v5838_v50, %v5837_v49  ;;  %v5840_v56 = vpop.f32.mrb[162].mxu1  ;;  %v5127_v49 = vcombine.high %v5119_v2, %v5119_v2  ;;  %v5126_v50 = vcombine.low %v5119_v2, %v5119_v2 }
 0x4f1   : > { %v5841_v61 = vpop.f32.mrb[163].mxu1 }
 0x4f2   : > { %v5842_v57 = vadd.f32 %v5841_v61, %v5840_v56  ;;  %6592 = vmatmul.mubr.msk.f32.vlgmr.msra.gmra.mrb[172].mxu0 %vm925_vm3, %v5839_v54  ;;  %v5098_v54 = vld [vmem:[%s8871_s3 + $0x2c0] sm:$0xff]  ;;  %v5099_v56 = vld [vmem:[%s8871_s3 + $0x2c8] sm:$0xff] }
 0x4f3   : > { %5877 = vmatpush3.bf16.msra.mxu0 %v7359_v55  ;;  %6594 = vmatprep.mubr.msk.f32.mxu0 %vm7191_vm2, %v7192_v45  ;;  %v6934_v61 = vpack.c.bf16 %v5099_v56, %v5098_v54 }
 0x4f4   : > { %5878 = vmatprep.subr.bf16.mxu0 %v7380_v36 }
 0x4f5   : > { %6935 = vmatpush3.bf16.msra.mxu1 %v6934_v61 }
 0x4f6   : > { %v5843_v62 = vpop.f32.mrb[164].mxu1  ;;  %6595 = vmatmul.mubr.msk.f32.gmra.mrb[174].mxu0 %vm925_vm3, %v5842_v57  ;;  %6936 = vmatprep.subr.bf16.mxu1 %v7190_v40  ;;  %v5100_v57 = vld [vmem:[%s8871_s3 + $0x2d0] sm:$0xff] }
 0x4f7   : > { %5879 = vmatpush3.bf16.msra.mxu0 %v7361_v60  ;;  %v5844_v63 = vpop.f32.mrb[165].mxu1  ;;  %6597 = vmatprep.mubr.msk.f32.mxu0 %vm7191_vm2, %v7192_v45 }
 0x4f8   : > { %v5845_v3 = vadd.f32 %v5844_v63, %v5843_v62  ;;  %5880 = vmatprep.subr.bf16.mxu0 %v7384_v42  ;;  %v5846_v4 = vpop.f32.mrb[166].mxu1  ;;  %v5101_v62 = vld [vmem:[%s8871_s3 + $0x2d8] sm:$0xff] }
 0x4f9   : > { %v5847_v5 = vpop.f32.mrb[167].mxu1  ;;  %v6937_v63 = vpack.c.bf16 %v5101_v62, %v5100_v57 }
 0x4fa   : > { %v5848_v8 = vadd.f32 %v5847_v5, %v5846_v4  ;;  %6598 = vmatmul.mubr.msk.f32.gmra.mrb[176].mxu0 %vm925_vm3, %v5845_v3  ;;  %v5102_v3 = vld [vmem:[%s8871_s3 + $0x2e0] sm:$0xff]  ;;  %v5103_v4 = vld [vmem:[%s8871_s3 + $0x2e8] sm:$0xff] }
 0x4fb   : > { %5881 = vmatpush3.bf16.msra.mxu0 %v7363_v1  ;;  %6600 = vmatprep.mubr.msk.f32.mxu0 %vm7191_vm2, %v7192_v45  ;;  %v6940_v5 = vpack.c.bf16 %v5103_v4, %v5102_v3 }
 0x4fc   : > { %5882 = vmatprep.subr.bf16.mxu0 %v7388_v47  ;;  %6938 = vmatpush3.bf16.msra.mxu1 %v6937_v63 }
 0x4fd   : > { %6939 = vmatprep.subr.bf16.mxu1 %v7190_v40 }
 0x4fe   : > { %v5849_v9 = vpop.f32.mrb[168].mxu1  ;;  %6601 = vmatmul.mubr.msk.f32.gmra.mrb[178].mxu0 %vm925_vm3, %v5848_v8  ;;  %v5104_v8 = vld [vmem:[%s8871_s3 + $0x2f0] sm:$0xff] }
 0x4ff   : > { %5883 = vmatpush3.bf16.msra.mxu0 %v7365_v6  ;;  %v5850_v10 = vpop.f32.mrb[169].mxu1  ;;  %6603 = vmatprep.mubr.msk.f32.mxu0 %vm7191_vm2, %v7192_v45 }
 0x500   : > { %v5851_v12 = vadd.f32 %v5850_v10, %v5849_v9  ;;  %5884 = vmatprep.subr.bf16.mxu0 %v7392_v52  ;;  %v5852_v29 = vpop.f32.mrb[170].mxu1  ;;  %6941 = vmatpush3.bf16.msra.mxu1 %v6940_v5  ;;  %v5105_v9 = vld [vmem:[%s8871_s3 + $0x2f8] sm:$0xff]  ;;  %v5128_v5 = vld [vmem:[%s8871_s3 + $0x300] sm:$0xff] }
 0x501   : > { %v5853_v13 = vpop.f32.mrb[171].mxu1  ;;  %6942 = vmatprep.subr.bf16.mxu1 %v7190_v40  ;;  %v6943_v10 = vpack.c.bf16 %v5105_v9, %v5104_v8  ;;  %v5129_v8 = vld [vmem:[%s8871_s3 + $0x308] sm:$0xff] }
 0x502   : > { %v5854_v14 = vadd.f32 %v5853_v13, %v5852_v29  ;;  %6604 = vmatmul.mubr.msk.f32.gmra.mrb[180].mxu0 %vm925_vm3, %v5851_v12 }
 0x503   : > { %5885 = vmatpush3.bf16.msra.mxu0 %v7367_v11  ;;  %6606 = vmatprep.mubr.msk.f32.mxu0 %vm7191_vm2, %v7192_v45 }
 0x504   : > { %5886 = vmatprep.subr.bf16.mxu0 %v7396_v58  ;;  %6944 = vmatpush3.bf16.msra.mxu1 %v6943_v10 }
 0x505   : > { %6945 = vmatprep.subr.bf16.mxu1 %v7190_v40 }
 0x506   : > { %v5855_v15 = vpop.f32.mrb[172].mxu1  ;;  %6607 = vmatmul.mubr.msk.f32.gmra.mrb[182].mxu0 %vm925_vm3, %v5854_v14 }
 0x507   : > { %5887 = vmatpush3.bf16.msra.mxu0 %v7369_v16  ;;  %v5856_v17 = vpop.f32.mrb[173].mxu1  ;;  %6609 = vmatprep.mubr.msk.f32.mxu0 %vm7191_vm2, %v7192_v45 }
 0x508   : > { %v5857_v19 = vadd.f32 %v5856_v17, %v5855_v15  ;;  %5888 = vmatprep.subr.bf16.mxu0 %v7400_v0  ;;  %v5858_v35 = vpop.f32.mrb[174].mxu1 }
 0x509   : > { %v5859_v20 = vpop.f32.mrb[175].mxu1 }
 0x50a   : > { %6610 = vmatmul.mubr.msk.f32.gmra.mrb[184].mxu0 %vm925_vm3, %v5857_v19 }
 0x50b   : > { %5889 = vmatpush3.bf16.msra.mxu0 %v7371_v21  ;;  %3459 = vmatprep.mubr.bf16.mxu0 %v7129_v18 }
 0x50c   : > { %5890 = vmatprep.subr.bf16.mxu0 %v7404_v7 }
 0x50f   : > { %5891 = vmatpush3.bf16.msra.mxu0 %v7373_v26 }
 0x510   : > { %5931 = vmatprep.subr.bf16.mxu0 %v7375_v31 }
 0x512   : > { %3460 = vmatmul.mubr.bf16.vlgmr.msra.gmra.mrb[188].mxu0 %v7127_v22 }
 0x513   : > { %5932 = vmatpush3.bf16.msra.mxu0 %v7359_v55  ;;  %3467 = vmatprep.mubr.bf16.mxu0 %v7130_v39 }
 0x514   : > { %5933 = vmatprep.subr.bf16.mxu0 %v7380_v36 }
 0x517   : > { %5934 = vmatpush3.bf16.msra.mxu0 %v7361_v60 }
 0x518   : > { %5935 = vmatprep.subr.bf16.mxu0 %v7384_v42 }
 0x51a   : > { %3468 = vmatmul.mubr.bf16.gmra.mrb[192].mxu0 %v7132_v24 }
 0x51b   : > { %5936 = vmatpush3.bf16.msra.mxu0 %v7363_v1  ;;  %3475 = vmatprep.mubr.bf16.mxu0 %v7133_v25 }
 0x51c   : > { %5937 = vmatprep.subr.bf16.mxu0 %v7388_v47 }
 0x51f   : > { %5938 = vmatpush3.bf16.msra.mxu0 %v7365_v6 }
 0x520   : > { %5939 = vmatprep.subr.bf16.mxu0 %v7392_v52 }
 0x522   : > { %3476 = vmatmul.mubr.bf16.gmra.mrb[196].mxu0 %v7135_v28 }
 0x523   : > { %5940 = vmatpush3.bf16.msra.mxu0 %v7367_v11  ;;  %3483 = vmatprep.mubr.bf16.mxu0 %v5097_v23 }
 0x524   : > { %5941 = vmatprep.subr.bf16.mxu0 %v7396_v58 }
 0x527   : > { %5942 = vmatpush3.bf16.msra.mxu0 %v7369_v16 }
 0x528   : > { %5943 = vmatprep.subr.bf16.mxu0 %v7400_v0 }
 0x52a   : > { %3484 = vmatmul.mubr.bf16.gmra.mrb[200].mxu0 %v5096_v51 }
 0x52b   : > { %5944 = vmatpush3.bf16.msra.mxu0 %v7371_v21  ;;  %3705 = vmatprep.mubr.bf16.mxu0 %v7140_v34 }
 0x52c   : > { %5945 = vmatprep.subr.bf16.mxu0 %v7404_v7 }
 0x52f   : > { %5946 = vmatpush3.bf16.msra.mxu0 %v7373_v26 }
 0x530   : > { %6957 = vmatprep.subr.bf16.mxu0 %v7190_v40 }
 0x532   : > { %3706 = vmatmul.mubr.bf16.vlgmr.msra.gmra.mrb[204].mxu0 %v7138_v37 }
 0x533   : > { %3713 = vmatprep.mubr.bf16.mxu0 %v7141_v59 }
 0x53a   : > { %3714 = vmatmul.mubr.bf16.gmra.mrb[208].mxu0 %v7143_v41 }
 0x53b   : > { %3721 = vmatprep.mubr.bf16.mxu0 %v7144_v44 }
 0x542   : > { %3722 = vmatmul.mubr.bf16.gmra.mrb[212].mxu0 %v7146_v46 }
 0x543   : > { %3729 = vmatprep.mubr.bf16.mxu0 %v5127_v49 }
 0x54a   : > { %3730 = vmatmul.mubr.bf16.gmra.mrb[216].mxu0 %v5126_v50 }
 0x54b   : > { %6702 = vmatprep.mubr.msk.f32.mxu0 %vm7191_vm2, %v7192_v45 }
 0x5a5   : > { %v3095_v12 = vpop.f32.mrb[46].mxu0 }
 0x5a6   : > { %v3129_v29 = vadd.f32 %v3095_v12, %v8263_v32  ;;  %v6556_v13 = vpop.f32.mrb[47].mxu0  ;;  %v6946_v12 = vpack.c.bf16 %v5129_v8, %v5128_v5 }
 0x5a9   : > { %v3100_v14 = vpop.f32.mrb[160].mxu0 }
 0x5aa   : > { %v3130_v15 = vadd.f32 %v3100_v14, %v8265_v33  ;;  %v6559_v17 = vpop.f32.mrb[161].mxu0  ;;  %v5130_v14 = vld [vmem:[%s8871_s3 + $0x310] sm:$0xff] }
 0x5ad   : > { %v3105_v18 = vpop.f32.mrb[162].mxu0 }
 0x5ae   : > { %v3131_v19 = vadd.f32 %v3105_v18, %v8267_v27  ;;  %v6562_v35 = vpop.f32.mrb[163].mxu0 }
 0x5af   : > { %v5132_v35 = vld [vmem:[%s8871_s3 + $0x320] sm:$0xff] }
 0x5b1   : > { %v3110_v20 = vpop.f32.mrb[164].mxu0 }
 0x5b2   : > { %v3132_v22 = vadd.f32 %v3110_v20, %v8269_v30  ;;  %v6565_v39 = vpop.f32.mrb[165].mxu0  ;;  %v5133_v20 = vld [vmem:[%s8871_s3 + $0x328] sm:$0xff] }
 0x5b5   : > { %v3115_v24 = vpop.f32.mrb[166].mxu0 }
 0x5b6   : > { %v3133_v25 = vadd.f32 %v3115_v24, %v8271_v38  ;;  %v6568_v48 = vpop.f32.mrb[167].mxu0  ;;  %v6952_v24 = vpack.c.bf16 %v5133_v20, %v5132_v35 }
 0x5b9   : > { %v3120_v28 = vpop.f32.mrb[168].mxu0 }
 0x5ba   : > { %v3134_v32 = vadd.f32 %v3120_v28, %v8273_v43  ;;  %v6571_v23 = vpop.f32.mrb[169].mxu0  ;;  %v5134_v28 = vld [vmem:[%s8871_s3 + $0x330] sm:$0xff] }
 0x5bd   : > { %v3125_v51 = vpop.f32.mrb[170].mxu0 }
 0x5be   : > { %v3135_v33 = vadd.f32 %v3125_v51, %v8275_v53  ;;  %v6574_v34 = vpop.f32.mrb[171].mxu0 }
 0x5c5   : > { %v3341_v37 = vpop.f32.mrb[172].mxu0 }
 0x5c6   : > { %v8456_v59 = vadd.f32 %v3341_v37, %v3129_v29  ;;  %v6593_v27 = vpop.f32.mrb[173].mxu0 }
 0x5c9   : > { %v3346_v41 = vpop.f32.mrb[174].mxu0 }
 0x5ca   : > { %v8458_v44 = vadd.f32 %v3346_v41, %v3130_v15  ;;  %v6596_v30 = vpop.f32.mrb[175].mxu0  ;;  %v5131_v15 = vld [vmem:[%s8871_s3 + $0x318] sm:$0xff] }
 0x5cd   : > { %v3351_v2 = vpop.f32.mrb[176].mxu0 }
 0x5ce   : > { %v8460_v46 = vadd.f32 %v3351_v2, %v3131_v19  ;;  %v6599_v38 = vpop.f32.mrb[177].mxu0  ;;  %v6949_v19 = vpack.c.bf16 %v5131_v15, %v5130_v14 }
 0x5d1   : > { %v3356_v49 = vpop.f32.mrb[178].mxu0 }
 0x5d2   : > { %v8462_v50 = vadd.f32 %v3356_v49, %v3132_v22  ;;  %v6602_v43 = vpop.f32.mrb[179].mxu0 }
 0x5d5   : > { %v3361_v54 = vpop.f32.mrb[180].mxu0 }
 0x5d6   : > { %v8464_v56 = vadd.f32 %v3361_v54, %v3133_v25  ;;  %v6605_v53 = vpop.f32.mrb[181].mxu0 }
 0x5d9   : > { %v3366_v61 = vpop.f32.mrb[182].mxu0 }
 0x5da   : > { %v8466_v57 = vadd.f32 %v3366_v61, %v3134_v32  ;;  %v6608_v62 = vpop.f32.mrb[183].mxu0  ;;  %v5135_v32 = vld [vmem:[%s8871_s3 + $0x338] sm:$0xff] }
 0x5dd   : > { %v3371_v63 = vpop.f32.mrb[184].mxu0 }
 0x5de   : > { %v8468_v3 = vadd.f32 %v3371_v63, %v3135_v33  ;;  %v6611_v4 = vpop.f32.mrb[185].mxu0  ;;  %v6955_v33 = vpack.c.bf16 %v5135_v32, %v5134_v28  ;;  %v7149_v32 = vld [vmem:[%s8870_s2 + $0x2d8] ss:$8 sps:$4 sm:$0xff]  }
 0x5e5   : > { %v5892_v9 = vpop.f32.mrb[188].mxu0 }
 0x5e6   : > { %v5893_v10 = vpop.f32.mrb[189].mxu0 }
 0x5e7   : > { %v5894_v29 = vadd.f32 %v5893_v10, %v5892_v9  ;;  %v5895_v13 = vpop.f32.mrb[190].mxu0 }
 0x5e8   : > { %v5896_v17 = vpop.f32.mrb[191].mxu0 }
 0x5e9   : > { %v5897_v18 = vadd.f32 %v5896_v17, %v5895_v13  ;;  %6629 = vmatmul.mubr.msk.f32.vlgmr.msra.gmra.mrb[176].mxu1 %vm925_vm3, %v5894_v29 }
 0x5ea   : > { %6947 = vmatpush3.bf16.msra.mxu1 %v6946_v12  ;;  %6631 = vmatprep.mubr.msk.f32.mxu1 %vm7191_vm2, %v7192_v45 }
 0x5eb   : > { %6948 = vmatprep.subr.bf16.mxu1 %v7190_v40 }
 0x5ed   : > { %v5898_v22 = vpop.f32.mrb[192].mxu0  ;;  %6632 = vmatmul.mubr.msk.f32.gmra.mrb[178].mxu1 %vm925_vm3, %v5897_v18 }
 0x5ee   : > { %6950 = vmatpush3.bf16.msra.mxu1 %v6949_v19  ;;  %v5899_v39 = vpop.f32.mrb[193].mxu0  ;;  %6634 = vmatprep.mubr.msk.f32.mxu1 %vm7191_vm2, %v7192_v45 }
 0x5ef   : > { %v5900_v25 = vadd.f32 %v5899_v39, %v5898_v22  ;;  %v5901_v48 = vpop.f32.mrb[194].mxu0  ;;  %6951 = vmatprep.subr.bf16.mxu1 %v7190_v40 }
 0x5f0   : > { %v5902_v23 = vpop.f32.mrb[195].mxu0 }
 0x5f1   : > { %v5903_v51 = vadd.f32 %v5902_v23, %v5901_v48  ;;  %6635 = vmatmul.mubr.msk.f32.gmra.mrb[180].mxu1 %vm925_vm3, %v5900_v25  ;;  %v7152_v23 = vld [vmem:[%s8870_s2 + $0x2ec] ss:$8 sps:$4 sm:$0xff]  }
 0x5f2   : > { %6953 = vmatpush3.bf16.msra.mxu1 %v6952_v24  ;;  %6637 = vmatprep.mubr.msk.f32.mxu1 %vm7191_vm2, %v7192_v45  ;;  %v7151_v24 = vld [vmem:[%s8870_s2 + $0x2dc] ss:$8 sps:$4 sm:$0xff]  }
 0x5f3   : > { %6954 = vmatprep.subr.bf16.mxu1 %v7190_v40 }
 0x5f5   : > { %v5904_v34 = vpop.f32.mrb[196].mxu0  ;;  %6638 = vmatmul.mubr.msk.f32.gmra.mrb[182].mxu1 %vm925_vm3, %v5903_v51  ;;  %v7154_v51 = vld [vmem:[%s8870_s2 + $0x2e8] ss:$8 sps:$4 sm:$0xff]  }
 0x5f6   : > { %6956 = vmatpush3.bf16.msra.mxu1 %v6955_v33  ;;  %v5905_v37 = vpop.f32.mrb[197].mxu0  ;;  %6640 = vmatprep.mubr.msk.f32.mxu1 %vm7191_vm2, %v7192_v45  ;;  %v7155_v33 = vld [vmem:[%s8870_s2 + $0x2fc] ss:$8 sps:$4 sm:$0xff]  }
 0x5f7   : > { %v5906_v27 = vadd.f32 %v5905_v37, %v5904_v34  ;;  %5986 = vmatprep.subr.bf16.mxu1 %v7375_v31  ;;  %v5907_v41 = vpop.f32.mrb[198].mxu0  ;;  %v5149_v34 = vld [vmem:[%s8870_s2 + $0x308] sm:$0x11]  ;;  %v7157_v37 = vld [vmem:[%s8870_s2 + $0x2f8] ss:$8 sps:$4 sm:$0xff]  }
 0x5f8   : > { %v5908_v30 = vpop.f32.mrb[199].mxu0 }
 0x5f9   : > { %v5909_v2 = vadd.f32 %v5908_v30, %v5907_v41  ;;  %6641 = vmatmul.mubr.msk.f32.gmra.mrb[184].mxu1 %vm925_vm3, %v5906_v27  ;;  %v5157_v27 = vcombine.high %v5149_v34, %v5149_v34  ;;  %v5156_v41 = vcombine.low %v5149_v34, %v5149_v34  ;;  %v7162_v30 = vld [vmem:[%s8870_s2 + $0x314] ss:$8 sps:$4 sm:$0xff]  }
 0x5fa   : > { %6643 = vmatprep.mubr.msk.f32.mxu1 %vm7191_vm2, %v7192_v45 }
 0x5fd   : > { %v5910_v38 = vpop.f32.mrb[200].mxu0  ;;  %6644 = vmatmul.mubr.msk.f32.gmra.mrb[186].mxu1 %vm925_vm3, %v5909_v2  ;;  %v7160_v2 = vld [vmem:[%s8870_s2 + $0x310] ss:$8 sps:$4 sm:$0xff]  }
 0x5fe   : > { %v5911_v49 = vpop.f32.mrb[201].mxu0  ;;  %6646 = vmatprep.mubr.msk.f32.mxu1 %vm7191_vm2, %v7192_v45 }
 0x5ff   : > { %v5912_v43 = vadd.f32 %v5911_v49, %v5910_v38  ;;  %v5913_v54 = vpop.f32.mrb[202].mxu0  ;;  %v7163_v38 = vld [vmem:[%s8870_s2 + $0x324] ss:$8 sps:$4 sm:$0xff]   ;;  %v7165_v49 = vld [vmem:[%s8870_s2 + $0x320] ss:$8 sps:$4 sm:$0xff]  }
 0x600   : > { %v5914_v53 = vpop.f32.mrb[203].mxu0  ;;  %v5179_v54 = vld [vmem:[%s8870_s2 + $0x340] sm:$0x11] }
 0x601   : > { %6647 = vmatmul.mubr.msk.f32.gmra.mrb[188].mxu1 %vm925_vm3, %v5912_v43  ;;  %v7166_v43 = vld [vmem:[%s8870_s2 + $0x334] ss:$8 sps:$4 sm:$0xff]   ;;  %v7168_v53 = vld [vmem:[%s8870_s2 + $0x330] ss:$8 sps:$4 sm:$0xff]  }
 0x602   : > { %6665 = vmatprep.mubr.msk.f32.mxu1 %vm7191_vm2, %v7192_v45 }
 0x605   : > { %v5947_v61 = vpop.f32.mrb[204].mxu0 }
 0x606   : > { %v5948_v62 = vpop.f32.mrb[205].mxu0 }
 0x607   : > { %v5949_v63 = vadd.f32 %v5948_v62, %v5947_v61  ;;  %v5950_v4 = vpop.f32.mrb[206].mxu0  ;;  %v5187_v61 = vcombine.high %v5179_v54, %v5179_v54  ;;  %v5186_v62 = vcombine.low %v5179_v54, %v5179_v54 }
 0x608   : > { %v5951_v5 = vpop.f32.mrb[207].mxu0 }
 0x609   : > { %v5952_v8 = vadd.f32 %v5951_v5, %v5950_v4  ;;  %6666 = vmatmul.mubr.msk.f32.vlgmr.msra.gmra.mrb[190].mxu1 %vm925_vm3, %v5949_v63  ;;  %v5158_v63 = vld [vmem:[%s8871_s3 + $0x340] sm:$0xff]  ;;  %v5159_v4 = vld [vmem:[%s8871_s3 + $0x348] sm:$0xff] }
 0x60a   : > { %5987 = vmatpush3.bf16.msra.mxu1 %v7359_v55  ;;  %6668 = vmatprep.mubr.msk.f32.mxu1 %vm7191_vm2, %v7192_v45  ;;  %v6958_v5 = vpack.c.bf16 %v5159_v4, %v5158_v63 }
 0x60b   : > { %5988 = vmatprep.subr.bf16.mxu1 %v7380_v36 }
 0x60c   : > { %6959 = vmatpush3.bf16.msra.mxu0 %v6958_v5 }
 0x60d   : > { %v5953_v9 = vpop.f32.mrb[208].mxu0  ;;  %6669 = vmatmul.mubr.msk.f32.gmra.mrb[192].mxu1 %vm925_vm3, %v5952_v8  ;;  %6960 = vmatprep.subr.bf16.mxu0 %v7190_v40  ;;  %v5160_v8 = vld [vmem:[%s8871_s3 + $0x350] sm:$0xff] }
 0x60e   : > { %5989 = vmatpush3.bf16.msra.mxu1 %v7361_v60  ;;  %v5954_v10 = vpop.f32.mrb[209].mxu0  ;;  %6671 = vmatprep.mubr.msk.f32.mxu1 %vm7191_vm2, %v7192_v45 }
 0x60f   : > { %v5955_v12 = vadd.f32 %v5954_v10, %v5953_v9  ;;  %5990 = vmatprep.subr.bf16.mxu1 %v7384_v42  ;;  %v5956_v29 = vpop.f32.mrb[210].mxu0  ;;  %v5161_v9 = vld [vmem:[%s8871_s3 + $0x358] sm:$0xff] }
 0x610   : > { %v5957_v13 = vpop.f32.mrb[211].mxu0  ;;  %v6961_v10 = vpack.c.bf16 %v5161_v9, %v5160_v8 }
 0x611   : > { %v5958_v14 = vadd.f32 %v5957_v13, %v5956_v29  ;;  %6672 = vmatmul.mubr.msk.f32.gmra.mrb[194].mxu1 %vm925_vm3, %v5955_v12  ;;  %v5162_v12 = vld [vmem:[%s8871_s3 + $0x360] sm:$0xff]  ;;  %v5163_v29 = vld [vmem:[%s8871_s3 + $0x368] sm:$0xff] }
 0x612   : > { %5991 = vmatpush3.bf16.msra.mxu1 %v7363_v1  ;;  %6674 = vmatprep.mubr.msk.f32.mxu1 %vm7191_vm2, %v7192_v45  ;;  %v6964_v13 = vpack.c.bf16 %v5163_v29, %v5162_v12 }
 0x613   : > { %5992 = vmatprep.subr.bf16.mxu1 %v7388_v47  ;;  %6962 = vmatpush3.bf16.msra.mxu0 %v6961_v10 }
 0x614   : > { %6963 = vmatprep.subr.bf16.mxu0 %v7190_v40 }
 0x615   : > { %v5959_v15 = vpop.f32.mrb[212].mxu0  ;;  %6675 = vmatmul.mubr.msk.f32.gmra.mrb[196].mxu1 %vm925_vm3, %v5958_v14  ;;  %v5164_v14 = vld [vmem:[%s8871_s3 + $0x370] sm:$0xff] }
 0x616   : > { %5993 = vmatpush3.bf16.msra.mxu1 %v7365_v6  ;;  %v5960_v17 = vpop.f32.mrb[213].mxu0  ;;  %6677 = vmatprep.mubr.msk.f32.mxu1 %vm7191_vm2, %v7192_v45 }
 0x617   : > { %v5961_v18 = vadd.f32 %v5960_v17, %v5959_v15  ;;  %5994 = vmatprep.subr.bf16.mxu1 %v7392_v52  ;;  %v5962_v19 = vpop.f32.mrb[214].mxu0  ;;  %6965 = vmatpush3.bf16.msra.mxu0 %v6964_v13  ;;  %v5165_v15 = vld [vmem:[%s8871_s3 + $0x378] sm:$0xff]  ;;  %v5188_v13 = vld [vmem:[%s8871_s3 + $0x380] sm:$0xff] }
 0x618   : > { %v5963_v35 = vpop.f32.mrb[215].mxu0  ;;  %6966 = vmatprep.subr.bf16.mxu0 %v7190_v40  ;;  %v6967_v17 = vpack.c.bf16 %v5165_v15, %v5164_v14  ;;  %v5189_v14 = vld [vmem:[%s8871_s3 + $0x388] sm:$0xff] }
 0x619   : > { %v5964_v20 = vadd.f32 %v5963_v35, %v5962_v19  ;;  %6678 = vmatmul.mubr.msk.f32.gmra.mrb[198].mxu1 %vm925_vm3, %v5961_v18 }
 0x61a   : > { %5995 = vmatpush3.bf16.msra.mxu1 %v7367_v11  ;;  %6680 = vmatprep.mubr.msk.f32.mxu1 %vm7191_vm2, %v7192_v45 }
 0x61b   : > { %5996 = vmatprep.subr.bf16.mxu1 %v7396_v58  ;;  %6968 = vmatpush3.bf16.msra.mxu0 %v6967_v17 }
 0x61c   : > { %6969 = vmatprep.subr.bf16.mxu0 %v7190_v40 }
 0x61d   : > { %v5965_v22 = vpop.f32.mrb[216].mxu0  ;;  %6681 = vmatmul.mubr.msk.f32.gmra.mrb[200].mxu1 %vm925_vm3, %v5964_v20 }
 0x61e   : > { %5997 = vmatpush3.bf16.msra.mxu1 %v7369_v16  ;;  %v5966_v39 = vpop.f32.mrb[217].mxu0  ;;  %6683 = vmatprep.mubr.msk.f32.mxu1 %vm7191_vm2, %v7192_v45 }
 0x61f   : > { %v5967_v25 = vadd.f32 %v5966_v39, %v5965_v22  ;;  %5998 = vmatprep.subr.bf16.mxu1 %v7400_v0  ;;  %v5968_v48 = vpop.f32.mrb[218].mxu0 }
 0x620   : > { %v5969_v28 = vpop.f32.mrb[219].mxu0 }
 0x621   : > { %6684 = vmatmul.mubr.msk.f32.gmra.mrb[202].mxu1 %vm925_vm3, %v5967_v25 }
 0x622   : > { %5999 = vmatpush3.bf16.msra.mxu1 %v7371_v21  ;;  %3951 = vmatprep.mubr.bf16.mxu1 %v7151_v24 }
 0x623   : > { %6000 = vmatprep.subr.bf16.mxu1 %v7404_v7 }
 0x626   : > { %6001 = vmatpush3.bf16.msra.mxu1 %v7373_v26 }
 0x627   : > { %6041 = vmatprep.subr.bf16.mxu1 %v7375_v31 }
 0x629   : > { %3952 = vmatmul.mubr.bf16.vlgmr.msra.gmra.mrb[204].mxu1 %v7149_v32 }
 0x62a   : > { %6042 = vmatpush3.bf16.msra.mxu1 %v7359_v55  ;;  %3959 = vmatprep.mubr.bf16.mxu1 %v7152_v23 }
 0x62b   : > { %6043 = vmatprep.subr.bf16.mxu1 %v7380_v36 }
 0x62e   : > { %6044 = vmatpush3.bf16.msra.mxu1 %v7361_v60 }
 0x62f   : > { %6045 = vmatprep.subr.bf16.mxu1 %v7384_v42 }
 0x631   : > { %3960 = vmatmul.mubr.bf16.gmra.mrb[208].mxu1 %v7154_v51 }
 0x632   : > { %6046 = vmatpush3.bf16.msra.mxu1 %v7363_v1  ;;  %3967 = vmatprep.mubr.bf16.mxu1 %v7155_v33 }
 0x633   : > { %6047 = vmatprep.subr.bf16.mxu1 %v7388_v47 }
 0x636   : > { %6048 = vmatpush3.bf16.msra.mxu1 %v7365_v6 }
 0x637   : > { %6049 = vmatprep.subr.bf16.mxu1 %v7392_v52 }
 0x639   : > { %3968 = vmatmul.mubr.bf16.gmra.mrb[212].mxu1 %v7157_v37 }
 0x63a   : > { %6050 = vmatpush3.bf16.msra.mxu1 %v7367_v11  ;;  %3975 = vmatprep.mubr.bf16.mxu1 %v5157_v27 }
 0x63b   : > { %6051 = vmatprep.subr.bf16.mxu1 %v7396_v58 }
 0x63e   : > { %6052 = vmatpush3.bf16.msra.mxu1 %v7369_v16 }
 0x63f   : > { %6053 = vmatprep.subr.bf16.mxu1 %v7400_v0 }
 0x641   : > { %3976 = vmatmul.mubr.bf16.gmra.mrb[216].mxu1 %v5156_v41 }
 0x642   : > { %6054 = vmatpush3.bf16.msra.mxu1 %v7371_v21  ;;  %4197 = vmatprep.mubr.bf16.mxu1 %v7162_v30 }
 0x643   : > { %6055 = vmatprep.subr.bf16.mxu1 %v7404_v7 }
 0x646   : > { %6056 = vmatpush3.bf16.msra.mxu1 %v7373_v26 }
 0x647   : > { %6981 = vmatprep.subr.bf16.mxu1 %v7190_v40 }
 0x649   : > { %4198 = vmatmul.mubr.bf16.vlgmr.msra.gmra.mrb[220].mxu1 %v7160_v2 }
 0x64a   : > { %4205 = vmatprep.mubr.bf16.mxu1 %v7163_v38 }
 0x651   : > { %4206 = vmatmul.mubr.bf16.gmra.mrb[224].mxu1 %v7165_v49 }
 0x652   : > { %4213 = vmatprep.mubr.bf16.mxu1 %v7166_v43 }
 0x659   : > { %4214 = vmatmul.mubr.bf16.gmra.mrb[228].mxu1 %v7168_v53 }
 0x65a   : > { %4221 = vmatprep.mubr.bf16.mxu1 %v5187_v61 }
 0x661   : > { %4222 = vmatmul.mubr.bf16.gmra.mrb[232].mxu1 %v5186_v62 }
 0x662   : > { %6776 = vmatprep.mubr.msk.f32.mxu1 %vm7191_vm2, %v7192_v45 }
 0x6bc   : > { %v3587_v18 = vpop.f32.mrb[176].mxu1 }
 0x6bd   : > { %v3621_v19 = vadd.f32 %v3587_v18, %v8456_v59  ;;  %v6630_v35 = vpop.f32.mrb[177].mxu1  ;;  %v6970_v18 = vpack.c.bf16 %v5189_v14, %v5188_v13 }
 0x6c0   : > { %v3592_v20 = vpop.f32.mrb[178].mxu1 }
 0x6c1   : > { %v3622_v22 = vadd.f32 %v3592_v20, %v8458_v44  ;;  %v6633_v39 = vpop.f32.mrb[179].mxu1  ;;  %v5190_v20 = vld [vmem:[%s8871_s3 + $0x390] sm:$0xff] }
 0x6c4   : > { %v3597_v24 = vpop.f32.mrb[180].mxu1 }
 0x6c5   : > { %v3623_v25 = vadd.f32 %v3597_v24, %v8460_v46  ;;  %v6636_v48 = vpop.f32.mrb[181].mxu1 }
 0x6c6   : > { %v5192_v48 = vld [vmem:[%s8871_s3 + $0x3a0] sm:$0xff] }
 0x6c8   : > { %v3602_v28 = vpop.f32.mrb[182].mxu1 }
 0x6c9   : > { %v3624_v32 = vadd.f32 %v3602_v28, %v8462_v50  ;;  %v6639_v23 = vpop.f32.mrb[183].mxu1  ;;  %v5193_v28 = vld [vmem:[%s8871_s3 + $0x3a8] sm:$0xff] }
 0x6cc   : > { %v3607_v51 = vpop.f32.mrb[184].mxu1 }
 0x6cd   : > { %v3625_v33 = vadd.f32 %v3607_v51, %v8464_v56  ;;  %v6642_v34 = vpop.f32.mrb[185].mxu1  ;;  %v6976_v51 = vpack.c.bf16 %v5193_v28, %v5192_v48  ;;  %v5218_v48 = vld [vmem:[%s8871_s3 + $0x3c0] sm:$0xff]  ;;  %v5219_v28 = vld [vmem:[%s8871_s3 + $0x3c8] sm:$0xff] }
 0x6d0   : > { %v3612_v37 = vpop.f32.mrb[186].mxu1 }
 0x6d1   : > { %v3626_v59 = vadd.f32 %v3612_v37, %v8466_v57  ;;  %v6645_v27 = vpop.f32.mrb[187].mxu1  ;;  %v5194_v37 = vld [vmem:[%s8871_s3 + $0x3b0] sm:$0xff] }
 0x6d4   : > { %v3617_v41 = vpop.f32.mrb[188].mxu1 }
 0x6d5   : > { %v3627_v44 = vadd.f32 %v3617_v41, %v8468_v3  ;;  %v6648_v30 = vpop.f32.mrb[189].mxu1 }
 0x6dc   : > { %v3833_v2 = vpop.f32.mrb[190].mxu1 }
 0x6dd   : > { %v8649_v38 = vadd.f32 %v3833_v2, %v3621_v19  ;;  %v6667_v46 = vpop.f32.mrb[191].mxu1 }
 0x6e0   : > { %v3838_v49 = vpop.f32.mrb[192].mxu1 }
 0x6e1   : > { %v8651_v43 = vadd.f32 %v3838_v49, %v3622_v22  ;;  %v6670_v50 = vpop.f32.mrb[193].mxu1  ;;  %v5191_v22 = vld [vmem:[%s8871_s3 + $0x398] sm:$0xff] }
 0x6e4   : > { %v3843_v54 = vpop.f32.mrb[194].mxu1 }
 0x6e5   : > { %v8653_v53 = vadd.f32 %v3843_v54, %v3623_v25  ;;  %v6673_v56 = vpop.f32.mrb[195].mxu1  ;;  %v6973_v25 = vpack.c.bf16 %v5191_v22, %v5190_v20 }
 0x6e8   : > { %v3848_v61 = vpop.f32.mrb[196].mxu1 }
 0x6e9   : > { %v8655_v62 = vadd.f32 %v3848_v61, %v3624_v32  ;;  %v6676_v57 = vpop.f32.mrb[197].mxu1 }
 0x6ec   : > { %v3853_v63 = vpop.f32.mrb[198].mxu1 }
 0x6ed   : > { %v8657_v4 = vadd.f32 %v3853_v63, %v3625_v33  ;;  %v6679_v3 = vpop.f32.mrb[199].mxu1 }
 0x6f0   : > { %v3858_v5 = vpop.f32.mrb[200].mxu1 }
 0x6f1   : > { %v8659_v8 = vadd.f32 %v3858_v5, %v3626_v59  ;;  %v6682_v9 = vpop.f32.mrb[201].mxu1  ;;  %v5195_v59 = vld [vmem:[%s8871_s3 + $0x3b8] sm:$0xff] }
 0x6f4   : > { %v3863_v10 = vpop.f32.mrb[202].mxu1 }
 0x6f5   : > { %v8661_v12 = vadd.f32 %v3863_v10, %v3627_v44  ;;  %v6685_v29 = vpop.f32.mrb[203].mxu1  ;;  %v6979_v44 = vpack.c.bf16 %v5195_v59, %v5194_v37  ;;  %v5223_v37 = vld [vmem:[%s8871_s3 + $0x3e8] sm:$0xff] }
 0x6fc   : > { %v6002_v15 = vpop.f32.mrb[204].mxu1 }
 0x6fd   : > { %v6003_v17 = vpop.f32.mrb[205].mxu1 }
 0x6fe   : > { %v6004_v19 = vadd.f32 %v6003_v17, %v6002_v15  ;;  %v6005_v35 = vpop.f32.mrb[206].mxu1 }
 0x6ff   : > { %v6006_v39 = vpop.f32.mrb[207].mxu1 }
 0x700   : > { %v6007_v24 = vadd.f32 %v6006_v39, %v6005_v35  ;;  %6703 = vmatmul.mubr.msk.f32.vlgmr.msra.gmra.mrb[186].mxu0 %vm925_vm3, %v6004_v19 }
 0x701   : > { %6971 = vmatpush3.bf16.msra.mxu0 %v6970_v18  ;;  %6705 = vmatprep.mubr.msk.f32.mxu0 %vm7191_vm2, %v7192_v45 }
 0x702   : > { %6972 = vmatprep.subr.bf16.mxu0 %v7190_v40 }
 0x704   : > { %v6008_v32 = vpop.f32.mrb[208].mxu1  ;;  %6706 = vmatmul.mubr.msk.f32.gmra.mrb[220].mxu0 %vm925_vm3, %v6007_v24 }
 0x705   : > { %6974 = vmatpush3.bf16.msra.mxu0 %v6973_v25  ;;  %v6009_v23 = vpop.f32.mrb[209].mxu1  ;;  %6708 = vmatprep.mubr.msk.f32.mxu0 %vm7191_vm2, %v7192_v45 }
 0x706   : > { %v6010_v33 = vadd.f32 %v6009_v23, %v6008_v32  ;;  %v6011_v34 = vpop.f32.mrb[210].mxu1  ;;  %6975 = vmatprep.subr.bf16.mxu0 %v7190_v40  ;;  %v6982_v32 = vpack.c.bf16 %v5219_v28, %v5218_v48  ;;  %v5220_v23 = vld [vmem:[%s8871_s3 + $0x3d0] sm:$0xff] }
 0x707   : > { %v6012_v27 = vpop.f32.mrb[211].mxu1 }
 0x708   : > { %v6013_v41 = vadd.f32 %v6012_v27, %v6011_v34  ;;  %6709 = vmatmul.mubr.msk.f32.gmra.mrb[222].mxu0 %vm925_vm3, %v6010_v33  ;;  %6983 = vmatpush3.bf16.msra.mxu1 %v6982_v32  ;;  %v5222_v34 = vld [vmem:[%s8871_s3 + $0x3e0] sm:$0xff]  ;;  %v5224_v27 = vld [vmem:[%s8871_s3 + $0x3f0] sm:$0xff] }
 0x709   : > { %6977 = vmatpush3.bf16.msra.mxu0 %v6976_v51  ;;  %6711 = vmatprep.mubr.msk.f32.mxu0 %vm7191_vm2, %v7192_v45  ;;  %v5221_v51 = vld [vmem:[%s8871_s3 + $0x3d8] sm:$0xff]  ;;  %v6988_v59 = vpack.c.bf16 %v5223_v37, %v5222_v34 }
 0x70a   : > { %6978 = vmatprep.subr.bf16.mxu0 %v7190_v40  ;;  %6984 = vmatprep.subr.bf16.mxu1 %v7190_v40  ;;  %v6985_v33 = vpack.c.bf16 %v5221_v51, %v5220_v23 }
 0x70c   : > { %v6014_v30 = vpop.f32.mrb[212].mxu1  ;;  %6712 = vmatmul.mubr.msk.f32.gmra.mrb[224].mxu0 %vm925_vm3, %v6013_v41  ;;  %6986 = vmatpush3.bf16.msra.mxu1 %v6985_v33  ;;  %v5225_v41 = vld [vmem:[%s8871_s3 + $0x3f8] sm:$0xff] }
 0x70d   : > { %6980 = vmatpush3.bf16.msra.mxu0 %v6979_v44  ;;  %v6015_v2 = vpop.f32.mrb[213].mxu1  ;;  %6714 = vmatprep.mubr.msk.f32.mxu0 %vm7191_vm2, %v7192_v45  ;;  %v6991_v44 = vpack.c.bf16 %v5225_v41, %v5224_v27 }
 0x70e   : > { %v6016_v46 = vadd.f32 %v6015_v2, %v6014_v30  ;;  %6096 = vmatprep.subr.bf16.mxu0 %v7375_v31  ;;  %v6017_v49 = vpop.f32.mrb[214].mxu1  ;;  %6987 = vmatprep.subr.bf16.mxu1 %v7190_v40 }
 0x70f   : > { %v6018_v50 = vpop.f32.mrb[215].mxu1 }
 0x710   : > { %v6019_v54 = vadd.f32 %v6018_v50, %v6017_v49  ;;  %6715 = vmatmul.mubr.msk.f32.gmra.mrb[226].mxu0 %vm925_vm3, %v6016_v46  ;;  %6989 = vmatpush3.bf16.msra.mxu1 %v6988_v59 }
 0x711   : > { %6717 = vmatprep.mubr.msk.f32.mxu0 %vm7191_vm2, %v7192_v45  ;;  %6990 = vmatprep.subr.bf16.mxu1 %v7190_v40 }
 0x714   : > { %v6020_v56 = vpop.f32.mrb[216].mxu1  ;;  %6718 = vmatmul.mubr.msk.f32.gmra.mrb[228].mxu0 %vm925_vm3, %v6019_v54  ;;  %6992 = vmatpush3.bf16.msra.mxu1 %v6991_v44 }
 0x715   : > { %v6021_v61 = vpop.f32.mrb[217].mxu1  ;;  %6720 = vmatprep.mubr.msk.f32.mxu0 %vm7191_vm2, %v7192_v45 }
 0x716   : > { %v6022_v57 = vadd.f32 %v6021_v61, %v6020_v56  ;;  %v6023_v63 = vpop.f32.mrb[218].mxu1 }
 0x717   : > { %v6024_v3 = vpop.f32.mrb[219].mxu1 }
 0x718   : > { %6721 = vmatmul.mubr.msk.f32.gmra.mrb[230].mxu0 %vm925_vm3, %v6022_v57 }
 0x719   : > { %6739 = vmatprep.mubr.msk.f32.mxu0 %vm7191_vm2, %v7192_v45 }
 0x71c   : > { %v6057_v31 = vpop.f32.mrb[220].mxu1 }
 0x71d   : > { %v6058_v5 = vpop.f32.mrb[221].mxu1 }
 0x71e   : > { %v6059_v9 = vadd.f32 %v6058_v5, %v6057_v31  ;;  %v6060_v10 = vpop.f32.mrb[222].mxu1 }
 0x71f   : > { %v6061_v29 = vpop.f32.mrb[223].mxu1 }
 0x720   : > { %v6062_v13 = vadd.f32 %v6061_v29, %v6060_v10  ;;  %6740 = vmatmul.mubr.msk.f32.vlgmr.msra.gmra.mrb[232].mxu0 %vm925_vm3, %v6059_v9 }
 0x721   : > { %6097 = vmatpush3.bf16.msra.mxu0 %v7359_v55  ;;  %6742 = vmatprep.mubr.msk.f32.mxu0 %vm7191_vm2, %v7192_v45 }
 0x722   : > { %6098 = vmatprep.subr.bf16.mxu0 %v7380_v36 }
 0x724   : > { %v6063_v14 = vpop.f32.mrb[224].mxu1  ;;  %6743 = vmatmul.mubr.msk.f32.gmra.mrb[234].mxu0 %vm925_vm3, %v6062_v13 }
 0x725   : > { %6099 = vmatpush3.bf16.msra.mxu0 %v7361_v60  ;;  %v6064_v15 = vpop.f32.mrb[225].mxu1  ;;  %6745 = vmatprep.mubr.msk.f32.mxu0 %vm7191_vm2, %v7192_v45 }
 0x726   : > { %v6065_v17 = vadd.f32 %v6064_v15, %v6063_v14  ;;  %6100 = vmatprep.subr.bf16.mxu0 %v7384_v42  ;;  %v6066_v18 = vpop.f32.mrb[226].mxu1 }
 0x727   : > { %v6067_v19 = vpop.f32.mrb[227].mxu1 }
 0x728   : > { %v6068_v55 = vadd.f32 %v6067_v19, %v6066_v18  ;;  %6746 = vmatmul.mubr.msk.f32.gmra.mrb[236].mxu0 %vm925_vm3, %v6065_v17 }
 0x729   : > { %6101 = vmatpush3.bf16.msra.mxu0 %v7363_v1  ;;  %6748 = vmatprep.mubr.msk.f32.mxu0 %vm7191_vm2, %v7192_v45 }
 0x72a   : > { %6102 = vmatprep.subr.bf16.mxu0 %v7388_v47 }
 0x72c   : > { %v6069_v60 = vpop.f32.mrb[228].mxu1  ;;  %6749 = vmatmul.mubr.msk.f32.gmra.mrb[238].mxu0 %vm925_vm3, %v6068_v55 }
 0x72d   : > { %6103 = vmatpush3.bf16.msra.mxu0 %v7365_v6  ;;  %v6070_v36 = vpop.f32.mrb[229].mxu1  ;;  %6751 = vmatprep.mubr.msk.f32.mxu0 %vm7191_vm2, %v7192_v45 }
 0x72e   : > { %v6071_v42 = vadd.f32 %v6070_v36, %v6069_v60  ;;  %6104 = vmatprep.subr.bf16.mxu0 %v7392_v52  ;;  %v6072_v35 = vpop.f32.mrb[230].mxu1  ;;  %v7173_v52 = vld [vmem:[%s8870_s2 + $0x34c] ss:$8 sps:$4 sm:$0xff]  }
 0x72f   : > { %v6073_v20 = vpop.f32.mrb[231].mxu1 }
 0x730   : > { %v6074_v1 = vadd.f32 %v6073_v20, %v6072_v35  ;;  %6752 = vmatmul.mubr.msk.f32.gmra.mrb[240].mxu0 %vm925_vm3, %v6071_v42 }
 0x731   : > { %6105 = vmatpush3.bf16.msra.mxu0 %v7367_v11  ;;  %6754 = vmatprep.mubr.msk.f32.mxu0 %vm7191_vm2, %v7192_v45 }
 0x732   : > { %6106 = vmatprep.subr.bf16.mxu0 %v7396_v58  ;;  %v7174_v58 = vld [vmem:[%s8870_s2 + $0x35c] ss:$8 sps:$4 sm:$0xff]  }
 0x734   : > { %v6075_v6 = vpop.f32.mrb[232].mxu1  ;;  %6755 = vmatmul.mubr.msk.f32.gmra.mrb[242].mxu0 %vm925_vm3, %v6074_v1 }
 0x735   : > { %6107 = vmatpush3.bf16.msra.mxu0 %v7369_v16  ;;  %v6076_v47 = vpop.f32.mrb[233].mxu1  ;;  %6757 = vmatprep.mubr.msk.f32.mxu0 %vm7191_vm2, %v7192_v45  ;;  %v7171_v16 = vld [vmem:[%s8870_s2 + $0x348] ss:$8 sps:$4 sm:$0xff]  }
 0x736   : > { %v6077_v22 = vadd.f32 %v6076_v47, %v6075_v6  ;;  %6108 = vmatprep.subr.bf16.mxu0 %v7400_v0  ;;  %v6078_v11 = vpop.f32.mrb[234].mxu1  ;;  %v7176_v0 = vld [vmem:[%s8870_s2 + $0x358] ss:$8 sps:$4 sm:$0xff]  }
 0x737   : > { %v6079_v39 = vpop.f32.mrb[235].mxu1 }
 0x738   : > { %6758 = vmatmul.mubr.msk.f32.gmra.mrb[244].mxu0 %vm925_vm3, %v6077_v22 }
 0x739   : > { %6109 = vmatpush3.bf16.msra.mxu0 %v7371_v21  ;;  %4443 = vmatprep.mubr.bf16.mxu0 %v7173_v52  ;;  %v7179_v21 = vld [vmem:[%s8870_s2 + $0x36c] ss:$8 sps:$4 sm:$0xff]  }
 0x73a   : > { %6110 = vmatprep.subr.bf16.mxu0 %v7404_v7  ;;  %v7177_v7 = vld [vmem:[%s8870_s2 + $0x368] ss:$8 sps:$4 sm:$0xff]  }
 0x73d   : > { %6111 = vmatpush3.bf16.msra.mxu0 %v7373_v26  ;;  %v5209_v26 = vld [vmem:[%s8870_s2 + $0x378] sm:$0x11] }
 0x73e   : > { %v5217_v24 = vcombine.high %v5209_v26, %v5209_v26  ;;  %v5216_v25 = vcombine.low %v5209_v26, %v5209_v26 }
 0x740   : > { %4444 = vmatmul.mubr.bf16.vlgmr.msra.gmra.mrb[248].mxu0 %v7171_v16 }
 0x741   : > { %4451 = vmatprep.mubr.bf16.mxu0 %v7174_v58 }
 0x748   : > { %4452 = vmatmul.mubr.bf16.gmra.mrb[252].mxu0 %v7176_v0 }
 0x749   : > { %4459 = vmatprep.mubr.bf16.mxu0 %v7179_v21 }
 0x750   : > { %4460 = vmatmul.mubr.bf16.gmra.mrb[0].mxu0 %v7177_v7 }
 0x751   : > { %4467 = vmatprep.mubr.bf16.mxu0 %v5217_v24 }
 0x758   : > { %4468 = vmatmul.mubr.bf16.gmra.mrb[4].mxu0 %v5216_v25 }
 0x7d3   : > { %v4079_v30 = vpop.f32.mrb[186].mxu0 }
 0x7d4   : > { %v4113_v2 = vadd.f32 %v4079_v30, %v8649_v38  ;;  %v6704_v46 = vpop.f32.mrb[187].mxu0 }
 0x7d7   : > { %v4084_v49 = vpop.f32.mrb[220].mxu0 }
 0x7d8   : > { %v4114_v50 = vadd.f32 %v4084_v49, %v8651_v43  ;;  %v6707_v54 = vpop.f32.mrb[221].mxu0  ;;  %v5233_v49 = vld [vmem:[%s8872_s4] ss:$0 sm:$0xff] }
 0x7db   : > { %v4089_v56 = vpop.f32.mrb[222].mxu0 }
 0x7dc   : > { %v4115_v40 = vadd.f32 %v4089_v56, %v8653_v53  ;;  %v6710_v61 = vpop.f32.mrb[223].mxu0 }
 0x7df   : > { %v4094_v57 = vpop.f32.mrb[224].mxu0 }
 0x7e0   : > { %v4116_v63 = vadd.f32 %v4094_v57, %v8655_v62  ;;  %v6713_v3 = vpop.f32.mrb[225].mxu0 }
 0x7e3   : > { %v4099_v31 = vpop.f32.mrb[226].mxu0 }
 0x7e4   : > { %v4117_v5 = vadd.f32 %v4099_v31, %v8657_v4  ;;  %v6716_v9 = vpop.f32.mrb[227].mxu0  ;;  %v4634_v31 = vld [vmem:[%s8873_s5 + $0x8] sm:$0xff] }
 0x7e7   : > { %v4104_v10 = vpop.f32.mrb[228].mxu0 }
 0x7e8   : > { %v4118_v38 = vadd.f32 %v4104_v10, %v8659_v8  ;;  %v6719_v29 = vpop.f32.mrb[229].mxu0 }
 0x7eb   : > { %v4109_v13 = vpop.f32.mrb[230].mxu0 }
 0x7ec   : > { %v4119_v43 = vadd.f32 %v4109_v13, %v8661_v12  ;;  %v6722_v14 = vpop.f32.mrb[231].mxu0 }
 0x7ed   : > { %v4635_v14 = vld [vmem:[%s8873_s5 + $0x10] sm:$0xff] }
 0x7f3   : > { %v4325_v15 = vpop.f32.mrb[232].mxu0 }
 0x7f4   : > { %v4359_v17 = vadd.f32 %v4325_v15, %v4113_v2  ;;  %v6741_v53 = vpop.f32.mrb[233].mxu0 }
 0x7f7   : > { %v4330_v18 = vpop.f32.mrb[234].mxu0 }
 0x7f8   : > { %v4360_v19 = vadd.f32 %v4330_v18, %v4114_v50  ;;  %v6744_v55 = vpop.f32.mrb[235].mxu0 }
 0x7fb   : > { %v4335_v62 = vpop.f32.mrb[236].mxu0 }
 0x7fc   : > { %v8801_v60 = vadd.f32 %v4335_v62, %v4115_v40  ;;  %v6747_v36 = vpop.f32.mrb[237].mxu0 }
 0x7ff   : > { %v4340_v4 = vpop.f32.mrb[238].mxu0 }
 0x800   : > { %v8803_v42 = vadd.f32 %v4340_v4, %v4116_v63  ;;  %v6750_v35 = vpop.f32.mrb[239].mxu0 }
 0x803   : > { %v4345_v8 = vpop.f32.mrb[240].mxu0 }
 0x804   : > { %v8805_v20 = vadd.f32 %v4345_v8, %v4117_v5  ;;  %v6753_v1 = vpop.f32.mrb[241].mxu0 }
 0x807   : > { %v4350_v12 = vpop.f32.mrb[242].mxu0 }
 0x808   : > { %v8807_v6 = vadd.f32 %v4350_v12, %v4118_v38  ;;  %v6756_v47 = vpop.f32.mrb[243].mxu0 }
 0x80b   : > { %v4355_v52 = vpop.f32.mrb[244].mxu0 }
 0x80c   : > { %v8809_v22 = vadd.f32 %v4355_v52, %v4119_v43  ;;  %v6759_v11 = vpop.f32.mrb[245].mxu0  ;;  %v4637_v52 = vld [vmem:[%s8873_s5 + $0x20] sm:$0xff] }
 0x813   : > { %v6112_v39 = vpop.f32.mrb[248].mxu0 }
 0x814   : > { %v6113_v16 = vpop.f32.mrb[249].mxu0 }
 0x815   : > { %v6114_v58 = vadd.f32 %v6113_v16, %v6112_v39  ;;  %v6115_v0 = vpop.f32.mrb[250].mxu0 }
 0x816   : > { %v6116_v21 = vpop.f32.mrb[251].mxu0 }
 0x817   : > { %v6117_v26 = vadd.f32 %v6116_v21, %v6115_v0  ;;  %6777 = vmatmul.mubr.msk.f32.vlgmr.msra.gmra.mrb[236].mxu1 %vm925_vm3, %v6114_v58 }
 0x818   : > { %6779 = vmatprep.mubr.msk.f32.mxu1 %vm7191_vm2, %v7192_v45 }
 0x81b   : > { %v6118_v7 = vpop.f32.mrb[252].mxu0  ;;  %6780 = vmatmul.mubr.msk.f32.gmra.mrb[238].mxu1 %vm925_vm3, %v6117_v26  ;;  %v4638_v26 = vld [vmem:[%s8873_s5 + $0x28] sm:$0xff] }
 0x81c   : > { %v6119_v24 = vpop.f32.mrb[253].mxu0  ;;  %6782 = vmatprep.mubr.msk.f32.mxu1 %vm7191_vm2, %v7192_v45 }
 0x81d   : > { %v6120_v25 = vadd.f32 %v6119_v24, %v6118_v7  ;;  %v6121_v48 = vpop.f32.mrb[254].mxu0 }
 0x81e   : > { %v6122_v28 = vpop.f32.mrb[255].mxu0 }
 0x81f   : > { %v6123_v32 = vadd.f32 %v6122_v28, %v6121_v48  ;;  %6783 = vmatmul.mubr.msk.f32.gmra.mrb[240].mxu1 %vm925_vm3, %v6120_v25 }
 0x820   : > { %6785 = vmatprep.mubr.msk.f32.mxu1 %vm7191_vm2, %v7192_v45 }
 0x823   : > { %v6124_v23 = vpop.f32.mrb[0].mxu0  ;;  %6786 = vmatmul.mubr.msk.f32.gmra.mrb[242].mxu1 %vm925_vm3, %v6123_v32 }
 0x824   : > { %v6125_v51 = vpop.f32.mrb[1].mxu0  ;;  %6788 = vmatprep.mubr.msk.f32.mxu1 %vm7191_vm2, %v7192_v45 }
 0x825   : > { %v6126_v33 = vadd.f32 %v6125_v51, %v6124_v23  ;;  %v6127_v34 = vpop.f32.mrb[2].mxu0  ;;  %v4639_v23 = vld [vmem:[%s8873_s5 + $0x30] sm:$0x1] }
 0x826   : > { %v6128_v37 = vpop.f32.mrb[3].mxu0 }
 0x827   : > { %v6129_v59 = vadd.f32 %v6128_v37, %v6127_v34  ;;  %6789 = vmatmul.mubr.msk.f32.gmra.mrb[244].mxu1 %vm925_vm3, %v6126_v33 }
 0x828   : > { %6791 = vmatprep.mubr.msk.f32.mxu1 %vm7191_vm2, %v7192_v45 }
 0x82b   : > { %v6130_v27 = vpop.f32.mrb[4].mxu0  ;;  %6792 = vmatmul.mubr.msk.f32.gmra.mrb[246].mxu1 %vm925_vm3, %v6129_v59 }
 0x82c   : > { %v6131_v41 = vpop.f32.mrb[5].mxu0  ;;  %6794 = vmatprep.mubr.msk.f32.mxu1 %vm7191_vm2, %v7192_v45  ;;  %v4633_v45 = vld [vmem:[%s8873_s5] sm:$0xff] }
 0x82d   : > { %v6132_v44 = vadd.f32 %v6131_v41, %v6130_v27  ;;  %v6133_v30 = vpop.f32.mrb[6].mxu0 }
 0x82e   : > { %v6134_v2 = vpop.f32.mrb[7].mxu0 }
 0x82f   : > { %6795 = vmatmul.mubr.msk.f32.gmra.mrb[248].mxu1 %vm925_vm3, %v6132_v44  ;;  %v7193_v2 = vmov 0  }
 0x830   : > { %7005 = vset.pattern.permute.xlu0 %v7193_v2 }
 0x8ea   : > { %v4571_v46 = vpop.f32.mrb[236].mxu1 }
 0x8eb   : > { %v4605_v50 = vadd.f32 %v4571_v46, %v4359_v17  ;;  %v6778_v54 = vpop.f32.mrb[237].mxu1  ;;  %v4665_v46 = vlaneseq }
 0x8ed   : > { %v4619_v56 = vadd.f32 %v5233_v49, %v4605_v50  ;;  %v4662_v50 = vld [vmem:[#allocation2] sm:$0x1] }
 0x8ee   : > { %v4576_v40 = vpop.f32.mrb[238].mxu1 }
 0x8ef   : > { %v4606_v61 = vadd.f32 %v4576_v40, %v4360_v19  ;;  %v6781_v57 = vpop.f32.mrb[239].mxu1  ;;  %v4626_v63 = vmax.f32 %v4619_v56, 0.0 }
 0x8f1   : > { %v4620_v3 = vadd.f32 %v5233_v49, %v4606_v61  ;;  %v4640_v29 = vmul.f32 %v4633_v45, %v4626_v63 }
 0x8f2   : > { %v4581_v5 = vpop.f32.mrb[240].mxu1 }
 0x8f3   : > { %v4627_v9 = vmax.f32 %v4620_v3, 0.0  ;;  %v4607_v10 = vadd.f32 %v4581_v5, %v8801_v60  ;;  %v6784_v38 = vpop.f32.mrb[241].mxu1  ;;  %v4636_v60 = vld [vmem:[%s8873_s5 + $0x18] sm:$0xff] }
 0x8f5   : > { %v4641_v13 = vmul.f32 %v4634_v31, %v4627_v9  ;;  %v4621_v43 = vadd.f32 %v5233_v49, %v4607_v10 }
 0x8f6   : > { %v4586_v15 = vpop.f32.mrb[242].mxu1 }
 0x8f7   : > { %v4647_v17 = vadd.f32 %v4641_v13, %v4640_v29  ;;  %v4628_v53 = vmax.f32 %v4621_v43, 0.0  ;;  %v4608_v18 = vadd.f32 %v4586_v15, %v8803_v42  ;;  %v6787_v19 = vpop.f32.mrb[243].mxu1 }
 0x8f9   : > { %v4642_v55 = vmul.f32 %v4635_v14, %v4628_v53  ;;  %v4622_v62 = vadd.f32 %v5233_v49, %v4608_v18 }
 0x8fa   : > { %v4591_v36 = vpop.f32.mrb[244].mxu1 }
 0x8fb   : > { %v4648_v4 = vadd.f32 %v4647_v17, %v4642_v55  ;;  %v4629_v35 = vmax.f32 %v4622_v62, 0.0  ;;  %v4609_v8 = vadd.f32 %v4591_v36, %v8805_v20  ;;  %v6790_v1 = vpop.f32.mrb[245].mxu1 }
 0x8fd   : > { %v4643_v12 = vmul.f32 %v4636_v60, %v4629_v35  ;;  %v4623_v47 = vadd.f32 %v5233_v49, %v4609_v8 }
 0x8fe   : > { %v4596_v42 = vpop.f32.mrb[246].mxu1 }
 0x8ff   : > { %v4649_v11 = vadd.f32 %v4648_v4, %v4643_v12  ;;  %v4630_v39 = vmax.f32 %v4623_v47, 0.0  ;;  %v4610_v16 = vadd.f32 %v4596_v42, %v8807_v6  ;;  %v6793_v58 = vpop.f32.mrb[247].mxu1 }
 0x901   : > { %v4644_v0 = vmul.f32 %v4637_v52, %v4630_v39  ;;  %v4624_v21 = vadd.f32 %v5233_v49, %v4610_v16 }
 0x902   : > { %v4601_v20 = vpop.f32.mrb[248].mxu1 }
 0x903   : > { %v4650_v7 = vadd.f32 %v4649_v11, %v4644_v0  ;;  %v4631_v24 = vmax.f32 %v4624_v21, 0.0  ;;  %v4611_v25 = vadd.f32 %v4601_v20, %v8809_v22  ;;  %v6796_v48 = vpop.f32.mrb[249].mxu1 }
 0x905   : > { %v4645_v28 = vmul.f32 %v4638_v26, %v4631_v24  ;;  %v4625_v32 = vadd.f32 %v5233_v49, %v4611_v25  ;;  %v4666_v49 = vshrl.u32 %v4665_v46, 7 }
 0x907   : > { %v4651_v6 = vadd.f32 %v4650_v7, %v4645_v28  ;;  %v4632_v51 = vmax.f32 %v4625_v32, 0.0  ;;  %v4667_v54 = vsub.s32 0, %v4666_v49 }
 0x909   : > { %v4646_v33 = vmul.f32 %v4639_v23, %v4632_v51 }
 0x90b   : > { %v4652_v34 = vsel %vm414_vm0, %v4646_v33, 0.0 }
 0x90c   : > { %v4653_v37 = vadd.f32 %v4652_v34, %v4651_v6 }
 0x90e   : > { %v4654_v59 = vrot.slane %v4653_v37, 4 }
 0x910   : > { %v4655_v27 = vadd.f32 %v4654_v59, %v4653_v37 }
 0x912   : > { %v4656_v41 = vrot.slane %v4655_v27, 2 }
 0x914   : > { %v4657_v44 = vadd.f32 %v4656_v41, %v4655_v27 }
 0x916   : > { %v4658_v22 = vrot.slane %v4657_v44, 1 }
 0x918   : > { %v4659_v30 = vadd.f32 %v4658_v22, %v4657_v44 }
 0x91a   : > { %4660 = vadd.xlane.f32.xlu0 %v4659_v30 }
 0x9a7   : > { %v4661_v56 = vpop.xlane.xlu0 %4660 }
 0x9a8   : > { %v4663_v40 = vadd.f32 %v4662_v50, %v4661_v56 }
 0x9aa   : > { %v4668_v61 = vrot.slane %v4663_v40, %v4667_v54 }
 0x9ac   : > { %4670 = vperm.xlu0 %7005, %v4668_v61  }
 0xa2b   : > { %v4671_v57 = vpop.permute.xlu0 %4670 }
 0xa2c   : > { %4673 = vst [vmem:[%s280_s8] sm:$0xff] %v4671_v57 }
 0xa2d PF: > { %s19_s26 = sadd.s32 1, %s7188_s26  }
 0xa2e   : > { %p16_p5 = scmp.ge.s32.totalorder %s19_s26, 4  }
 0xa30   :  { %18 = sbr.rel (!%p16_p5) target bundleno = 3 (0x3), region = 108 }

</bundles_post_ra>
